<compile_context>
chip_gen: v6e
topology: v6e:2x2x1
jax: 0.10.0
libtpu: 0.0.40
codegen_flags: <defaults>
</compile_context>

<pallas_src>
import functools

import jax
import jax.numpy as jnp
from jax.experimental import pallas as pl
from jax.experimental.pallas import tpu as pltpu


def lstm_kernel(*refs, B, T, H, num_layers, sigm_out):
    """Fused bidirectional multi-layer LSTM forward + last-step fc.

    refs = (x_ref,
            [wih_f, whh_f, b_f, wih_b, whh_b, b_b] * num_layers,
            fcw_ref, fcb_ref, out_ref)

    x_ref:   (T*B, I)   time-major, flattened (row t*B + b)
    wih_*:   (I_l, 4H)  transposed input->gates weight (gates i,f,g,o)
    whh_*:   (H, 4H)    transposed hidden->gates weight
    b_*:     (1, 4H)    b_ih + b_hh
    fcw_ref: (2H, O)    transposed fc weight
    fcb_ref: (1, O)
    out_ref: (B, O)
    """
    x_ref = refs[0]
    layer_refs = refs[1:1 + 6 * num_layers]
    fcw_ref, fcb_ref, out_ref = refs[-3], refs[-2], refs[-1]

    def cell(gi, h, c, whh_ref):
        # gi: (B, 4H) precomputed input projection (+ bias); h, c: (B, H)
        gates = gi + jnp.dot(h, whh_ref[...], preferred_element_type=jnp.float32)
        i = jax.nn.sigmoid(gates[:, 0 * H:1 * H])
        f = jax.nn.sigmoid(gates[:, 1 * H:2 * H])
        g = jnp.tanh(gates[:, 2 * H:3 * H])
        o = jax.nn.sigmoid(gates[:, 3 * H:4 * H])
        c_new = f * c + i * g
        h_new = o * jnp.tanh(c_new)
        return h_new, c_new

    def input_proj(x_rows, wih_ref, b_ref):
        # One batched matmul for all supplied (timestep, batch) rows.
        return jnp.dot(x_rows, wih_ref[...],
                       preferred_element_type=jnp.float32) + b_ref[...]

    def run_direction(gi_all, whh_ref, reverse):
        h = jnp.zeros((B, H), jnp.float32)
        c = jnp.zeros((B, H), jnp.float32)
        outs = [None] * T
        order = range(T - 1, -1, -1) if reverse else range(T)
        for t in order:  # small static T -> unrolled
            gi = gi_all[t * B:(t + 1) * B, :]
            h, c = cell(gi, h, c, whh_ref)
            outs[t] = h
        return outs, h

    cur = x_ref[...].astype(jnp.float32)  # (T*B, I)
    last_cat = None
    for l in range(num_layers):
        wih_f, whh_f, b_f, wih_b, whh_b, b_b = layer_refs[6 * l:6 * l + 6]

        gi_f = input_proj(cur, wih_f, b_f)                 # (T*B, 4H), one matmul
        fwd_outs, h_fwd = run_direction(gi_f, whh_f, reverse=False)

        if l == num_layers - 1:
            # torch fc consumes out[:, -1, :]; the reverse direction's value at
            # the last time index is just its first step (zero initial state).
            gi_b_last = input_proj(cur[(T - 1) * B:T * B, :], wih_b, b_b)
            zeros = jnp.zeros((B, H), jnp.float32)
            h_bwd, _ = cell(gi_b_last, zeros, zeros, whh_b)
            last_cat = jnp.concatenate([h_fwd, h_bwd], axis=1)      # (B, 2H)
        else:
            gi_b = input_proj(cur, wih_b, b_b)             # (T*B, 4H), one matmul
            bwd_outs, _ = run_direction(gi_b, whh_b, reverse=True)
            fwd_seq = jnp.concatenate(fwd_outs, axis=0)    # (T*B, H)
            bwd_seq = jnp.concatenate(bwd_outs, axis=0)    # (T*B, H)
            cur = jnp.concatenate([fwd_seq, bwd_seq], axis=1)       # (T*B, 2H)

    res = jnp.dot(last_cat, fcw_ref[...],
                  preferred_element_type=jnp.float32) + fcb_ref[...]
    if sigm_out:
        res = jax.nn.sigmoid(res)
    out_ref[...] = res.astype(out_ref.dtype)  # single lane-dense full-tile store


def lstm_forward(x, lstm_params, fc_w, fc_b, *, hidden_size, num_layers,
                 sigm_out=False):
    """x: (B, T, input_size) -> (B, output_size), matching the torch module."""
    B, T, I = x.shape
    H = hidden_size
    O = fc_w.shape[0]

    # Plain-JAX layout plumbing: time-major flatten + weight transposes.
    x_tm = jnp.transpose(x, (1, 0, 2)).reshape(T * B, I)

    args = [x_tm]
    for layer in lstm_params:
        for d in ("f", "b"):
            wih = layer[f"wih_{d}"]                       # (4H, I_l)
            whh = layer[f"whh_{d}"]                       # (4H, H)
            bih = layer[f"bih_{d}"]
            bhh = layer[f"bhh_{d}"]
            args.append(wih.T)                            # (I_l, 4H)
            args.append(whh.T)                            # (H, 4H)
            args.append((bih + bhh).reshape(1, -1))       # (1, 4H)
    args.append(fc_w.T)                                   # (2H, O)
    args.append(fc_b.reshape(1, -1))                      # (1, O)

    def full_spec(a):
        nd = a.ndim
        return pl.BlockSpec(a.shape, lambda i, _nd=nd: (0,) * _nd)

    return pl.pallas_call(
        functools.partial(lstm_kernel, B=B, T=T, H=H,
                          num_layers=num_layers, sigm_out=sigm_out),
        out_shape=jax.ShapeDtypeStruct((B, O), x.dtype),
        grid=(1,),
        in_specs=[full_spec(a) for a in args],
        out_specs=pl.BlockSpec((B, O), lambda i: (0, 0)),
        compiler_params=pltpu.CompilerParams(dimension_semantics=("arbitrary",)),
    )(*args)


def ref_forward(x, lstm_params, fc_w, fc_b, *, hidden_size, num_layers,
                sigm_out=False):
    """Pure-JAX reference of the PyTorch forward (bidirectional nn.LSTM + fc)."""
    B, T, _ = x.shape
    H = hidden_size

    def cell(x_t, h, c, wih, whh, bih, bhh):
        gates = x_t @ wih.T + bih + h @ whh.T + bhh
        i = jax.nn.sigmoid(gates[:, 0 * H:1 * H])
        f = jax.nn.sigmoid(gates[:, 1 * H:2 * H])
        g = jnp.tanh(gates[:, 2 * H:3 * H])
        o = jax.nn.sigmoid(gates[:, 3 * H:4 * H])
        c = f * c + i * g
        h = o * jnp.tanh(c)
        return h, c

    cur = x
    for layer in lstm_params:
        h = jnp.zeros((B, H), jnp.float32)
        c = jnp.zeros((B, H), jnp.float32)
        fwd = []
        for t in range(T):
            h, c = cell(cur[:, t], h, c, layer["wih_f"], layer["whh_f"],
                        layer["bih_f"], layer["bhh_f"])
            fwd.append(h)
        h = jnp.zeros((B, H), jnp.float32)
        c = jnp.zeros((B, H), jnp.float32)
        bwd = [None] * T
        for t in range(T - 1, -1, -1):
            h, c = cell(cur[:, t], h, c, layer["wih_b"], layer["whh_b"],
                        layer["bih_b"], layer["bhh_b"])
            bwd[t] = h
        cur = jnp.concatenate(
            [jnp.stack(fwd, axis=1), jnp.stack(bwd, axis=1)], axis=2)
    out = cur[:, -1, :] @ fc_w.T + fc_b
    if sigm_out:
        out = jax.nn.sigmoid(out)
    return out


if __name__ == "__main__":
    # Small shapes consistent with the module.
    input_size, hidden_size, num_layers, output_size = 4, 16, 2, 3
    B, T = 2, 8
    # TODO(synk): self.sigm_out is never set in the torch __init__ (forward
    # would raise AttributeError); modeled here as an explicit flag.
    sigm_out = True

    H = hidden_size
    key = jax.random.PRNGKey(0)
    keys = iter(jax.random.split(key, 1 + num_layers * 8 + 2))

    def uinit(k, shape, fan):
        bound = 1.0 / (fan ** 0.5)
        return jax.random.uniform(k, shape, jnp.float32, -bound, bound)

    # PyTorch nn.LSTM default init: U(-1/sqrt(H), 1/sqrt(H)) for all params.
    lstm_params = []
    for l in range(num_layers):
        in_l = input_size if l == 0 else 2 * hidden_size
        layer = {}
        for d in ("f", "b"):
            layer[f"wih_{d}"] = uinit(next(keys), (4 * H, in_l), H)
            layer[f"whh_{d}"] = uinit(next(keys), (4 * H, H), H)
            layer[f"bih_{d}"] = uinit(next(keys), (4 * H,), H)
            layer[f"bhh_{d}"] = uinit(next(keys), (4 * H,), H)
        lstm_params.append(layer)
    fc_w = uinit(next(keys), (output_size, 2 * H), 2 * H)
    fc_b = uinit(next(keys), (output_size,), 2 * H)

    x = jax.random.normal(next(keys), (B, T, input_size), jnp.float32)

    out = lstm_forward(x, lstm_params, fc_w, fc_b, hidden_size=hidden_size,
                       num_layers=num_layers, sigm_out=sigm_out)
    out = jax.block_until_ready(out)

    ref = ref_forward(x, lstm_params, fc_w, fc_b, hidden_size=hidden_size,
                      num_layers=num_layers, sigm_out=sigm_out)

    assert out.shape == (B, output_size), out.shape
    assert jnp.allclose(out, ref, atol=1e-4, rtol=1e-4), (out, ref)
    print("KERNEL_OK")
</pallas_src>

<mosaic_0001>
module attributes {stable_mosaic.version = 11 : i64} {
  func.func @lstm_kernel(%arg0: i32, %arg1: memref<16x4xf32, #tpu.memory_space<vmem>>, %arg2: memref<4x64xf32, #tpu.memory_space<vmem>>, %arg3: memref<16x64xf32, #tpu.memory_space<vmem>>, %arg4: memref<1x64xf32, #tpu.memory_space<vmem>>, %arg5: memref<4x64xf32, #tpu.memory_space<vmem>>, %arg6: memref<16x64xf32, #tpu.memory_space<vmem>>, %arg7: memref<1x64xf32, #tpu.memory_space<vmem>>, %arg8: memref<32x64xf32, #tpu.memory_space<vmem>>, %arg9: memref<16x64xf32, #tpu.memory_space<vmem>>, %arg10: memref<1x64xf32, #tpu.memory_space<vmem>>, %arg11: memref<32x64xf32, #tpu.memory_space<vmem>>, %arg12: memref<16x64xf32, #tpu.memory_space<vmem>>, %arg13: memref<1x64xf32, #tpu.memory_space<vmem>>, %arg14: memref<32x3xf32, #tpu.memory_space<vmem>>, %arg15: memref<1x3xf32, #tpu.memory_space<vmem>>, %arg16: memref<2x3xf32, #tpu.memory_space<vmem>>) attributes {dimension_semantics = [#tpu.dimension_semantics<arbitrary>], iteration_bounds = array<i64: 1>, scalar_prefetch = 0 : i64, scratch_operands = 0 : i64, tpu.core_type = #tpu.core_type<tc>, window_params = [{pipeline_mode = #tpu.pipeline_mode<synchronous>, transform_indices = @transform_0, window_bounds = array<i64: 16, 4>}, {pipeline_mode = #tpu.pipeline_mode<synchronous>, transform_indices = @transform_1, window_bounds = array<i64: 4, 64>}, {pipeline_mode = #tpu.pipeline_mode<synchronous>, transform_indices = @transform_2, window_bounds = array<i64: 16, 64>}, {pipeline_mode = #tpu.pipeline_mode<synchronous>, transform_indices = @transform_3, window_bounds = array<i64: 1, 64>}, {pipeline_mode = #tpu.pipeline_mode<synchronous>, transform_indices = @transform_4, window_bounds = array<i64: 4, 64>}, {pipeline_mode = #tpu.pipeline_mode<synchronous>, transform_indices = @transform_5, window_bounds = array<i64: 16, 64>}, {pipeline_mode = #tpu.pipeline_mode<synchronous>, transform_indices = @transform_6, window_bounds = array<i64: 1, 64>}, {pipeline_mode = #tpu.pipeline_mode<synchronous>, transform_indices = @transform_7, window_bounds = array<i64: 32, 64>}, {pipeline_mode = #tpu.pipeline_mode<synchronous>, transform_indices = @transform_8, window_bounds = array<i64: 16, 64>}, {pipeline_mode = #tpu.pipeline_mode<synchronous>, transform_indices = @transform_9, window_bounds = array<i64: 1, 64>}, {pipeline_mode = #tpu.pipeline_mode<synchronous>, transform_indices = @transform_10, window_bounds = array<i64: 32, 64>}, {pipeline_mode = #tpu.pipeline_mode<synchronous>, transform_indices = @transform_11, window_bounds = array<i64: 16, 64>}, {pipeline_mode = #tpu.pipeline_mode<synchronous>, transform_indices = @transform_12, window_bounds = array<i64: 1, 64>}, {pipeline_mode = #tpu.pipeline_mode<synchronous>, transform_indices = @transform_13, window_bounds = array<i64: 32, 3>}, {pipeline_mode = #tpu.pipeline_mode<synchronous>, transform_indices = @transform_14, window_bounds = array<i64: 1, 3>}, {pipeline_mode = #tpu.pipeline_mode<synchronous>, transform_indices = @transform_15, window_bounds = array<i64: 2, 3>}]} {
    %c0 = arith.constant 0 : index
    %c0_0 = arith.constant 0 : index
    %0 = vector.load %arg1[%c0, %c0_0] : memref<16x4xf32, #tpu.memory_space<vmem>>, vector<16x4xf32>
    %c0_1 = arith.constant 0 : index
    %c0_2 = arith.constant 0 : index
    %1 = vector.load %arg2[%c0_1, %c0_2] : memref<4x64xf32, #tpu.memory_space<vmem>>, vector<4x64xf32>
    %cst = arith.constant dense<0.000000e+00> : vector<16x64xf32>
    %2 = tpu.matmul %0, %1, %cst {dimension_numbers = #tpu.dot_dimension_numbers<[1], [0], [0], [1], [0, 0, 1, 1], [], []>} : vector<16x4xf32>, vector<4x64xf32>, vector<16x64xf32> -> vector<16x64xf32>
    %c0_3 = arith.constant 0 : index
    %c0_4 = arith.constant 0 : index
    %3 = vector.load %arg4[%c0_3, %c0_4] : memref<1x64xf32, #tpu.memory_space<vmem>>, vector<1x64xf32>
    %4 = vector.broadcast %3 : vector<1x64xf32> to vector<16x64xf32>
    %5 = arith.addf %2, %4 : vector<16x64xf32>
    %cst_5 = arith.constant 0.000000e+00 : f32
    %6 = vector.broadcast %cst_5 : f32 to vector<2x16xf32>
    %cst_6 = arith.constant 0.000000e+00 : f32
    %7 = vector.broadcast %cst_6 : f32 to vector<2x16xf32>
    %8 = vector.extract_strided_slice %5 {offsets = [0, 0], sizes = [2, 64], strides = [1, 1]} : vector<16x64xf32> to vector<2x64xf32>
    %c0_7 = arith.constant 0 : index
    %c0_8 = arith.constant 0 : index
    %9 = vector.load %arg3[%c0_7, %c0_8] : memref<16x64xf32, #tpu.memory_space<vmem>>, vector<16x64xf32>
    %cst_9 = arith.constant dense<0.000000e+00> : vector<2x64xf32>
    %10 = tpu.matmul %6, %9, %cst_9 {dimension_numbers = #tpu.dot_dimension_numbers<[1], [0], [0], [1], [0, 0, 1, 1], [], []>} : vector<2x16xf32>, vector<16x64xf32>, vector<2x64xf32> -> vector<2x64xf32>
    %11 = arith.addf %8, %10 : vector<2x64xf32>
    %12 = vector.extract_strided_slice %11 {offsets = [0, 0], sizes = [2, 16], strides = [1, 1]} : vector<2x64xf32> to vector<2x16xf32>
    %13 = arith.negf %12 : vector<2x16xf32>
    %14 = math.exp %13 : vector<2x16xf32>
    %cst_10 = arith.constant 1.000000e+00 : f32
    %15 = vector.broadcast %cst_10 : f32 to vector<2x16xf32>
    %16 = arith.addf %15, %14 : vector<2x16xf32>
    %17 = arith.divf %15, %16 : vector<2x16xf32>
    %18 = vector.extract_strided_slice %11 {offsets = [0, 16], sizes = [2, 16], strides = [1, 1]} : vector<2x64xf32> to vector<2x16xf32>
    %19 = arith.negf %18 : vector<2x16xf32>
    %20 = math.exp %19 : vector<2x16xf32>
    %cst_11 = arith.constant 1.000000e+00 : f32
    %21 = vector.broadcast %cst_11 : f32 to vector<2x16xf32>
    %22 = arith.addf %21, %20 : vector<2x16xf32>
    %23 = arith.divf %21, %22 : vector<2x16xf32>
    %24 = vector.extract_strided_slice %11 {offsets = [0, 32], sizes = [2, 16], strides = [1, 1]} : vector<2x64xf32> to vector<2x16xf32>
    %25 = math.tanh %24 : vector<2x16xf32>
    %26 = vector.extract_strided_slice %11 {offsets = [0, 48], sizes = [2, 16], strides = [1, 1]} : vector<2x64xf32> to vector<2x16xf32>
    %27 = arith.negf %26 : vector<2x16xf32>
    %28 = math.exp %27 : vector<2x16xf32>
    %cst_12 = arith.constant 1.000000e+00 : f32
    %29 = vector.broadcast %cst_12 : f32 to vector<2x16xf32>
    %30 = arith.addf %29, %28 : vector<2x16xf32>
    %31 = arith.divf %29, %30 : vector<2x16xf32>
    %32 = arith.mulf %23, %7 : vector<2x16xf32>
    %33 = arith.mulf %17, %25 : vector<2x16xf32>
    %34 = arith.addf %32, %33 : vector<2x16xf32>
    %35 = math.tanh %34 : vector<2x16xf32>
    %36 = arith.mulf %31, %35 : vector<2x16xf32>
    %37 = vector.extract_strided_slice %5 {offsets = [2, 0], sizes = [2, 64], strides = [1, 1]} : vector<16x64xf32> to vector<2x64xf32>
    %c0_13 = arith.constant 0 : index
    %c0_14 = arith.constant 0 : index
    %38 = vector.load %arg3[%c0_13, %c0_14] : memref<16x64xf32, #tpu.memory_space<vmem>>, vector<16x64xf32>
    %cst_15 = arith.constant dense<0.000000e+00> : vector<2x64xf32>
    %39 = tpu.matmul %36, %38, %cst_15 {dimension_numbers = #tpu.dot_dimension_numbers<[1], [0], [0], [1], [0, 0, 1, 1], [], []>} : vector<2x16xf32>, vector<16x64xf32>, vector<2x64xf32> -> vector<2x64xf32>
    %40 = arith.addf %37, %39 : vector<2x64xf32>
    %41 = vector.extract_strided_slice %40 {offsets = [0, 0], sizes = [2, 16], strides = [1, 1]} : vector<2x64xf32> to vector<2x16xf32>
    %42 = arith.negf %41 : vector<2x16xf32>
    %43 = math.exp %42 : vector<2x16xf32>
    %cst_16 = arith.constant 1.000000e+00 : f32
    %44 = vector.broadcast %cst_16 : f32 to vector<2x16xf32>
    %45 = arith.addf %44, %43 : vector<2x16xf32>
    %46 = arith.divf %44, %45 : vector<2x16xf32>
    %47 = vector.extract_strided_slice %40 {offsets = [0, 16], sizes = [2, 16], strides = [1, 1]} : vector<2x64xf32> to vector<2x16xf32>
    %48 = arith.negf %47 : vector<2x16xf32>
    %49 = math.exp %48 : vector<2x16xf32>
    %cst_17 = arith.constant 1.000000e+00 : f32
    %50 = vector.broadcast %cst_17 : f32 to vector<2x16xf32>
    %51 = arith.addf %50, %49 : vector<2x16xf32>
    %52 = arith.divf %50, %51 : vector<2x16xf32>
    %53 = vector.extract_strided_slice %40 {offsets = [0, 32], sizes = [2, 16], strides = [1, 1]} : vector<2x64xf32> to vector<2x16xf32>
    %54 = math.tanh %53 : vector<2x16xf32>
    %55 = vector.extract_strided_slice %40 {offsets = [0, 48], sizes = [2, 16], strides = [1, 1]} : vector<2x64xf32> to vector<2x16xf32>
    %56 = arith.negf %55 : vector<2x16xf32>
    %57 = math.exp %56 : vector<2x16xf32>
    %cst_18 = arith.constant 1.000000e+00 : f32
    %58 = vector.broadcast %cst_18 : f32 to vector<2x16xf32>
    %59 = arith.addf %58, %57 : vector<2x16xf32>
    %60 = arith.divf %58, %59 : vector<2x16xf32>
    %61 = arith.mulf %52, %34 : vector<2x16xf32>
    %62 = arith.mulf %46, %54 : vector<2x16xf32>
    %63 = arith.addf %61, %62 : vector<2x16xf32>
    %64 = math.tanh %63 : vector<2x16xf32>
    %65 = arith.mulf %60, %64 : vector<2x16xf32>
    %66 = vector.extract_strided_slice %5 {offsets = [4, 0], sizes = [2, 64], strides = [1, 1]} : vector<16x64xf32> to vector<2x64xf32>
    %c0_19 = arith.constant 0 : index
    %c0_20 = arith.constant 0 : index
    %67 = vector.load %arg3[%c0_19, %c0_20] : memref<16x64xf32, #tpu.memory_space<vmem>>, vector<16x64xf32>
    %cst_21 = arith.constant dense<0.000000e+00> : vector<2x64xf32>
    %68 = tpu.matmul %65, %67, %cst_21 {dimension_numbers = #tpu.dot_dimension_numbers<[1], [0], [0], [1], [0, 0, 1, 1], [], []>} : vector<2x16xf32>, vector<16x64xf32>, vector<2x64xf32> -> vector<2x64xf32>
    %69 = arith.addf %66, %68 : vector<2x64xf32>
    %70 = vector.extract_strided_slice %69 {offsets = [0, 0], sizes = [2, 16], strides = [1, 1]} : vector<2x64xf32> to vector<2x16xf32>
    %71 = arith.negf %70 : vector<2x16xf32>
    %72 = math.exp %71 : vector<2x16xf32>
    %cst_22 = arith.constant 1.000000e+00 : f32
    %73 = vector.broadcast %cst_22 : f32 to vector<2x16xf32>
    %74 = arith.addf %73, %72 : vector<2x16xf32>
    %75 = arith.divf %73, %74 : vector<2x16xf32>
    %76 = vector.extract_strided_slice %69 {offsets = [0, 16], sizes = [2, 16], strides = [1, 1]} : vector<2x64xf32> to vector<2x16xf32>
    %77 = arith.negf %76 : vector<2x16xf32>
    %78 = math.exp %77 : vector<2x16xf32>
    %cst_23 = arith.constant 1.000000e+00 : f32
    %79 = vector.broadcast %cst_23 : f32 to vector<2x16xf32>
    %80 = arith.addf %79, %78 : vector<2x16xf32>
    %81 = arith.divf %79, %80 : vector<2x16xf32>
    %82 = vector.extract_strided_slice %69 {offsets = [0, 32], sizes = [2, 16], strides = [1, 1]} : vector<2x64xf32> to vector<2x16xf32>
    %83 = math.tanh %82 : vector<2x16xf32>
    %84 = vector.extract_strided_slice %69 {offsets = [0, 48], sizes = [2, 16], strides = [1, 1]} : vector<2x64xf32> to vector<2x16xf32>
    %85 = arith.negf %84 : vector<2x16xf32>
    %86 = math.exp %85 : vector<2x16xf32>
    %cst_24 = arith.constant 1.000000e+00 : f32
    %87 = vector.broadcast %cst_24 : f32 to vector<2x16xf32>
    %88 = arith.addf %87, %86 : vector<2x16xf32>
    %89 = arith.divf %87, %88 : vector<2x16xf32>
    %90 = arith.mulf %81, %63 : vector<2x16xf32>
    %91 = arith.mulf %75, %83 : vector<2x16xf32>
    %92 = arith.addf %90, %91 : vector<2x16xf32>
    %93 = math.tanh %92 : vector<2x16xf32>
    %94 = arith.mulf %89, %93 : vector<2x16xf32>
    %95 = vector.extract_strided_slice %5 {offsets = [6, 0], sizes = [2, 64], strides = [1, 1]} : vector<16x64xf32> to vector<2x64xf32>
    %c0_25 = arith.constant 0 : index
    %c0_26 = arith.constant 0 : index
    %96 = vector.load %arg3[%c0_25, %c0_26] : memref<16x64xf32, #tpu.memory_space<vmem>>, vector<16x64xf32>
    %cst_27 = arith.constant dense<0.000000e+00> : vector<2x64xf32>
    %97 = tpu.matmul %94, %96, %cst_27 {dimension_numbers = #tpu.dot_dimension_numbers<[1], [0], [0], [1], [0, 0, 1, 1], [], []>} : vector<2x16xf32>, vector<16x64xf32>, vector<2x64xf32> -> vector<2x64xf32>
    %98 = arith.addf %95, %97 : vector<2x64xf32>
    %99 = vector.extract_strided_slice %98 {offsets = [0, 0], sizes = [2, 16], strides = [1, 1]} : vector<2x64xf32> to vector<2x16xf32>
    %100 = arith.negf %99 : vector<2x16xf32>
    %101 = math.exp %100 : vector<2x16xf32>
    %cst_28 = arith.constant 1.000000e+00 : f32
    %102 = vector.broadcast %cst_28 : f32 to vector<2x16xf32>
    %103 = arith.addf %102, %101 : vector<2x16xf32>
    %104 = arith.divf %102, %103 : vector<2x16xf32>
    %105 = vector.extract_strided_slice %98 {offsets = [0, 16], sizes = [2, 16], strides = [1, 1]} : vector<2x64xf32> to vector<2x16xf32>
    %106 = arith.negf %105 : vector<2x16xf32>
    %107 = math.exp %106 : vector<2x16xf32>
    %cst_29 = arith.constant 1.000000e+00 : f32
    %108 = vector.broadcast %cst_29 : f32 to vector<2x16xf32>
    %109 = arith.addf %108, %107 : vector<2x16xf32>
    %110 = arith.divf %108, %109 : vector<2x16xf32>
    %111 = vector.extract_strided_slice %98 {offsets = [0, 32], sizes = [2, 16], strides = [1, 1]} : vector<2x64xf32> to vector<2x16xf32>
    %112 = math.tanh %111 : vector<2x16xf32>
    %113 = vector.extract_strided_slice %98 {offsets = [0, 48], sizes = [2, 16], strides = [1, 1]} : vector<2x64xf32> to vector<2x16xf32>
    %114 = arith.negf %113 : vector<2x16xf32>
    %115 = math.exp %114 : vector<2x16xf32>
    %cst_30 = arith.constant 1.000000e+00 : f32
    %116 = vector.broadcast %cst_30 : f32 to vector<2x16xf32>
    %117 = arith.addf %116, %115 : vector<2x16xf32>
    %118 = arith.divf %116, %117 : vector<2x16xf32>
    %119 = arith.mulf %110, %92 : vector<2x16xf32>
    %120 = arith.mulf %104, %112 : vector<2x16xf32>
    %121 = arith.addf %119, %120 : vector<2x16xf32>
    %122 = math.tanh %121 : vector<2x16xf32>
    %123 = arith.mulf %118, %122 : vector<2x16xf32>
    %124 = vector.extract_strided_slice %5 {offsets = [8, 0], sizes = [2, 64], strides = [1, 1]} : vector<16x64xf32> to vector<2x64xf32>
    %c0_31 = arith.constant 0 : index
    %c0_32 = arith.constant 0 : index
    %125 = vector.load %arg3[%c0_31, %c0_32] : memref<16x64xf32, #tpu.memory_space<vmem>>, vector<16x64xf32>
    %cst_33 = arith.constant dense<0.000000e+00> : vector<2x64xf32>
    %126 = tpu.matmul %123, %125, %cst_33 {dimension_numbers = #tpu.dot_dimension_numbers<[1], [0], [0], [1], [0, 0, 1, 1], [], []>} : vector<2x16xf32>, vector<16x64xf32>, vector<2x64xf32> -> vector<2x64xf32>
    %127 = arith.addf %124, %126 : vector<2x64xf32>
    %128 = vector.extract_strided_slice %127 {offsets = [0, 0], sizes = [2, 16], strides = [1, 1]} : vector<2x64xf32> to vector<2x16xf32>
    %129 = arith.negf %128 : vector<2x16xf32>
    %130 = math.exp %129 : vector<2x16xf32>
    %cst_34 = arith.constant 1.000000e+00 : f32
    %131 = vector.broadcast %cst_34 : f32 to vector<2x16xf32>
    %132 = arith.addf %131, %130 : vector<2x16xf32>
    %133 = arith.divf %131, %132 : vector<2x16xf32>
    %134 = vector.extract_strided_slice %127 {offsets = [0, 16], sizes = [2, 16], strides = [1, 1]} : vector<2x64xf32> to vector<2x16xf32>
    %135 = arith.negf %134 : vector<2x16xf32>
    %136 = math.exp %135 : vector<2x16xf32>
    %cst_35 = arith.constant 1.000000e+00 : f32
    %137 = vector.broadcast %cst_35 : f32 to vector<2x16xf32>
    %138 = arith.addf %137, %136 : vector<2x16xf32>
    %139 = arith.divf %137, %138 : vector<2x16xf32>
    %140 = vector.extract_strided_slice %127 {offsets = [0, 32], sizes = [2, 16], strides = [1, 1]} : vector<2x64xf32> to vector<2x16xf32>
    %141 = math.tanh %140 : vector<2x16xf32>
    %142 = vector.extract_strided_slice %127 {offsets = [0, 48], sizes = [2, 16], strides = [1, 1]} : vector<2x64xf32> to vector<2x16xf32>
    %143 = arith.negf %142 : vector<2x16xf32>
    %144 = math.exp %143 : vector<2x16xf32>
    %cst_36 = arith.constant 1.000000e+00 : f32
    %145 = vector.broadcast %cst_36 : f32 to vector<2x16xf32>
    %146 = arith.addf %145, %144 : vector<2x16xf32>
    %147 = arith.divf %145, %146 : vector<2x16xf32>
    %148 = arith.mulf %139, %121 : vector<2x16xf32>
    %149 = arith.mulf %133, %141 : vector<2x16xf32>
    %150 = arith.addf %148, %149 : vector<2x16xf32>
    %151 = math.tanh %150 : vector<2x16xf32>
    %152 = arith.mulf %147, %151 : vector<2x16xf32>
    %153 = vector.extract_strided_slice %5 {offsets = [10, 0], sizes = [2, 64], strides = [1, 1]} : vector<16x64xf32> to vector<2x64xf32>
    %c0_37 = arith.constant 0 : index
    %c0_38 = arith.constant 0 : index
    %154 = vector.load %arg3[%c0_37, %c0_38] : memref<16x64xf32, #tpu.memory_space<vmem>>, vector<16x64xf32>
    %cst_39 = arith.constant dense<0.000000e+00> : vector<2x64xf32>
    %155 = tpu.matmul %152, %154, %cst_39 {dimension_numbers = #tpu.dot_dimension_numbers<[1], [0], [0], [1], [0, 0, 1, 1], [], []>} : vector<2x16xf32>, vector<16x64xf32>, vector<2x64xf32> -> vector<2x64xf32>
    %156 = arith.addf %153, %155 : vector<2x64xf32>
    %157 = vector.extract_strided_slice %156 {offsets = [0, 0], sizes = [2, 16], strides = [1, 1]} : vector<2x64xf32> to vector<2x16xf32>
    %158 = arith.negf %157 : vector<2x16xf32>
    %159 = math.exp %158 : vector<2x16xf32>
    %cst_40 = arith.constant 1.000000e+00 : f32
    %160 = vector.broadcast %cst_40 : f32 to vector<2x16xf32>
    %161 = arith.addf %160, %159 : vector<2x16xf32>
    %162 = arith.divf %160, %161 : vector<2x16xf32>
    %163 = vector.extract_strided_slice %156 {offsets = [0, 16], sizes = [2, 16], strides = [1, 1]} : vector<2x64xf32> to vector<2x16xf32>
    %164 = arith.negf %163 : vector<2x16xf32>
    %165 = math.exp %164 : vector<2x16xf32>
    %cst_41 = arith.constant 1.000000e+00 : f32
    %166 = vector.broadcast %cst_41 : f32 to vector<2x16xf32>
    %167 = arith.addf %166, %165 : vector<2x16xf32>
    %168 = arith.divf %166, %167 : vector<2x16xf32>
    %169 = vector.extract_strided_slice %156 {offsets = [0, 32], sizes = [2, 16], strides = [1, 1]} : vector<2x64xf32> to vector<2x16xf32>
    %170 = math.tanh %169 : vector<2x16xf32>
    %171 = vector.extract_strided_slice %156 {offsets = [0, 48], sizes = [2, 16], strides = [1, 1]} : vector<2x64xf32> to vector<2x16xf32>
    %172 = arith.negf %171 : vector<2x16xf32>
    %173 = math.exp %172 : vector<2x16xf32>
    %cst_42 = arith.constant 1.000000e+00 : f32
    %174 = vector.broadcast %cst_42 : f32 to vector<2x16xf32>
    %175 = arith.addf %174, %173 : vector<2x16xf32>
    %176 = arith.divf %174, %175 : vector<2x16xf32>
    %177 = arith.mulf %168, %150 : vector<2x16xf32>
    %178 = arith.mulf %162, %170 : vector<2x16xf32>
    %179 = arith.addf %177, %178 : vector<2x16xf32>
    %180 = math.tanh %179 : vector<2x16xf32>
    %181 = arith.mulf %176, %180 : vector<2x16xf32>
    %182 = vector.extract_strided_slice %5 {offsets = [12, 0], sizes = [2, 64], strides = [1, 1]} : vector<16x64xf32> to vector<2x64xf32>
    %c0_43 = arith.constant 0 : index
    %c0_44 = arith.constant 0 : index
    %183 = vector.load %arg3[%c0_43, %c0_44] : memref<16x64xf32, #tpu.memory_space<vmem>>, vector<16x64xf32>
    %cst_45 = arith.constant dense<0.000000e+00> : vector<2x64xf32>
    %184 = tpu.matmul %181, %183, %cst_45 {dimension_numbers = #tpu.dot_dimension_numbers<[1], [0], [0], [1], [0, 0, 1, 1], [], []>} : vector<2x16xf32>, vector<16x64xf32>, vector<2x64xf32> -> vector<2x64xf32>
    %185 = arith.addf %182, %184 : vector<2x64xf32>
    %186 = vector.extract_strided_slice %185 {offsets = [0, 0], sizes = [2, 16], strides = [1, 1]} : vector<2x64xf32> to vector<2x16xf32>
    %187 = arith.negf %186 : vector<2x16xf32>
    %188 = math.exp %187 : vector<2x16xf32>
    %cst_46 = arith.constant 1.000000e+00 : f32
    %189 = vector.broadcast %cst_46 : f32 to vector<2x16xf32>
    %190 = arith.addf %189, %188 : vector<2x16xf32>
    %191 = arith.divf %189, %190 : vector<2x16xf32>
    %192 = vector.extract_strided_slice %185 {offsets = [0, 16], sizes = [2, 16], strides = [1, 1]} : vector<2x64xf32> to vector<2x16xf32>
    %193 = arith.negf %192 : vector<2x16xf32>
    %194 = math.exp %193 : vector<2x16xf32>
    %cst_47 = arith.constant 1.000000e+00 : f32
    %195 = vector.broadcast %cst_47 : f32 to vector<2x16xf32>
    %196 = arith.addf %195, %194 : vector<2x16xf32>
    %197 = arith.divf %195, %196 : vector<2x16xf32>
    %198 = vector.extract_strided_slice %185 {offsets = [0, 32], sizes = [2, 16], strides = [1, 1]} : vector<2x64xf32> to vector<2x16xf32>
    %199 = math.tanh %198 : vector<2x16xf32>
    %200 = vector.extract_strided_slice %185 {offsets = [0, 48], sizes = [2, 16], strides = [1, 1]} : vector<2x64xf32> to vector<2x16xf32>
    %201 = arith.negf %200 : vector<2x16xf32>
    %202 = math.exp %201 : vector<2x16xf32>
    %cst_48 = arith.constant 1.000000e+00 : f32
    %203 = vector.broadcast %cst_48 : f32 to vector<2x16xf32>
    %204 = arith.addf %203, %202 : vector<2x16xf32>
    %205 = arith.divf %203, %204 : vector<2x16xf32>
    %206 = arith.mulf %197, %179 : vector<2x16xf32>
    %207 = arith.mulf %191, %199 : vector<2x16xf32>
    %208 = arith.addf %206, %207 : vector<2x16xf32>
    %209 = math.tanh %208 : vector<2x16xf32>
    %210 = arith.mulf %205, %209 : vector<2x16xf32>
    %211 = vector.extract_strided_slice %5 {offsets = [14, 0], sizes = [2, 64], strides = [1, 1]} : vector<16x64xf32> to vector<2x64xf32>
    %c0_49 = arith.constant 0 : index
    %c0_50 = arith.constant 0 : index
    %212 = vector.load %arg3[%c0_49, %c0_50] : memref<16x64xf32, #tpu.memory_space<vmem>>, vector<16x64xf32>
    %cst_51 = arith.constant dense<0.000000e+00> : vector<2x64xf32>
    %213 = tpu.matmul %210, %212, %cst_51 {dimension_numbers = #tpu.dot_dimension_numbers<[1], [0], [0], [1], [0, 0, 1, 1], [], []>} : vector<2x16xf32>, vector<16x64xf32>, vector<2x64xf32> -> vector<2x64xf32>
    %214 = arith.addf %211, %213 : vector<2x64xf32>
    %215 = vector.extract_strided_slice %214 {offsets = [0, 0], sizes = [2, 16], strides = [1, 1]} : vector<2x64xf32> to vector<2x16xf32>
    %216 = arith.negf %215 : vector<2x16xf32>
    %217 = math.exp %216 : vector<2x16xf32>
    %cst_52 = arith.constant 1.000000e+00 : f32
    %218 = vector.broadcast %cst_52 : f32 to vector<2x16xf32>
    %219 = arith.addf %218, %217 : vector<2x16xf32>
    %220 = arith.divf %218, %219 : vector<2x16xf32>
    %221 = vector.extract_strided_slice %214 {offsets = [0, 16], sizes = [2, 16], strides = [1, 1]} : vector<2x64xf32> to vector<2x16xf32>
    %222 = arith.negf %221 : vector<2x16xf32>
    %223 = math.exp %222 : vector<2x16xf32>
    %cst_53 = arith.constant 1.000000e+00 : f32
    %224 = vector.broadcast %cst_53 : f32 to vector<2x16xf32>
    %225 = arith.addf %224, %223 : vector<2x16xf32>
    %226 = arith.divf %224, %225 : vector<2x16xf32>
    %227 = vector.extract_strided_slice %214 {offsets = [0, 32], sizes = [2, 16], strides = [1, 1]} : vector<2x64xf32> to vector<2x16xf32>
    %228 = math.tanh %227 : vector<2x16xf32>
    %229 = vector.extract_strided_slice %214 {offsets = [0, 48], sizes = [2, 16], strides = [1, 1]} : vector<2x64xf32> to vector<2x16xf32>
    %230 = arith.negf %229 : vector<2x16xf32>
    %231 = math.exp %230 : vector<2x16xf32>
    %cst_54 = arith.constant 1.000000e+00 : f32
    %232 = vector.broadcast %cst_54 : f32 to vector<2x16xf32>
    %233 = arith.addf %232, %231 : vector<2x16xf32>
    %234 = arith.divf %232, %233 : vector<2x16xf32>
    %235 = arith.mulf %226, %208 : vector<2x16xf32>
    %236 = arith.mulf %220, %228 : vector<2x16xf32>
    %237 = arith.addf %235, %236 : vector<2x16xf32>
    %238 = math.tanh %237 : vector<2x16xf32>
    %239 = arith.mulf %234, %238 : vector<2x16xf32>
    %c0_55 = arith.constant 0 : index
    %c0_56 = arith.constant 0 : index
    %240 = vector.load %arg5[%c0_55, %c0_56] : memref<4x64xf32, #tpu.memory_space<vmem>>, vector<4x64xf32>
    %cst_57 = arith.constant dense<0.000000e+00> : vector<16x64xf32>
    %241 = tpu.matmul %0, %240, %cst_57 {dimension_numbers = #tpu.dot_dimension_numbers<[1], [0], [0], [1], [0, 0, 1, 1], [], []>} : vector<16x4xf32>, vector<4x64xf32>, vector<16x64xf32> -> vector<16x64xf32>
    %c0_58 = arith.constant 0 : index
    %c0_59 = arith.constant 0 : index
    %242 = vector.load %arg7[%c0_58, %c0_59] : memref<1x64xf32, #tpu.memory_space<vmem>>, vector<1x64xf32>
    %243 = vector.broadcast %242 : vector<1x64xf32> to vector<16x64xf32>
    %244 = arith.addf %241, %243 : vector<16x64xf32>
    %cst_60 = arith.constant 0.000000e+00 : f32
    %245 = vector.broadcast %cst_60 : f32 to vector<2x16xf32>
    %cst_61 = arith.constant 0.000000e+00 : f32
    %246 = vector.broadcast %cst_61 : f32 to vector<2x16xf32>
    %247 = vector.extract_strided_slice %244 {offsets = [14, 0], sizes = [2, 64], strides = [1, 1]} : vector<16x64xf32> to vector<2x64xf32>
    %c0_62 = arith.constant 0 : index
    %c0_63 = arith.constant 0 : index
    %248 = vector.load %arg6[%c0_62, %c0_63] : memref<16x64xf32, #tpu.memory_space<vmem>>, vector<16x64xf32>
    %cst_64 = arith.constant dense<0.000000e+00> : vector<2x64xf32>
    %249 = tpu.matmul %245, %248, %cst_64 {dimension_numbers = #tpu.dot_dimension_numbers<[1], [0], [0], [1], [0, 0, 1, 1], [], []>} : vector<2x16xf32>, vector<16x64xf32>, vector<2x64xf32> -> vector<2x64xf32>
    %250 = arith.addf %247, %249 : vector<2x64xf32>
    %251 = vector.extract_strided_slice %250 {offsets = [0, 0], sizes = [2, 16], strides = [1, 1]} : vector<2x64xf32> to vector<2x16xf32>
    %252 = arith.negf %251 : vector<2x16xf32>
    %253 = math.exp %252 : vector<2x16xf32>
    %cst_65 = arith.constant 1.000000e+00 : f32
    %254 = vector.broadcast %cst_65 : f32 to vector<2x16xf32>
    %255 = arith.addf %254, %253 : vector<2x16xf32>
    %256 = arith.divf %254, %255 : vector<2x16xf32>
    %257 = vector.extract_strided_slice %250 {offsets = [0, 16], sizes = [2, 16], strides = [1, 1]} : vector<2x64xf32> to vector<2x16xf32>
    %258 = arith.negf %257 : vector<2x16xf32>
    %259 = math.exp %258 : vector<2x16xf32>
    %cst_66 = arith.constant 1.000000e+00 : f32
    %260 = vector.broadcast %cst_66 : f32 to vector<2x16xf32>
    %261 = arith.addf %260, %259 : vector<2x16xf32>
    %262 = arith.divf %260, %261 : vector<2x16xf32>
    %263 = vector.extract_strided_slice %250 {offsets = [0, 32], sizes = [2, 16], strides = [1, 1]} : vector<2x64xf32> to vector<2x16xf32>
    %264 = math.tanh %263 : vector<2x16xf32>
    %265 = vector.extract_strided_slice %250 {offsets = [0, 48], sizes = [2, 16], strides = [1, 1]} : vector<2x64xf32> to vector<2x16xf32>
    %266 = arith.negf %265 : vector<2x16xf32>
    %267 = math.exp %266 : vector<2x16xf32>
    %cst_67 = arith.constant 1.000000e+00 : f32
    %268 = vector.broadcast %cst_67 : f32 to vector<2x16xf32>
    %269 = arith.addf %268, %267 : vector<2x16xf32>
    %270 = arith.divf %268, %269 : vector<2x16xf32>
    %271 = arith.mulf %262, %246 : vector<2x16xf32>
    %272 = arith.mulf %256, %264 : vector<2x16xf32>
    %273 = arith.addf %271, %272 : vector<2x16xf32>
    %274 = math.tanh %273 : vector<2x16xf32>
    %275 = arith.mulf %270, %274 : vector<2x16xf32>
    %276 = vector.extract_strided_slice %244 {offsets = [12, 0], sizes = [2, 64], strides = [1, 1]} : vector<16x64xf32> to vector<2x64xf32>
    %c0_68 = arith.constant 0 : index
    %c0_69 = arith.constant 0 : index
    %277 = vector.load %arg6[%c0_68, %c0_69] : memref<16x64xf32, #tpu.memory_space<vmem>>, vector<16x64xf32>
    %cst_70 = arith.constant dense<0.000000e+00> : vector<2x64xf32>
    %278 = tpu.matmul %275, %277, %cst_70 {dimension_numbers = #tpu.dot_dimension_numbers<[1], [0], [0], [1], [0, 0, 1, 1], [], []>} : vector<2x16xf32>, vector<16x64xf32>, vector<2x64xf32> -> vector<2x64xf32>
    %279 = arith.addf %276, %278 : vector<2x64xf32>
    %280 = vector.extract_strided_slice %279 {offsets = [0, 0], sizes = [2, 16], strides = [1, 1]} : vector<2x64xf32> to vector<2x16xf32>
    %281 = arith.negf %280 : vector<2x16xf32>
    %282 = math.exp %281 : vector<2x16xf32>
    %cst_71 = arith.constant 1.000000e+00 : f32
    %283 = vector.broadcast %cst_71 : f32 to vector<2x16xf32>
    %284 = arith.addf %283, %282 : vector<2x16xf32>
    %285 = arith.divf %283, %284 : vector<2x16xf32>
    %286 = vector.extract_strided_slice %279 {offsets = [0, 16], sizes = [2, 16], strides = [1, 1]} : vector<2x64xf32> to vector<2x16xf32>
    %287 = arith.negf %286 : vector<2x16xf32>
    %288 = math.exp %287 : vector<2x16xf32>
    %cst_72 = arith.constant 1.000000e+00 : f32
    %289 = vector.broadcast %cst_72 : f32 to vector<2x16xf32>
    %290 = arith.addf %289, %288 : vector<2x16xf32>
    %291 = arith.divf %289, %290 : vector<2x16xf32>
    %292 = vector.extract_strided_slice %279 {offsets = [0, 32], sizes = [2, 16], strides = [1, 1]} : vector<2x64xf32> to vector<2x16xf32>
    %293 = math.tanh %292 : vector<2x16xf32>
    %294 = vector.extract_strided_slice %279 {offsets = [0, 48], sizes = [2, 16], strides = [1, 1]} : vector<2x64xf32> to vector<2x16xf32>
    %295 = arith.negf %294 : vector<2x16xf32>
    %296 = math.exp %295 : vector<2x16xf32>
    %cst_73 = arith.constant 1.000000e+00 : f32
    %297 = vector.broadcast %cst_73 : f32 to vector<2x16xf32>
    %298 = arith.addf %297, %296 : vector<2x16xf32>
    %299 = arith.divf %297, %298 : vector<2x16xf32>
    %300 = arith.mulf %291, %273 : vector<2x16xf32>
    %301 = arith.mulf %285, %293 : vector<2x16xf32>
    %302 = arith.addf %300, %301 : vector<2x16xf32>
    %303 = math.tanh %302 : vector<2x16xf32>
    %304 = arith.mulf %299, %303 : vector<2x16xf32>
    %305 = vector.extract_strided_slice %244 {offsets = [10, 0], sizes = [2, 64], strides = [1, 1]} : vector<16x64xf32> to vector<2x64xf32>
    %c0_74 = arith.constant 0 : index
    %c0_75 = arith.constant 0 : index
    %306 = vector.load %arg6[%c0_74, %c0_75] : memref<16x64xf32, #tpu.memory_space<vmem>>, vector<16x64xf32>
    %cst_76 = arith.constant dense<0.000000e+00> : vector<2x64xf32>
    %307 = tpu.matmul %304, %306, %cst_76 {dimension_numbers = #tpu.dot_dimension_numbers<[1], [0], [0], [1], [0, 0, 1, 1], [], []>} : vector<2x16xf32>, vector<16x64xf32>, vector<2x64xf32> -> vector<2x64xf32>
    %308 = arith.addf %305, %307 : vector<2x64xf32>
    %309 = vector.extract_strided_slice %308 {offsets = [0, 0], sizes = [2, 16], strides = [1, 1]} : vector<2x64xf32> to vector<2x16xf32>
    %310 = arith.negf %309 : vector<2x16xf32>
    %311 = math.exp %310 : vector<2x16xf32>
    %cst_77 = arith.constant 1.000000e+00 : f32
    %312 = vector.broadcast %cst_77 : f32 to vector<2x16xf32>
    %313 = arith.addf %312, %311 : vector<2x16xf32>
    %314 = arith.divf %312, %313 : vector<2x16xf32>
    %315 = vector.extract_strided_slice %308 {offsets = [0, 16], sizes = [2, 16], strides = [1, 1]} : vector<2x64xf32> to vector<2x16xf32>
    %316 = arith.negf %315 : vector<2x16xf32>
    %317 = math.exp %316 : vector<2x16xf32>
    %cst_78 = arith.constant 1.000000e+00 : f32
    %318 = vector.broadcast %cst_78 : f32 to vector<2x16xf32>
    %319 = arith.addf %318, %317 : vector<2x16xf32>
    %320 = arith.divf %318, %319 : vector<2x16xf32>
    %321 = vector.extract_strided_slice %308 {offsets = [0, 32], sizes = [2, 16], strides = [1, 1]} : vector<2x64xf32> to vector<2x16xf32>
    %322 = math.tanh %321 : vector<2x16xf32>
    %323 = vector.extract_strided_slice %308 {offsets = [0, 48], sizes = [2, 16], strides = [1, 1]} : vector<2x64xf32> to vector<2x16xf32>
    %324 = arith.negf %323 : vector<2x16xf32>
    %325 = math.exp %324 : vector<2x16xf32>
    %cst_79 = arith.constant 1.000000e+00 : f32
    %326 = vector.broadcast %cst_79 : f32 to vector<2x16xf32>
    %327 = arith.addf %326, %325 : vector<2x16xf32>
    %328 = arith.divf %326, %327 : vector<2x16xf32>
    %329 = arith.mulf %320, %302 : vector<2x16xf32>
    %330 = arith.mulf %314, %322 : vector<2x16xf32>
    %331 = arith.addf %329, %330 : vector<2x16xf32>
    %332 = math.tanh %331 : vector<2x16xf32>
    %333 = arith.mulf %328, %332 : vector<2x16xf32>
    %334 = vector.extract_strided_slice %244 {offsets = [8, 0], sizes = [2, 64], strides = [1, 1]} : vector<16x64xf32> to vector<2x64xf32>
    %c0_80 = arith.constant 0 : index
    %c0_81 = arith.constant 0 : index
    %335 = vector.load %arg6[%c0_80, %c0_81] : memref<16x64xf32, #tpu.memory_space<vmem>>, vector<16x64xf32>
    %cst_82 = arith.constant dense<0.000000e+00> : vector<2x64xf32>
    %336 = tpu.matmul %333, %335, %cst_82 {dimension_numbers = #tpu.dot_dimension_numbers<[1], [0], [0], [1], [0, 0, 1, 1], [], []>} : vector<2x16xf32>, vector<16x64xf32>, vector<2x64xf32> -> vector<2x64xf32>
    %337 = arith.addf %334, %336 : vector<2x64xf32>
    %338 = vector.extract_strided_slice %337 {offsets = [0, 0], sizes = [2, 16], strides = [1, 1]} : vector<2x64xf32> to vector<2x16xf32>
    %339 = arith.negf %338 : vector<2x16xf32>
    %340 = math.exp %339 : vector<2x16xf32>
    %cst_83 = arith.constant 1.000000e+00 : f32
    %341 = vector.broadcast %cst_83 : f32 to vector<2x16xf32>
    %342 = arith.addf %341, %340 : vector<2x16xf32>
    %343 = arith.divf %341, %342 : vector<2x16xf32>
    %344 = vector.extract_strided_slice %337 {offsets = [0, 16], sizes = [2, 16], strides = [1, 1]} : vector<2x64xf32> to vector<2x16xf32>
    %345 = arith.negf %344 : vector<2x16xf32>
    %346 = math.exp %345 : vector<2x16xf32>
    %cst_84 = arith.constant 1.000000e+00 : f32
    %347 = vector.broadcast %cst_84 : f32 to vector<2x16xf32>
    %348 = arith.addf %347, %346 : vector<2x16xf32>
    %349 = arith.divf %347, %348 : vector<2x16xf32>
    %350 = vector.extract_strided_slice %337 {offsets = [0, 32], sizes = [2, 16], strides = [1, 1]} : vector<2x64xf32> to vector<2x16xf32>
    %351 = math.tanh %350 : vector<2x16xf32>
    %352 = vector.extract_strided_slice %337 {offsets = [0, 48], sizes = [2, 16], strides = [1, 1]} : vector<2x64xf32> to vector<2x16xf32>
    %353 = arith.negf %352 : vector<2x16xf32>
    %354 = math.exp %353 : vector<2x16xf32>
    %cst_85 = arith.constant 1.000000e+00 : f32
    %355 = vector.broadcast %cst_85 : f32 to vector<2x16xf32>
    %356 = arith.addf %355, %354 : vector<2x16xf32>
    %357 = arith.divf %355, %356 : vector<2x16xf32>
    %358 = arith.mulf %349, %331 : vector<2x16xf32>
    %359 = arith.mulf %343, %351 : vector<2x16xf32>
    %360 = arith.addf %358, %359 : vector<2x16xf32>
    %361 = math.tanh %360 : vector<2x16xf32>
    %362 = arith.mulf %357, %361 : vector<2x16xf32>
    %363 = vector.extract_strided_slice %244 {offsets = [6, 0], sizes = [2, 64], strides = [1, 1]} : vector<16x64xf32> to vector<2x64xf32>
    %c0_86 = arith.constant 0 : index
    %c0_87 = arith.constant 0 : index
    %364 = vector.load %arg6[%c0_86, %c0_87] : memref<16x64xf32, #tpu.memory_space<vmem>>, vector<16x64xf32>
    %cst_88 = arith.constant dense<0.000000e+00> : vector<2x64xf32>
    %365 = tpu.matmul %362, %364, %cst_88 {dimension_numbers = #tpu.dot_dimension_numbers<[1], [0], [0], [1], [0, 0, 1, 1], [], []>} : vector<2x16xf32>, vector<16x64xf32>, vector<2x64xf32> -> vector<2x64xf32>
    %366 = arith.addf %363, %365 : vector<2x64xf32>
    %367 = vector.extract_strided_slice %366 {offsets = [0, 0], sizes = [2, 16], strides = [1, 1]} : vector<2x64xf32> to vector<2x16xf32>
    %368 = arith.negf %367 : vector<2x16xf32>
    %369 = math.exp %368 : vector<2x16xf32>
    %cst_89 = arith.constant 1.000000e+00 : f32
    %370 = vector.broadcast %cst_89 : f32 to vector<2x16xf32>
    %371 = arith.addf %370, %369 : vector<2x16xf32>
    %372 = arith.divf %370, %371 : vector<2x16xf32>
    %373 = vector.extract_strided_slice %366 {offsets = [0, 16], sizes = [2, 16], strides = [1, 1]} : vector<2x64xf32> to vector<2x16xf32>
    %374 = arith.negf %373 : vector<2x16xf32>
    %375 = math.exp %374 : vector<2x16xf32>
    %cst_90 = arith.constant 1.000000e+00 : f32
    %376 = vector.broadcast %cst_90 : f32 to vector<2x16xf32>
    %377 = arith.addf %376, %375 : vector<2x16xf32>
    %378 = arith.divf %376, %377 : vector<2x16xf32>
    %379 = vector.extract_strided_slice %366 {offsets = [0, 32], sizes = [2, 16], strides = [1, 1]} : vector<2x64xf32> to vector<2x16xf32>
    %380 = math.tanh %379 : vector<2x16xf32>
    %381 = vector.extract_strided_slice %366 {offsets = [0, 48], sizes = [2, 16], strides = [1, 1]} : vector<2x64xf32> to vector<2x16xf32>
    %382 = arith.negf %381 : vector<2x16xf32>
    %383 = math.exp %382 : vector<2x16xf32>
    %cst_91 = arith.constant 1.000000e+00 : f32
    %384 = vector.broadcast %cst_91 : f32 to vector<2x16xf32>
    %385 = arith.addf %384, %383 : vector<2x16xf32>
    %386 = arith.divf %384, %385 : vector<2x16xf32>
    %387 = arith.mulf %378, %360 : vector<2x16xf32>
    %388 = arith.mulf %372, %380 : vector<2x16xf32>
    %389 = arith.addf %387, %388 : vector<2x16xf32>
    %390 = math.tanh %389 : vector<2x16xf32>
    %391 = arith.mulf %386, %390 : vector<2x16xf32>
    %392 = vector.extract_strided_slice %244 {offsets = [4, 0], sizes = [2, 64], strides = [1, 1]} : vector<16x64xf32> to vector<2x64xf32>
    %c0_92 = arith.constant 0 : index
    %c0_93 = arith.constant 0 : index
    %393 = vector.load %arg6[%c0_92, %c0_93] : memref<16x64xf32, #tpu.memory_space<vmem>>, vector<16x64xf32>
    %cst_94 = arith.constant dense<0.000000e+00> : vector<2x64xf32>
    %394 = tpu.matmul %391, %393, %cst_94 {dimension_numbers = #tpu.dot_dimension_numbers<[1], [0], [0], [1], [0, 0, 1, 1], [], []>} : vector<2x16xf32>, vector<16x64xf32>, vector<2x64xf32> -> vector<2x64xf32>
    %395 = arith.addf %392, %394 : vector<2x64xf32>
    %396 = vector.extract_strided_slice %395 {offsets = [0, 0], sizes = [2, 16], strides = [1, 1]} : vector<2x64xf32> to vector<2x16xf32>
    %397 = arith.negf %396 : vector<2x16xf32>
    %398 = math.exp %397 : vector<2x16xf32>
    %cst_95 = arith.constant 1.000000e+00 : f32
    %399 = vector.broadcast %cst_95 : f32 to vector<2x16xf32>
    %400 = arith.addf %399, %398 : vector<2x16xf32>
    %401 = arith.divf %399, %400 : vector<2x16xf32>
    %402 = vector.extract_strided_slice %395 {offsets = [0, 16], sizes = [2, 16], strides = [1, 1]} : vector<2x64xf32> to vector<2x16xf32>
    %403 = arith.negf %402 : vector<2x16xf32>
    %404 = math.exp %403 : vector<2x16xf32>
    %cst_96 = arith.constant 1.000000e+00 : f32
    %405 = vector.broadcast %cst_96 : f32 to vector<2x16xf32>
    %406 = arith.addf %405, %404 : vector<2x16xf32>
    %407 = arith.divf %405, %406 : vector<2x16xf32>
    %408 = vector.extract_strided_slice %395 {offsets = [0, 32], sizes = [2, 16], strides = [1, 1]} : vector<2x64xf32> to vector<2x16xf32>
    %409 = math.tanh %408 : vector<2x16xf32>
    %410 = vector.extract_strided_slice %395 {offsets = [0, 48], sizes = [2, 16], strides = [1, 1]} : vector<2x64xf32> to vector<2x16xf32>
    %411 = arith.negf %410 : vector<2x16xf32>
    %412 = math.exp %411 : vector<2x16xf32>
    %cst_97 = arith.constant 1.000000e+00 : f32
    %413 = vector.broadcast %cst_97 : f32 to vector<2x16xf32>
    %414 = arith.addf %413, %412 : vector<2x16xf32>
    %415 = arith.divf %413, %414 : vector<2x16xf32>
    %416 = arith.mulf %407, %389 : vector<2x16xf32>
    %417 = arith.mulf %401, %409 : vector<2x16xf32>
    %418 = arith.addf %416, %417 : vector<2x16xf32>
    %419 = math.tanh %418 : vector<2x16xf32>
    %420 = arith.mulf %415, %419 : vector<2x16xf32>
    %421 = vector.extract_strided_slice %244 {offsets = [2, 0], sizes = [2, 64], strides = [1, 1]} : vector<16x64xf32> to vector<2x64xf32>
    %c0_98 = arith.constant 0 : index
    %c0_99 = arith.constant 0 : index
    %422 = vector.load %arg6[%c0_98, %c0_99] : memref<16x64xf32, #tpu.memory_space<vmem>>, vector<16x64xf32>
    %cst_100 = arith.constant dense<0.000000e+00> : vector<2x64xf32>
    %423 = tpu.matmul %420, %422, %cst_100 {dimension_numbers = #tpu.dot_dimension_numbers<[1], [0], [0], [1], [0, 0, 1, 1], [], []>} : vector<2x16xf32>, vector<16x64xf32>, vector<2x64xf32> -> vector<2x64xf32>
    %424 = arith.addf %421, %423 : vector<2x64xf32>
    %425 = vector.extract_strided_slice %424 {offsets = [0, 0], sizes = [2, 16], strides = [1, 1]} : vector<2x64xf32> to vector<2x16xf32>
    %426 = arith.negf %425 : vector<2x16xf32>
    %427 = math.exp %426 : vector<2x16xf32>
    %cst_101 = arith.constant 1.000000e+00 : f32
    %428 = vector.broadcast %cst_101 : f32 to vector<2x16xf32>
    %429 = arith.addf %428, %427 : vector<2x16xf32>
    %430 = arith.divf %428, %429 : vector<2x16xf32>
    %431 = vector.extract_strided_slice %424 {offsets = [0, 16], sizes = [2, 16], strides = [1, 1]} : vector<2x64xf32> to vector<2x16xf32>
    %432 = arith.negf %431 : vector<2x16xf32>
    %433 = math.exp %432 : vector<2x16xf32>
    %cst_102 = arith.constant 1.000000e+00 : f32
    %434 = vector.broadcast %cst_102 : f32 to vector<2x16xf32>
    %435 = arith.addf %434, %433 : vector<2x16xf32>
    %436 = arith.divf %434, %435 : vector<2x16xf32>
    %437 = vector.extract_strided_slice %424 {offsets = [0, 32], sizes = [2, 16], strides = [1, 1]} : vector<2x64xf32> to vector<2x16xf32>
    %438 = math.tanh %437 : vector<2x16xf32>
    %439 = vector.extract_strided_slice %424 {offsets = [0, 48], sizes = [2, 16], strides = [1, 1]} : vector<2x64xf32> to vector<2x16xf32>
    %440 = arith.negf %439 : vector<2x16xf32>
    %441 = math.exp %440 : vector<2x16xf32>
    %cst_103 = arith.constant 1.000000e+00 : f32
    %442 = vector.broadcast %cst_103 : f32 to vector<2x16xf32>
    %443 = arith.addf %442, %441 : vector<2x16xf32>
    %444 = arith.divf %442, %443 : vector<2x16xf32>
    %445 = arith.mulf %436, %418 : vector<2x16xf32>
    %446 = arith.mulf %430, %438 : vector<2x16xf32>
    %447 = arith.addf %445, %446 : vector<2x16xf32>
    %448 = math.tanh %447 : vector<2x16xf32>
    %449 = arith.mulf %444, %448 : vector<2x16xf32>
    %450 = vector.extract_strided_slice %244 {offsets = [0, 0], sizes = [2, 64], strides = [1, 1]} : vector<16x64xf32> to vector<2x64xf32>
    %c0_104 = arith.constant 0 : index
    %c0_105 = arith.constant 0 : index
    %451 = vector.load %arg6[%c0_104, %c0_105] : memref<16x64xf32, #tpu.memory_space<vmem>>, vector<16x64xf32>
    %cst_106 = arith.constant dense<0.000000e+00> : vector<2x64xf32>
    %452 = tpu.matmul %449, %451, %cst_106 {dimension_numbers = #tpu.dot_dimension_numbers<[1], [0], [0], [1], [0, 0, 1, 1], [], []>} : vector<2x16xf32>, vector<16x64xf32>, vector<2x64xf32> -> vector<2x64xf32>
    %453 = arith.addf %450, %452 : vector<2x64xf32>
    %454 = vector.extract_strided_slice %453 {offsets = [0, 0], sizes = [2, 16], strides = [1, 1]} : vector<2x64xf32> to vector<2x16xf32>
    %455 = arith.negf %454 : vector<2x16xf32>
    %456 = math.exp %455 : vector<2x16xf32>
    %cst_107 = arith.constant 1.000000e+00 : f32
    %457 = vector.broadcast %cst_107 : f32 to vector<2x16xf32>
    %458 = arith.addf %457, %456 : vector<2x16xf32>
    %459 = arith.divf %457, %458 : vector<2x16xf32>
    %460 = vector.extract_strided_slice %453 {offsets = [0, 16], sizes = [2, 16], strides = [1, 1]} : vector<2x64xf32> to vector<2x16xf32>
    %461 = arith.negf %460 : vector<2x16xf32>
    %462 = math.exp %461 : vector<2x16xf32>
    %cst_108 = arith.constant 1.000000e+00 : f32
    %463 = vector.broadcast %cst_108 : f32 to vector<2x16xf32>
    %464 = arith.addf %463, %462 : vector<2x16xf32>
    %465 = arith.divf %463, %464 : vector<2x16xf32>
    %466 = vector.extract_strided_slice %453 {offsets = [0, 32], sizes = [2, 16], strides = [1, 1]} : vector<2x64xf32> to vector<2x16xf32>
    %467 = math.tanh %466 : vector<2x16xf32>
    %468 = vector.extract_strided_slice %453 {offsets = [0, 48], sizes = [2, 16], strides = [1, 1]} : vector<2x64xf32> to vector<2x16xf32>
    %469 = arith.negf %468 : vector<2x16xf32>
    %470 = math.exp %469 : vector<2x16xf32>
    %cst_109 = arith.constant 1.000000e+00 : f32
    %471 = vector.broadcast %cst_109 : f32 to vector<2x16xf32>
    %472 = arith.addf %471, %470 : vector<2x16xf32>
    %473 = arith.divf %471, %472 : vector<2x16xf32>
    %474 = arith.mulf %465, %447 : vector<2x16xf32>
    %475 = arith.mulf %459, %467 : vector<2x16xf32>
    %476 = arith.addf %474, %475 : vector<2x16xf32>
    %477 = math.tanh %476 : vector<2x16xf32>
    %478 = arith.mulf %473, %477 : vector<2x16xf32>
    %479 = tpu.concatenate %36, %65, %94, %123, %152, %181, %210, %239 in 0 : vector<2x16xf32>, vector<2x16xf32>, vector<2x16xf32>, vector<2x16xf32>, vector<2x16xf32>, vector<2x16xf32>, vector<2x16xf32>, vector<2x16xf32> -> vector<16x16xf32>
    %480 = tpu.concatenate %478, %449, %420, %391, %362, %333, %304, %275 in 0 : vector<2x16xf32>, vector<2x16xf32>, vector<2x16xf32>, vector<2x16xf32>, vector<2x16xf32>, vector<2x16xf32>, vector<2x16xf32>, vector<2x16xf32> -> vector<16x16xf32>
    %481 = tpu.concatenate %479, %480 in 1 : vector<16x16xf32>, vector<16x16xf32> -> vector<16x32xf32>
    %c0_110 = arith.constant 0 : index
    %c0_111 = arith.constant 0 : index
    %482 = vector.load %arg8[%c0_110, %c0_111] : memref<32x64xf32, #tpu.memory_space<vmem>>, vector<32x64xf32>
    %cst_112 = arith.constant dense<0.000000e+00> : vector<16x64xf32>
    %483 = tpu.matmul %481, %482, %cst_112 {dimension_numbers = #tpu.dot_dimension_numbers<[1], [0], [0], [1], [0, 0, 1, 1], [], []>} : vector<16x32xf32>, vector<32x64xf32>, vector<16x64xf32> -> vector<16x64xf32>
    %c0_113 = arith.constant 0 : index
    %c0_114 = arith.constant 0 : index
    %484 = vector.load %arg10[%c0_113, %c0_114] : memref<1x64xf32, #tpu.memory_space<vmem>>, vector<1x64xf32>
    %485 = vector.broadcast %484 : vector<1x64xf32> to vector<16x64xf32>
    %486 = arith.addf %483, %485 : vector<16x64xf32>
    %cst_115 = arith.constant 0.000000e+00 : f32
    %487 = vector.broadcast %cst_115 : f32 to vector<2x16xf32>
    %cst_116 = arith.constant 0.000000e+00 : f32
    %488 = vector.broadcast %cst_116 : f32 to vector<2x16xf32>
    %489 = vector.extract_strided_slice %486 {offsets = [0, 0], sizes = [2, 64], strides = [1, 1]} : vector<16x64xf32> to vector<2x64xf32>
    %c0_117 = arith.constant 0 : index
    %c0_118 = arith.constant 0 : index
    %490 = vector.load %arg9[%c0_117, %c0_118] : memref<16x64xf32, #tpu.memory_space<vmem>>, vector<16x64xf32>
    %cst_119 = arith.constant dense<0.000000e+00> : vector<2x64xf32>
    %491 = tpu.matmul %487, %490, %cst_119 {dimension_numbers = #tpu.dot_dimension_numbers<[1], [0], [0], [1], [0, 0, 1, 1], [], []>} : vector<2x16xf32>, vector<16x64xf32>, vector<2x64xf32> -> vector<2x64xf32>
    %492 = arith.addf %489, %491 : vector<2x64xf32>
    %493 = vector.extract_strided_slice %492 {offsets = [0, 0], sizes = [2, 16], strides = [1, 1]} : vector<2x64xf32> to vector<2x16xf32>
    %494 = arith.negf %493 : vector<2x16xf32>
    %495 = math.exp %494 : vector<2x16xf32>
    %cst_120 = arith.constant 1.000000e+00 : f32
    %496 = vector.broadcast %cst_120 : f32 to vector<2x16xf32>
    %497 = arith.addf %496, %495 : vector<2x16xf32>
    %498 = arith.divf %496, %497 : vector<2x16xf32>
    %499 = vector.extract_strided_slice %492 {offsets = [0, 16], sizes = [2, 16], strides = [1, 1]} : vector<2x64xf32> to vector<2x16xf32>
    %500 = arith.negf %499 : vector<2x16xf32>
    %501 = math.exp %500 : vector<2x16xf32>
    %cst_121 = arith.constant 1.000000e+00 : f32
    %502 = vector.broadcast %cst_121 : f32 to vector<2x16xf32>
    %503 = arith.addf %502, %501 : vector<2x16xf32>
    %504 = arith.divf %502, %503 : vector<2x16xf32>
    %505 = vector.extract_strided_slice %492 {offsets = [0, 32], sizes = [2, 16], strides = [1, 1]} : vector<2x64xf32> to vector<2x16xf32>
    %506 = math.tanh %505 : vector<2x16xf32>
    %507 = vector.extract_strided_slice %492 {offsets = [0, 48], sizes = [2, 16], strides = [1, 1]} : vector<2x64xf32> to vector<2x16xf32>
    %508 = arith.negf %507 : vector<2x16xf32>
    %509 = math.exp %508 : vector<2x16xf32>
    %cst_122 = arith.constant 1.000000e+00 : f32
    %510 = vector.broadcast %cst_122 : f32 to vector<2x16xf32>
    %511 = arith.addf %510, %509 : vector<2x16xf32>
    %512 = arith.divf %510, %511 : vector<2x16xf32>
    %513 = arith.mulf %504, %488 : vector<2x16xf32>
    %514 = arith.mulf %498, %506 : vector<2x16xf32>
    %515 = arith.addf %513, %514 : vector<2x16xf32>
    %516 = math.tanh %515 : vector<2x16xf32>
    %517 = arith.mulf %512, %516 : vector<2x16xf32>
    %518 = vector.extract_strided_slice %486 {offsets = [2, 0], sizes = [2, 64], strides = [1, 1]} : vector<16x64xf32> to vector<2x64xf32>
    %c0_123 = arith.constant 0 : index
    %c0_124 = arith.constant 0 : index
    %519 = vector.load %arg9[%c0_123, %c0_124] : memref<16x64xf32, #tpu.memory_space<vmem>>, vector<16x64xf32>
    %cst_125 = arith.constant dense<0.000000e+00> : vector<2x64xf32>
    %520 = tpu.matmul %517, %519, %cst_125 {dimension_numbers = #tpu.dot_dimension_numbers<[1], [0], [0], [1], [0, 0, 1, 1], [], []>} : vector<2x16xf32>, vector<16x64xf32>, vector<2x64xf32> -> vector<2x64xf32>
    %521 = arith.addf %518, %520 : vector<2x64xf32>
    %522 = vector.extract_strided_slice %521 {offsets = [0, 0], sizes = [2, 16], strides = [1, 1]} : vector<2x64xf32> to vector<2x16xf32>
    %523 = arith.negf %522 : vector<2x16xf32>
    %524 = math.exp %523 : vector<2x16xf32>
    %cst_126 = arith.constant 1.000000e+00 : f32
    %525 = vector.broadcast %cst_126 : f32 to vector<2x16xf32>
    %526 = arith.addf %525, %524 : vector<2x16xf32>
    %527 = arith.divf %525, %526 : vector<2x16xf32>
    %528 = vector.extract_strided_slice %521 {offsets = [0, 16], sizes = [2, 16], strides = [1, 1]} : vector<2x64xf32> to vector<2x16xf32>
    %529 = arith.negf %528 : vector<2x16xf32>
    %530 = math.exp %529 : vector<2x16xf32>
    %cst_127 = arith.constant 1.000000e+00 : f32
    %531 = vector.broadcast %cst_127 : f32 to vector<2x16xf32>
    %532 = arith.addf %531, %530 : vector<2x16xf32>
    %533 = arith.divf %531, %532 : vector<2x16xf32>
    %534 = vector.extract_strided_slice %521 {offsets = [0, 32], sizes = [2, 16], strides = [1, 1]} : vector<2x64xf32> to vector<2x16xf32>
    %535 = math.tanh %534 : vector<2x16xf32>
    %536 = vector.extract_strided_slice %521 {offsets = [0, 48], sizes = [2, 16], strides = [1, 1]} : vector<2x64xf32> to vector<2x16xf32>
    %537 = arith.negf %536 : vector<2x16xf32>
    %538 = math.exp %537 : vector<2x16xf32>
    %cst_128 = arith.constant 1.000000e+00 : f32
    %539 = vector.broadcast %cst_128 : f32 to vector<2x16xf32>
    %540 = arith.addf %539, %538 : vector<2x16xf32>
    %541 = arith.divf %539, %540 : vector<2x16xf32>
    %542 = arith.mulf %533, %515 : vector<2x16xf32>
    %543 = arith.mulf %527, %535 : vector<2x16xf32>
    %544 = arith.addf %542, %543 : vector<2x16xf32>
    %545 = math.tanh %544 : vector<2x16xf32>
    %546 = arith.mulf %541, %545 : vector<2x16xf32>
    %547 = vector.extract_strided_slice %486 {offsets = [4, 0], sizes = [2, 64], strides = [1, 1]} : vector<16x64xf32> to vector<2x64xf32>
    %c0_129 = arith.constant 0 : index
    %c0_130 = arith.constant 0 : index
    %548 = vector.load %arg9[%c0_129, %c0_130] : memref<16x64xf32, #tpu.memory_space<vmem>>, vector<16x64xf32>
    %cst_131 = arith.constant dense<0.000000e+00> : vector<2x64xf32>
    %549 = tpu.matmul %546, %548, %cst_131 {dimension_numbers = #tpu.dot_dimension_numbers<[1], [0], [0], [1], [0, 0, 1, 1], [], []>} : vector<2x16xf32>, vector<16x64xf32>, vector<2x64xf32> -> vector<2x64xf32>
    %550 = arith.addf %547, %549 : vector<2x64xf32>
    %551 = vector.extract_strided_slice %550 {offsets = [0, 0], sizes = [2, 16], strides = [1, 1]} : vector<2x64xf32> to vector<2x16xf32>
    %552 = arith.negf %551 : vector<2x16xf32>
    %553 = math.exp %552 : vector<2x16xf32>
    %cst_132 = arith.constant 1.000000e+00 : f32
    %554 = vector.broadcast %cst_132 : f32 to vector<2x16xf32>
    %555 = arith.addf %554, %553 : vector<2x16xf32>
    %556 = arith.divf %554, %555 : vector<2x16xf32>
    %557 = vector.extract_strided_slice %550 {offsets = [0, 16], sizes = [2, 16], strides = [1, 1]} : vector<2x64xf32> to vector<2x16xf32>
    %558 = arith.negf %557 : vector<2x16xf32>
    %559 = math.exp %558 : vector<2x16xf32>
    %cst_133 = arith.constant 1.000000e+00 : f32
    %560 = vector.broadcast %cst_133 : f32 to vector<2x16xf32>
    %561 = arith.addf %560, %559 : vector<2x16xf32>
    %562 = arith.divf %560, %561 : vector<2x16xf32>
    %563 = vector.extract_strided_slice %550 {offsets = [0, 32], sizes = [2, 16], strides = [1, 1]} : vector<2x64xf32> to vector<2x16xf32>
    %564 = math.tanh %563 : vector<2x16xf32>
    %565 = vector.extract_strided_slice %550 {offsets = [0, 48], sizes = [2, 16], strides = [1, 1]} : vector<2x64xf32> to vector<2x16xf32>
    %566 = arith.negf %565 : vector<2x16xf32>
    %567 = math.exp %566 : vector<2x16xf32>
    %cst_134 = arith.constant 1.000000e+00 : f32
    %568 = vector.broadcast %cst_134 : f32 to vector<2x16xf32>
    %569 = arith.addf %568, %567 : vector<2x16xf32>
    %570 = arith.divf %568, %569 : vector<2x16xf32>
    %571 = arith.mulf %562, %544 : vector<2x16xf32>
    %572 = arith.mulf %556, %564 : vector<2x16xf32>
    %573 = arith.addf %571, %572 : vector<2x16xf32>
    %574 = math.tanh %573 : vector<2x16xf32>
    %575 = arith.mulf %570, %574 : vector<2x16xf32>
    %576 = vector.extract_strided_slice %486 {offsets = [6, 0], sizes = [2, 64], strides = [1, 1]} : vector<16x64xf32> to vector<2x64xf32>
    %c0_135 = arith.constant 0 : index
    %c0_136 = arith.constant 0 : index
    %577 = vector.load %arg9[%c0_135, %c0_136] : memref<16x64xf32, #tpu.memory_space<vmem>>, vector<16x64xf32>
    %cst_137 = arith.constant dense<0.000000e+00> : vector<2x64xf32>
    %578 = tpu.matmul %575, %577, %cst_137 {dimension_numbers = #tpu.dot_dimension_numbers<[1], [0], [0], [1], [0, 0, 1, 1], [], []>} : vector<2x16xf32>, vector<16x64xf32>, vector<2x64xf32> -> vector<2x64xf32>
    %579 = arith.addf %576, %578 : vector<2x64xf32>
    %580 = vector.extract_strided_slice %579 {offsets = [0, 0], sizes = [2, 16], strides = [1, 1]} : vector<2x64xf32> to vector<2x16xf32>
    %581 = arith.negf %580 : vector<2x16xf32>
    %582 = math.exp %581 : vector<2x16xf32>
    %cst_138 = arith.constant 1.000000e+00 : f32
    %583 = vector.broadcast %cst_138 : f32 to vector<2x16xf32>
    %584 = arith.addf %583, %582 : vector<2x16xf32>
    %585 = arith.divf %583, %584 : vector<2x16xf32>
    %586 = vector.extract_strided_slice %579 {offsets = [0, 16], sizes = [2, 16], strides = [1, 1]} : vector<2x64xf32> to vector<2x16xf32>
    %587 = arith.negf %586 : vector<2x16xf32>
    %588 = math.exp %587 : vector<2x16xf32>
    %cst_139 = arith.constant 1.000000e+00 : f32
    %589 = vector.broadcast %cst_139 : f32 to vector<2x16xf32>
    %590 = arith.addf %589, %588 : vector<2x16xf32>
    %591 = arith.divf %589, %590 : vector<2x16xf32>
    %592 = vector.extract_strided_slice %579 {offsets = [0, 32], sizes = [2, 16], strides = [1, 1]} : vector<2x64xf32> to vector<2x16xf32>
    %593 = math.tanh %592 : vector<2x16xf32>
    %594 = vector.extract_strided_slice %579 {offsets = [0, 48], sizes = [2, 16], strides = [1, 1]} : vector<2x64xf32> to vector<2x16xf32>
    %595 = arith.negf %594 : vector<2x16xf32>
    %596 = math.exp %595 : vector<2x16xf32>
    %cst_140 = arith.constant 1.000000e+00 : f32
    %597 = vector.broadcast %cst_140 : f32 to vector<2x16xf32>
    %598 = arith.addf %597, %596 : vector<2x16xf32>
    %599 = arith.divf %597, %598 : vector<2x16xf32>
    %600 = arith.mulf %591, %573 : vector<2x16xf32>
    %601 = arith.mulf %585, %593 : vector<2x16xf32>
    %602 = arith.addf %600, %601 : vector<2x16xf32>
    %603 = math.tanh %602 : vector<2x16xf32>
    %604 = arith.mulf %599, %603 : vector<2x16xf32>
    %605 = vector.extract_strided_slice %486 {offsets = [8, 0], sizes = [2, 64], strides = [1, 1]} : vector<16x64xf32> to vector<2x64xf32>
    %c0_141 = arith.constant 0 : index
    %c0_142 = arith.constant 0 : index
    %606 = vector.load %arg9[%c0_141, %c0_142] : memref<16x64xf32, #tpu.memory_space<vmem>>, vector<16x64xf32>
    %cst_143 = arith.constant dense<0.000000e+00> : vector<2x64xf32>
    %607 = tpu.matmul %604, %606, %cst_143 {dimension_numbers = #tpu.dot_dimension_numbers<[1], [0], [0], [1], [0, 0, 1, 1], [], []>} : vector<2x16xf32>, vector<16x64xf32>, vector<2x64xf32> -> vector<2x64xf32>
    %608 = arith.addf %605, %607 : vector<2x64xf32>
    %609 = vector.extract_strided_slice %608 {offsets = [0, 0], sizes = [2, 16], strides = [1, 1]} : vector<2x64xf32> to vector<2x16xf32>
    %610 = arith.negf %609 : vector<2x16xf32>
    %611 = math.exp %610 : vector<2x16xf32>
    %cst_144 = arith.constant 1.000000e+00 : f32
    %612 = vector.broadcast %cst_144 : f32 to vector<2x16xf32>
    %613 = arith.addf %612, %611 : vector<2x16xf32>
    %614 = arith.divf %612, %613 : vector<2x16xf32>
    %615 = vector.extract_strided_slice %608 {offsets = [0, 16], sizes = [2, 16], strides = [1, 1]} : vector<2x64xf32> to vector<2x16xf32>
    %616 = arith.negf %615 : vector<2x16xf32>
    %617 = math.exp %616 : vector<2x16xf32>
    %cst_145 = arith.constant 1.000000e+00 : f32
    %618 = vector.broadcast %cst_145 : f32 to vector<2x16xf32>
    %619 = arith.addf %618, %617 : vector<2x16xf32>
    %620 = arith.divf %618, %619 : vector<2x16xf32>
    %621 = vector.extract_strided_slice %608 {offsets = [0, 32], sizes = [2, 16], strides = [1, 1]} : vector<2x64xf32> to vector<2x16xf32>
    %622 = math.tanh %621 : vector<2x16xf32>
    %623 = vector.extract_strided_slice %608 {offsets = [0, 48], sizes = [2, 16], strides = [1, 1]} : vector<2x64xf32> to vector<2x16xf32>
    %624 = arith.negf %623 : vector<2x16xf32>
    %625 = math.exp %624 : vector<2x16xf32>
    %cst_146 = arith.constant 1.000000e+00 : f32
    %626 = vector.broadcast %cst_146 : f32 to vector<2x16xf32>
    %627 = arith.addf %626, %625 : vector<2x16xf32>
    %628 = arith.divf %626, %627 : vector<2x16xf32>
    %629 = arith.mulf %620, %602 : vector<2x16xf32>
    %630 = arith.mulf %614, %622 : vector<2x16xf32>
    %631 = arith.addf %629, %630 : vector<2x16xf32>
    %632 = math.tanh %631 : vector<2x16xf32>
    %633 = arith.mulf %628, %632 : vector<2x16xf32>
    %634 = vector.extract_strided_slice %486 {offsets = [10, 0], sizes = [2, 64], strides = [1, 1]} : vector<16x64xf32> to vector<2x64xf32>
    %c0_147 = arith.constant 0 : index
    %c0_148 = arith.constant 0 : index
    %635 = vector.load %arg9[%c0_147, %c0_148] : memref<16x64xf32, #tpu.memory_space<vmem>>, vector<16x64xf32>
    %cst_149 = arith.constant dense<0.000000e+00> : vector<2x64xf32>
    %636 = tpu.matmul %633, %635, %cst_149 {dimension_numbers = #tpu.dot_dimension_numbers<[1], [0], [0], [1], [0, 0, 1, 1], [], []>} : vector<2x16xf32>, vector<16x64xf32>, vector<2x64xf32> -> vector<2x64xf32>
    %637 = arith.addf %634, %636 : vector<2x64xf32>
    %638 = vector.extract_strided_slice %637 {offsets = [0, 0], sizes = [2, 16], strides = [1, 1]} : vector<2x64xf32> to vector<2x16xf32>
    %639 = arith.negf %638 : vector<2x16xf32>
    %640 = math.exp %639 : vector<2x16xf32>
    %cst_150 = arith.constant 1.000000e+00 : f32
    %641 = vector.broadcast %cst_150 : f32 to vector<2x16xf32>
    %642 = arith.addf %641, %640 : vector<2x16xf32>
    %643 = arith.divf %641, %642 : vector<2x16xf32>
    %644 = vector.extract_strided_slice %637 {offsets = [0, 16], sizes = [2, 16], strides = [1, 1]} : vector<2x64xf32> to vector<2x16xf32>
    %645 = arith.negf %644 : vector<2x16xf32>
    %646 = math.exp %645 : vector<2x16xf32>
    %cst_151 = arith.constant 1.000000e+00 : f32
    %647 = vector.broadcast %cst_151 : f32 to vector<2x16xf32>
    %648 = arith.addf %647, %646 : vector<2x16xf32>
    %649 = arith.divf %647, %648 : vector<2x16xf32>
    %650 = vector.extract_strided_slice %637 {offsets = [0, 32], sizes = [2, 16], strides = [1, 1]} : vector<2x64xf32> to vector<2x16xf32>
    %651 = math.tanh %650 : vector<2x16xf32>
    %652 = vector.extract_strided_slice %637 {offsets = [0, 48], sizes = [2, 16], strides = [1, 1]} : vector<2x64xf32> to vector<2x16xf32>
    %653 = arith.negf %652 : vector<2x16xf32>
    %654 = math.exp %653 : vector<2x16xf32>
    %cst_152 = arith.constant 1.000000e+00 : f32
    %655 = vector.broadcast %cst_152 : f32 to vector<2x16xf32>
    %656 = arith.addf %655, %654 : vector<2x16xf32>
    %657 = arith.divf %655, %656 : vector<2x16xf32>
    %658 = arith.mulf %649, %631 : vector<2x16xf32>
    %659 = arith.mulf %643, %651 : vector<2x16xf32>
    %660 = arith.addf %658, %659 : vector<2x16xf32>
    %661 = math.tanh %660 : vector<2x16xf32>
    %662 = arith.mulf %657, %661 : vector<2x16xf32>
    %663 = vector.extract_strided_slice %486 {offsets = [12, 0], sizes = [2, 64], strides = [1, 1]} : vector<16x64xf32> to vector<2x64xf32>
    %c0_153 = arith.constant 0 : index
    %c0_154 = arith.constant 0 : index
    %664 = vector.load %arg9[%c0_153, %c0_154] : memref<16x64xf32, #tpu.memory_space<vmem>>, vector<16x64xf32>
    %cst_155 = arith.constant dense<0.000000e+00> : vector<2x64xf32>
    %665 = tpu.matmul %662, %664, %cst_155 {dimension_numbers = #tpu.dot_dimension_numbers<[1], [0], [0], [1], [0, 0, 1, 1], [], []>} : vector<2x16xf32>, vector<16x64xf32>, vector<2x64xf32> -> vector<2x64xf32>
    %666 = arith.addf %663, %665 : vector<2x64xf32>
    %667 = vector.extract_strided_slice %666 {offsets = [0, 0], sizes = [2, 16], strides = [1, 1]} : vector<2x64xf32> to vector<2x16xf32>
    %668 = arith.negf %667 : vector<2x16xf32>
    %669 = math.exp %668 : vector<2x16xf32>
    %cst_156 = arith.constant 1.000000e+00 : f32
    %670 = vector.broadcast %cst_156 : f32 to vector<2x16xf32>
    %671 = arith.addf %670, %669 : vector<2x16xf32>
    %672 = arith.divf %670, %671 : vector<2x16xf32>
    %673 = vector.extract_strided_slice %666 {offsets = [0, 16], sizes = [2, 16], strides = [1, 1]} : vector<2x64xf32> to vector<2x16xf32>
    %674 = arith.negf %673 : vector<2x16xf32>
    %675 = math.exp %674 : vector<2x16xf32>
    %cst_157 = arith.constant 1.000000e+00 : f32
    %676 = vector.broadcast %cst_157 : f32 to vector<2x16xf32>
    %677 = arith.addf %676, %675 : vector<2x16xf32>
    %678 = arith.divf %676, %677 : vector<2x16xf32>
    %679 = vector.extract_strided_slice %666 {offsets = [0, 32], sizes = [2, 16], strides = [1, 1]} : vector<2x64xf32> to vector<2x16xf32>
    %680 = math.tanh %679 : vector<2x16xf32>
    %681 = vector.extract_strided_slice %666 {offsets = [0, 48], sizes = [2, 16], strides = [1, 1]} : vector<2x64xf32> to vector<2x16xf32>
    %682 = arith.negf %681 : vector<2x16xf32>
    %683 = math.exp %682 : vector<2x16xf32>
    %cst_158 = arith.constant 1.000000e+00 : f32
    %684 = vector.broadcast %cst_158 : f32 to vector<2x16xf32>
    %685 = arith.addf %684, %683 : vector<2x16xf32>
    %686 = arith.divf %684, %685 : vector<2x16xf32>
    %687 = arith.mulf %678, %660 : vector<2x16xf32>
    %688 = arith.mulf %672, %680 : vector<2x16xf32>
    %689 = arith.addf %687, %688 : vector<2x16xf32>
    %690 = math.tanh %689 : vector<2x16xf32>
    %691 = arith.mulf %686, %690 : vector<2x16xf32>
    %692 = vector.extract_strided_slice %486 {offsets = [14, 0], sizes = [2, 64], strides = [1, 1]} : vector<16x64xf32> to vector<2x64xf32>
    %c0_159 = arith.constant 0 : index
    %c0_160 = arith.constant 0 : index
    %693 = vector.load %arg9[%c0_159, %c0_160] : memref<16x64xf32, #tpu.memory_space<vmem>>, vector<16x64xf32>
    %cst_161 = arith.constant dense<0.000000e+00> : vector<2x64xf32>
    %694 = tpu.matmul %691, %693, %cst_161 {dimension_numbers = #tpu.dot_dimension_numbers<[1], [0], [0], [1], [0, 0, 1, 1], [], []>} : vector<2x16xf32>, vector<16x64xf32>, vector<2x64xf32> -> vector<2x64xf32>
    %695 = arith.addf %692, %694 : vector<2x64xf32>
    %696 = vector.extract_strided_slice %695 {offsets = [0, 0], sizes = [2, 16], strides = [1, 1]} : vector<2x64xf32> to vector<2x16xf32>
    %697 = arith.negf %696 : vector<2x16xf32>
    %698 = math.exp %697 : vector<2x16xf32>
    %cst_162 = arith.constant 1.000000e+00 : f32
    %699 = vector.broadcast %cst_162 : f32 to vector<2x16xf32>
    %700 = arith.addf %699, %698 : vector<2x16xf32>
    %701 = arith.divf %699, %700 : vector<2x16xf32>
    %702 = vector.extract_strided_slice %695 {offsets = [0, 16], sizes = [2, 16], strides = [1, 1]} : vector<2x64xf32> to vector<2x16xf32>
    %703 = arith.negf %702 : vector<2x16xf32>
    %704 = math.exp %703 : vector<2x16xf32>
    %cst_163 = arith.constant 1.000000e+00 : f32
    %705 = vector.broadcast %cst_163 : f32 to vector<2x16xf32>
    %706 = arith.addf %705, %704 : vector<2x16xf32>
    %707 = arith.divf %705, %706 : vector<2x16xf32>
    %708 = vector.extract_strided_slice %695 {offsets = [0, 32], sizes = [2, 16], strides = [1, 1]} : vector<2x64xf32> to vector<2x16xf32>
    %709 = math.tanh %708 : vector<2x16xf32>
    %710 = vector.extract_strided_slice %695 {offsets = [0, 48], sizes = [2, 16], strides = [1, 1]} : vector<2x64xf32> to vector<2x16xf32>
    %711 = arith.negf %710 : vector<2x16xf32>
    %712 = math.exp %711 : vector<2x16xf32>
    %cst_164 = arith.constant 1.000000e+00 : f32
    %713 = vector.broadcast %cst_164 : f32 to vector<2x16xf32>
    %714 = arith.addf %713, %712 : vector<2x16xf32>
    %715 = arith.divf %713, %714 : vector<2x16xf32>
    %716 = arith.mulf %707, %689 : vector<2x16xf32>
    %717 = arith.mulf %701, %709 : vector<2x16xf32>
    %718 = arith.addf %716, %717 : vector<2x16xf32>
    %719 = math.tanh %718 : vector<2x16xf32>
    %720 = arith.mulf %715, %719 : vector<2x16xf32>
    %721 = vector.extract_strided_slice %481 {offsets = [14, 0], sizes = [2, 32], strides = [1, 1]} : vector<16x32xf32> to vector<2x32xf32>
    %c0_165 = arith.constant 0 : index
    %c0_166 = arith.constant 0 : index
    %722 = vector.load %arg11[%c0_165, %c0_166] : memref<32x64xf32, #tpu.memory_space<vmem>>, vector<32x64xf32>
    %cst_167 = arith.constant dense<0.000000e+00> : vector<2x64xf32>
    %723 = tpu.matmul %721, %722, %cst_167 {dimension_numbers = #tpu.dot_dimension_numbers<[1], [0], [0], [1], [0, 0, 1, 1], [], []>} : vector<2x32xf32>, vector<32x64xf32>, vector<2x64xf32> -> vector<2x64xf32>
    %c0_168 = arith.constant 0 : index
    %c0_169 = arith.constant 0 : index
    %724 = vector.load %arg13[%c0_168, %c0_169] : memref<1x64xf32, #tpu.memory_space<vmem>>, vector<1x64xf32>
    %725 = vector.broadcast %724 : vector<1x64xf32> to vector<2x64xf32>
    %726 = arith.addf %723, %725 : vector<2x64xf32>
    %cst_170 = arith.constant 0.000000e+00 : f32
    %727 = vector.broadcast %cst_170 : f32 to vector<2x16xf32>
    %c0_171 = arith.constant 0 : index
    %c0_172 = arith.constant 0 : index
    %728 = vector.load %arg12[%c0_171, %c0_172] : memref<16x64xf32, #tpu.memory_space<vmem>>, vector<16x64xf32>
    %cst_173 = arith.constant dense<0.000000e+00> : vector<2x64xf32>
    %729 = tpu.matmul %727, %728, %cst_173 {dimension_numbers = #tpu.dot_dimension_numbers<[1], [0], [0], [1], [0, 0, 1, 1], [], []>} : vector<2x16xf32>, vector<16x64xf32>, vector<2x64xf32> -> vector<2x64xf32>
    %730 = arith.addf %726, %729 : vector<2x64xf32>
    %731 = vector.extract_strided_slice %730 {offsets = [0, 0], sizes = [2, 16], strides = [1, 1]} : vector<2x64xf32> to vector<2x16xf32>
    %732 = arith.negf %731 : vector<2x16xf32>
    %733 = math.exp %732 : vector<2x16xf32>
    %cst_174 = arith.constant 1.000000e+00 : f32
    %734 = vector.broadcast %cst_174 : f32 to vector<2x16xf32>
    %735 = arith.addf %734, %733 : vector<2x16xf32>
    %736 = arith.divf %734, %735 : vector<2x16xf32>
    %737 = vector.extract_strided_slice %730 {offsets = [0, 16], sizes = [2, 16], strides = [1, 1]} : vector<2x64xf32> to vector<2x16xf32>
    %738 = arith.negf %737 : vector<2x16xf32>
    %739 = math.exp %738 : vector<2x16xf32>
    %cst_175 = arith.constant 1.000000e+00 : f32
    %740 = vector.broadcast %cst_175 : f32 to vector<2x16xf32>
    %741 = arith.addf %740, %739 : vector<2x16xf32>
    %742 = arith.divf %740, %741 : vector<2x16xf32>
    %743 = vector.extract_strided_slice %730 {offsets = [0, 32], sizes = [2, 16], strides = [1, 1]} : vector<2x64xf32> to vector<2x16xf32>
    %744 = math.tanh %743 : vector<2x16xf32>
    %745 = vector.extract_strided_slice %730 {offsets = [0, 48], sizes = [2, 16], strides = [1, 1]} : vector<2x64xf32> to vector<2x16xf32>
    %746 = arith.negf %745 : vector<2x16xf32>
    %747 = math.exp %746 : vector<2x16xf32>
    %cst_176 = arith.constant 1.000000e+00 : f32
    %748 = vector.broadcast %cst_176 : f32 to vector<2x16xf32>
    %749 = arith.addf %748, %747 : vector<2x16xf32>
    %750 = arith.divf %748, %749 : vector<2x16xf32>
    %751 = arith.mulf %742, %727 : vector<2x16xf32>
    %752 = arith.mulf %736, %744 : vector<2x16xf32>
    %753 = arith.addf %751, %752 : vector<2x16xf32>
    %754 = math.tanh %753 : vector<2x16xf32>
    %755 = arith.mulf %750, %754 : vector<2x16xf32>
    %756 = tpu.concatenate %720, %755 in 1 : vector<2x16xf32>, vector<2x16xf32> -> vector<2x32xf32>
    %c0_177 = arith.constant 0 : index
    %c0_178 = arith.constant 0 : index
    %757 = vector.load %arg14[%c0_177, %c0_178] : memref<32x3xf32, #tpu.memory_space<vmem>>, vector<32x3xf32>
    %cst_179 = arith.constant dense<0.000000e+00> : vector<2x3xf32>
    %758 = tpu.matmul %756, %757, %cst_179 {dimension_numbers = #tpu.dot_dimension_numbers<[1], [0], [0], [1], [0, 0, 1, 1], [], []>} : vector<2x32xf32>, vector<32x3xf32>, vector<2x3xf32> -> vector<2x3xf32>
    %c0_180 = arith.constant 0 : index
    %c0_181 = arith.constant 0 : index
    %759 = vector.load %arg15[%c0_180, %c0_181] : memref<1x3xf32, #tpu.memory_space<vmem>>, vector<1x3xf32>
    %760 = vector.broadcast %759 : vector<1x3xf32> to vector<2x3xf32>
    %761 = arith.addf %758, %760 : vector<2x3xf32>
    %762 = arith.negf %761 : vector<2x3xf32>
    %763 = math.exp %762 : vector<2x3xf32>
    %cst_182 = arith.constant 1.000000e+00 : f32
    %764 = vector.broadcast %cst_182 : f32 to vector<2x3xf32>
    %765 = arith.addf %764, %763 : vector<2x3xf32>
    %766 = arith.divf %764, %765 : vector<2x3xf32>
    %c0_183 = arith.constant 0 : index
    %c0_184 = arith.constant 0 : index
    %767 = vector.load %arg16[%c0_183, %c0_184] : memref<2x3xf32, #tpu.memory_space<vmem>>, vector<2x3xf32>
    tpu.vector_store %arg16[%c0_183, %c0_184], %766 {strides = array<i32>} : memref<2x3xf32, #tpu.memory_space<vmem>>, vector<2x3xf32>,
    return
  }
  func.func @transform_0(%arg0: i32) -> (i32, i32) {
    %c0_i32 = arith.constant 0 : i32
    %c0_i32_0 = arith.constant 0 : i32
    %c0_i32_1 = arith.constant 0 : i32
    return %c0_i32, %c0_i32_0 : i32, i32
  }
  func.func @transform_1(%arg0: i32) -> (i32, i32) {
    %c0_i32 = arith.constant 0 : i32
    %c0_i32_0 = arith.constant 0 : i32
    %c0_i32_1 = arith.constant 0 : i32
    return %c0_i32, %c0_i32_0 : i32, i32
  }
  func.func @transform_2(%arg0: i32) -> (i32, i32) {
    %c0_i32 = arith.constant 0 : i32
    %c0_i32_0 = arith.constant 0 : i32
    %c0_i32_1 = arith.constant 0 : i32
    return %c0_i32, %c0_i32_0 : i32, i32
  }
  func.func @transform_3(%arg0: i32) -> (i32, i32) {
    %c0_i32 = arith.constant 0 : i32
    %c0_i32_0 = arith.constant 0 : i32
    %c0_i32_1 = arith.constant 0 : i32
    return %c0_i32, %c0_i32_0 : i32, i32
  }
  func.func @transform_4(%arg0: i32) -> (i32, i32) {
    %c0_i32 = arith.constant 0 : i32
    %c0_i32_0 = arith.constant 0 : i32
    %c0_i32_1 = arith.constant 0 : i32
    return %c0_i32, %c0_i32_0 : i32, i32
  }
  func.func @transform_5(%arg0: i32) -> (i32, i32) {
    %c0_i32 = arith.constant 0 : i32
    %c0_i32_0 = arith.constant 0 : i32
    %c0_i32_1 = arith.constant 0 : i32
    return %c0_i32, %c0_i32_0 : i32, i32
  }
  func.func @transform_6(%arg0: i32) -> (i32, i32) {
    %c0_i32 = arith.constant 0 : i32
    %c0_i32_0 = arith.constant 0 : i32
    %c0_i32_1 = arith.constant 0 : i32
    return %c0_i32, %c0_i32_0 : i32, i32
  }
  func.func @transform_7(%arg0: i32) -> (i32, i32) {
    %c0_i32 = arith.constant 0 : i32
    %c0_i32_0 = arith.constant 0 : i32
    %c0_i32_1 = arith.constant 0 : i32
    return %c0_i32, %c0_i32_0 : i32, i32
  }
  func.func @transform_8(%arg0: i32) -> (i32, i32) {
    %c0_i32 = arith.constant 0 : i32
    %c0_i32_0 = arith.constant 0 : i32
    %c0_i32_1 = arith.constant 0 : i32
    return %c0_i32, %c0_i32_0 : i32, i32
  }
  func.func @transform_9(%arg0: i32) -> (i32, i32) {
    %c0_i32 = arith.constant 0 : i32
    %c0_i32_0 = arith.constant 0 : i32
    %c0_i32_1 = arith.constant 0 : i32
    return %c0_i32, %c0_i32_0 : i32, i32
  }
  func.func @transform_10(%arg0: i32) -> (i32, i32) {
    %c0_i32 = arith.constant 0 : i32
    %c0_i32_0 = arith.constant 0 : i32
    %c0_i32_1 = arith.constant 0 : i32
    return %c0_i32, %c0_i32_0 : i32, i32
  }
  func.func @transform_11(%arg0: i32) -> (i32, i32) {
    %c0_i32 = arith.constant 0 : i32
    %c0_i32_0 = arith.constant 0 : i32
    %c0_i32_1 = arith.constant 0 : i32
    return %c0_i32, %c0_i32_0 : i32, i32
  }
  func.func @transform_12(%arg0: i32) -> (i32, i32) {
    %c0_i32 = arith.constant 0 : i32
    %c0_i32_0 = arith.constant 0 : i32
    %c0_i32_1 = arith.constant 0 : i32
    return %c0_i32, %c0_i32_0 : i32, i32
  }
  func.func @transform_13(%arg0: i32) -> (i32, i32) {
    %c0_i32 = arith.constant 0 : i32
    %c0_i32_0 = arith.constant 0 : i32
    %c0_i32_1 = arith.constant 0 : i32
    return %c0_i32, %c0_i32_0 : i32, i32
  }
  func.func @transform_14(%arg0: i32) -> (i32, i32) {
    %c0_i32 = arith.constant 0 : i32
    %c0_i32_0 = arith.constant 0 : i32
    %c0_i32_1 = arith.constant 0 : i32
    return %c0_i32, %c0_i32_0 : i32, i32
  }
  func.func @transform_15(%arg0: i32) -> (i32, i32) {
    %c0_i32 = arith.constant 0 : i32
    %c0_i32_0 = arith.constant 0 : i32
    %c0_i32_1 = arith.constant 0 : i32
    return %c0_i32, %c0_i32_0 : i32, i32
  }
}

</mosaic_0001>

<bundles_post_ra>
// kernel: tpu_custom_call.1
= control target key start
LH: loop header
LB: loop body
LE: loop exit
PB: predicated region body
PF: predicated region fallthrough
CT: control target
= control target key end

     0   :  { %20 = vsyncpa [#allocation3], 0  ;;  %s4697_s0 = inlined_call_operand.vmem [shape: f32[16,4], index: 0, kind: input, shape index: {}]   ;;  %s4698_s1 = inlined_call_operand.hbm [shape: f32[4,64], index: 1, kind: input, shape index: {}]   ;;  %s4699_s2 = inlined_call_operand.hbm [shape: f32[16,64], index: 2, kind: input, shape index: {}]   ;;  %s4700_s3 = inlined_call_operand.hbm [shape: f32[1,64], index: 3, kind: input, shape index: {}]   ;;  %s4701_s4 = inlined_call_operand.hbm [shape: f32[4,64], index: 4, kind: input, shape index: {}]   ;;  %s4702_s5 = inlined_call_operand.hbm [shape: f32[16,64], index: 5, kind: input, shape index: {}]   ;;  %s4703_s6 = inlined_call_operand.hbm [shape: f32[1,64], index: 6, kind: input, shape index: {}]   ;;  %s4704_s7 = inlined_call_operand.vmem [shape: f32[32,64], index: 7, kind: input, shape index: {}]   ;;  %s4705_s8 = inlined_call_operand.hbm [shape: f32[16,64], index: 8, kind: input, shape index: {}]   ;;  %s4706_s9 = inlined_call_operand.vmem [shape: f32[1,64], index: 9, kind: input, shape index: {}]   ;;  %s4707_s10 = inlined_call_operand.vmem [shape: f32[32,64], index: 10, kind: input, shape index: {}]   ;;  %s4708_s11 = inlined_call_operand.hbm [shape: f32[16,64], index: 11, kind: input, shape index: {}]   ;;  %s4709_s12 = inlined_call_operand.vmem [shape: f32[1,64], index: 12, kind: input, shape index: {}]   ;;  %s4710_s13 = inlined_call_operand.vmem [shape: f32[32,3], index: 13, kind: input, shape index: {}]   ;;  %s4711_s14 = inlined_call_operand.vmem [shape: f32[1,3], index: 14, kind: input, shape index: {}]   ;;  %s4712_s15 = inlined_call_operand.hbm [shape: f32[2,3], index: 15, kind: output, shape index: {}]  }
   0x1   :  { %21 = vsyncpa [#allocation6], 0 }
   0x2   :  { %22 = vsyncpa [#allocation9], 0 }
   0x3   :  { %23 = vsyncpa [#allocation12], 0 }
   0x4   :  { %24 = vsyncpa [#allocation15], 0 }
   0x5   :  { %25 = vsyncpa [#allocation4], 0  ;;  %s4080_s18 = smov [#allocation5]  }
   0x6   :  { %s43_s19 = sshll.u32 %s4080_s18, 4  ;;  %s44_s19 = int_to_ptr.vmem [resolvable:$true] %s43_s19 }
   0x7   :  { %s3896_s20 = scalar_lea.vmem %s44_s19, 256  ;;  %p3901_p1 = scmp.lt.s32.totalorder %s44_s19, %s44_s19 }
   0x8   :  { %p3897_p0 = scmp.ne.s32.totalorder %s44_s19, %s3896_s20  ;;  %p3902_p2 = scmp.lt.s32.totalorder %s3896_s20, %s3896_s20 }
   0xa   :  { %p3903_p3 = por %p3902_p2, %p3901_p1 }
   0xc   :  { %p3904_p4 = pnand %p3903_p3, %p3897_p0 }
   0xe   :  { %3907 = shalt.err (!%p3904_p4)
}
   0xf   :  { %s4081_s21 = smov 128   ;;  %s4082_s22 = smov 8  }
  0x10   :  { %49 = dma.hbm_to_vmem [thread:$0]  %s4699_s2, 256, %s44_s19, [#allocation6], %s4081_s21, %s4081_s21, %s4082_s22  }
  0x11   :  { %s4083_s25 = smov [#allocation8]   ;;  %s4084_s27 = smov [#allocation11]  }
  0x12   :  { %s66_s26 = sshll.u32 %s4083_s25, 4  ;;  %s88_s28 = sshll.u32 %s4084_s27, 4  ;;  %s67_s26 = int_to_ptr.vmem [resolvable:$true] %s66_s26  ;;  %s89_s28 = int_to_ptr.vmem [resolvable:$true] %s88_s28 }
  0x13   :  { %s3916_s29 = scalar_lea.vmem %s67_s26, 64  ;;  %p3921_p6 = scmp.lt.s32.totalorder %s67_s26, %s67_s26 }
  0x14   :  { %p3917_p5 = scmp.ne.s32.totalorder %s67_s26, %s3916_s29  ;;  %p3922_p7 = scmp.lt.s32.totalorder %s3916_s29, %s3916_s29 }
  0x16   :  { %p3923_p8 = por %p3922_p7, %p3921_p6 }
  0x18   :  { %p3924_p9 = pnand %p3923_p8, %p3917_p5 }
  0x1a   :  { %3927 = shalt.err (!%p3924_p9)
}
  0x1b   :  { %69 = dma.hbm_to_vmem [thread:$0]  %s4701_s4, 64, %s67_s26, [#allocation9]  }
  0x1c   :  { %s3936_s17 = scalar_lea.vmem %s89_s28, 16  ;;  %s3940_s2 = scalar_lea.vmem %s89_s28, 32 }
  0x1d   :  { %p3937_p10 = scmp.ne.s32.totalorder %s89_s28, %s3936_s17  ;;  %p3941_p11 = scmp.lt.s32.totalorder %s89_s28, %s89_s28 }
  0x1e   :  { %p3942_p12 = scmp.lt.s32.totalorder %s3940_s2, %s3936_s17 }
  0x20   :  { %p3943_p13 = por %p3942_p12, %p3941_p11 }
  0x22   :  { %p3944_p0 = pnand %p3943_p13, %p3937_p10 }
  0x24   :  { %3947 = shalt.err (!%p3944_p0)
}
  0x25   :  { %91 = dma.hbm_to_vmem [thread:$0]  %s4703_s6, 16, %s89_s28, [#allocation12]  }
  0x26   :  { %s4085_s20 = smov [#allocation2]   ;;  %s4086_s24 = smov [#allocation7]  }
  0x27   :  { %s34_s23 = sshll.u32 %s4085_s20, 4  ;;  %s56_s25 = sshll.u32 %s4086_s24, 4  ;;  %s35_s23 = int_to_ptr.vmem [resolvable:$true] %s34_s23  ;;  %s57_s25 = int_to_ptr.vmem [resolvable:$true] %s56_s25 }
  0x28   :  { %s3956_s27 = scalar_lea.vmem %s35_s23, 64  ;;  %p3961_p2 = scmp.lt.s32.totalorder %s35_s23, %s35_s23 }
  0x29   :  { %p3957_p1 = scmp.ne.s32.totalorder %s35_s23, %s3956_s27  ;;  %p3962_p3 = scmp.lt.s32.totalorder %s3956_s27, %s3956_s27 }
  0x2b   :  { %p3963_p4 = por %p3962_p3, %p3961_p2 }
  0x2d   :  { %p3964_p5 = pnand %p3963_p4, %p3957_p1 }
  0x2f   :  { %3967 = shalt.err (!%p3964_p5)
}
  0x30   :  { %37 = dma.hbm_to_vmem [thread:$0]  %s4698_s1, 64, %s35_s23, [#allocation3]  }
  0x31   :  { %s3976_s29 = scalar_lea.vmem %s57_s25, 16  ;;  %s3980_s6 = scalar_lea.vmem %s57_s25, 32 }
  0x32   :  { %p3977_p6 = scmp.ne.s32.totalorder %s57_s25, %s3976_s29  ;;  %p3981_p7 = scmp.lt.s32.totalorder %s57_s25, %s57_s25 }
  0x33   :  { %p3982_p8 = scmp.lt.s32.totalorder %s3980_s6, %s3976_s29 }
  0x35   :  { %p3983_p9 = por %p3982_p8, %p3981_p7 }
  0x37   :  { %p3984_p10 = pnand %p3983_p9, %p3977_p6 }
  0x39   :  { %3987 = shalt.err (!%p3984_p10)
}
  0x3a   :  { %59 = dma.hbm_to_vmem [thread:$0]  %s4700_s3, 16, %s57_s25, [#allocation6]  }
  0x3b   :  { %s4087_s16 = smov [#allocation10]   ;;  %s4088_s2 = smov [#allocation13]  }
  0x3c   :  { %s75_s17 = sshll.u32 %s4087_s16, 4  ;;  %s99_s18 = sshll.u32 %s4088_s2, 4  ;;  %s76_s17 = int_to_ptr.vmem [resolvable:$true] %s75_s17  ;;  %s100_s18 = int_to_ptr.vmem [resolvable:$true] %s99_s18 }
  0x3d   :  { %s3996_s19 = scalar_lea.vmem %s76_s17, 256  ;;  %p4001_p12 = scmp.lt.s32.totalorder %s76_s17, %s76_s17 }
  0x3e   :  { %p3997_p11 = scmp.ne.s32.totalorder %s76_s17, %s3996_s19  ;;  %p4002_p13 = scmp.lt.s32.totalorder %s3996_s19, %s3996_s19 }
  0x40   :  { %p4003_p0 = por %p4002_p13, %p4001_p12 }
  0x42   :  { %p4004_p1 = pnand %p4003_p0, %p3997_p11 }
  0x44   :  { %4007 = shalt.err (!%p4004_p1)
}
  0x45   :  { %81 = dma.hbm_to_vmem [thread:$0]  %s4702_s5, 256, %s76_s17, [#allocation9], %s4081_s21, %s4081_s21, %s4082_s22  }
  0x46   :  { %s4016_s3 = scalar_lea.vmem %s100_s18, 256  ;;  %p4021_p3 = scmp.lt.s32.totalorder %s100_s18, %s100_s18 }
  0x47   :  { %p4017_p2 = scmp.ne.s32.totalorder %s100_s18, %s4016_s3  ;;  %p4022_p4 = scmp.lt.s32.totalorder %s4016_s3, %s4016_s3 }
  0x49   :  { %p4023_p5 = por %p4022_p4, %p4021_p3 }
  0x4b   :  { %p4024_p6 = pnand %p4023_p5, %p4017_p2 }
  0x4d   :  { %4027 = shalt.err (!%p4024_p6)
}
  0x4e   :  { %105 = dma.hbm_to_vmem [thread:$0]  %s4705_s8, 256, %s100_s18, [#allocation12], %s4081_s21, %s4081_s21, %s4082_s22  }
  0x4f   :  { %s4089_s25 = smov [#allocation14]  }
  0x50   :  { %s115_s27 = sshll.u32 %s4089_s25, 4  ;;  %s116_s27 = int_to_ptr.vmem [resolvable:$true] %s115_s27 }
  0x51   :  { %s4036_s4 = scalar_lea.vmem %s116_s27, 256  ;;  %p4041_p8 = scmp.lt.s32.totalorder %s116_s27, %s116_s27 }
  0x52   :  { %p4037_p7 = scmp.ne.s32.totalorder %s116_s27, %s4036_s4  ;;  %p4042_p9 = scmp.lt.s32.totalorder %s4036_s4, %s4036_s4 }
  0x54   :  { %p4043_p10 = por %p4042_p9, %p4041_p8 }
  0x56   :  { %p4044_p11 = pnand %p4043_p10, %p4037_p7 }
  0x58   :  { %4047 = shalt.err (!%p4044_p11)
}
  0x59   :  { %121 = dma.hbm_to_vmem [thread:$0]  %s4708_s11, 256, %s116_s27, [#allocation15], %s4081_s21, %s4081_s21, %s4082_s22  }
  0x5a   :  { %4068 = dma.done.wait [#allocation3], 64  }
  0x5b   :  { %4069 = vsyncadd [#allocation3], 4294967232 }
  0x5c   :  { %4070 = dma.done.wait [#allocation6], 272  }
  0x5d   :  { %4071 = vsyncadd [#allocation6], 4294967024 }
  0x5e   :  { %4072 = dma.done.wait [#allocation9], 320  }
  0x5f   :  { %4073 = vsyncadd [#allocation9], 4294966976 }
  0x60   :  { %4074 = dma.done.wait [#allocation12], 272  }
  0x61   :  { %4075 = vsyncadd [#allocation12], 4294967024 }
  0x62   :  { %4076 = dma.done.wait [#allocation15], 256  }
  0x63   :  { %4077 = vsyncadd [#allocation15], 4294967040  ;;  %v4090_v0 = vmov 0.0   ;;  %vm4091_vm0 = vmmov 0   ;;  %vm169_vm1 = vcmask 1043456   ;;  %vm162_vm2 = vcmask 31744  }
  0x64   :  { %3468 = vmatprep.subr.mxu1 %v4090_v0  ;;  %3472 = vmatprep.mubr.msk.f32.mxu1 %vm4091_vm0, %v4090_v0  ;;  %v154_v1 = vld [vmem:[#allocation2] sm:$0xf]  ;;  %v4224_v3 = vld [vmem:[%s4697_s0 + $0x8] sm:$0xff]  ;;  %v3290_v6 = vld [vmem:[#allocation7] ss:$0 sm:$0xff]  ;;  %s4093_s29 = smov 16  }
  0x65   :  { %v4219_v2 = vld [vmem:[%s4697_s0] sm:$0xff]  ;;  %3449 = vmatprep.subr.msk.mxu0 %vm169_vm1, %v154_v1  ;;  %v4229_v4 = vld [vmem:[#allocation5 + $0x8] sm:$0xff]  ;;  %s4092_s0 = smov 96   ;;  %s4094_s6 = smov 32   ;;  %vm250_vm3 = vcmask 130048   ;;  %vm2021_vm4 = vcmask 1041408  }
  0x66   :  { %3451 = vmatprep.mubr.msk.f32.mxu0 %vm162_vm2, %v4219_v2  ;;  %3450 = vmatpush3.msk.msra.mxu0 %vm169_vm1, %v154_v1  ;;  %v4236_v5 = vld [vmem:[#allocation5] sm:$0xff]  ;;  %s4095_s28 = smov 80   ;;  %vm2024_vm5 = vcmask 1045504   ;;  %vm2064_vm6 = vcmask 261120   ;;  %vm3269_vm7 = vcmask 17408  }
  0x67   :  { %3469 = vmatpush3.msra.mxu1 %v4229_v4  ;;  %3452 = vmatmul.mubr.msk.f32.vlgmr.msra.gmra.mxu0 %vm162_vm2, %v4224_v3 }
  0x68   :  { %3454 = vmatprep.subr.mxu0 %v4090_v0  ;;  %3458 = vmatprep.mubr.msk.f32.mxu0 %vm4091_vm0, %v4090_v0 }
  0x69   :  { %3455 = vmatpush3.msra.mxu0 %v4229_v4  ;;  %3470 = vmatprep.subr.mxu1 %v4090_v0 }
  0x6a   :  { %3456 = vmatprep.subr.mxu0 %v4090_v0  ;;  %3471 = vmatpush3.msra.mxu1 %v4236_v5 }
  0x6b   :  { %3457 = vmatpush3.msra.mxu0 %v4236_v5  ;;  %3482 = vmatprep.subr.mxu1 %v4090_v0 }
  0x6c   :  { %3459 = vmatmul.mubr.f32.vlgmr.msra.gmra.mxu0 %v4090_v0  ;;  %3461 = vmatprep.subr.mxu0 %v4090_v0 }
  0x6d   :  { %3462 = vmatpush3.msra.mxu0 %v4229_v4  ;;  %3465 = vmatprep.mubr.msk.f32.mxu0 %vm4091_vm0, %v4090_v0 }
  0x6e   :  { %3463 = vmatprep.subr.mxu0 %v4090_v0 }
  0x6f   :  { %3464 = vmatpush3.msra.mxu0 %v4236_v5 }
  0x70   :  { %3475 = vmatprep.subr.mxu0 %v4090_v0 }
 0x127   :  { %v3453_v7 = vpop.f32.mrf.mxu0 }
 0x128   :  { %v4254_v8 = vadd.f32 %v3453_v7, %v3290_v6 }
 0x129   :  { %v239_v9 = vpop.f32.mrf.mxu0 }
 0x12a   :  { %v4256_v10 = vadd.f32 %v3290_v6, %v239_v9 }
 0x12c   :  { %v320_v11 = vpop.f32.mrf.mxu0 }
 0x12d   :  { %v324_v12 = vadd.f32 %v320_v11, %v4256_v10 }
 0x12e   :  { %v3460_v13 = vpop.f32.mrf.mxu0 }
 0x12f   :  { %3684 = vtanh.f32 %v324_v12  ;;  %v3294_v15 = vmul.f32 -1.442695, %v324_v12 }
 0x131   :  { %3686 = vpow2.f32 %v3294_v15 }
 0x13c   :  { %v3685_v14 = vpop.eup %3684 }
 0x13d   :  { %334 = vrot.lane.b32.xlu0 %v3685_v14, %s4092_s0 }
 0x13e   :  { %v3687_v16 = vpop.eup %3686 }
 0x13f   :  { %v328_v17 = vadd.f32 1.0, %v3687_v16 }
 0x141   :  { %3688 = vrcp.f32 %v328_v17 }
 0x14e   :  { %v3689_v18 = vpop.eup %3688 }
 0x14f   :  { %v332_v21 = vmul.f32 0.0, %v3689_v18 }
 0x1af   :  { %v335_v19 = vpop.permute.xlu0 %334 }
 0x1b0   :  { %v337_v20 = vmul.f32 %v3689_v18, %v335_v19 }
 0x1b2   :  { %339 = vrot.lane.b32.xlu0 %v337_v20, %s4093_s29 }
 0x224   :  { %v340_v22 = vpop.permute.xlu0 %339 }
 0x225   :  { %v342_v23 = vadd.f32 %v340_v22, %v332_v21 }
 0x227   :  { %3690 = vtanh.f32 %v342_v23  ;;  %v436_v39 = vrot.slane %v342_v23, 6 }
 0x234   :  { %v3691_v24 = vpop.eup %3690 }
 0x235   :  { %345 = vrot.lane.b32.xlu1 %v3691_v24, %s4094_s6 }
 0x2a7   :  { %v346_v25 = vpop.permute.xlu1 %345 }
 0x2a8   :  { %v4262_v26 = vmul.f32 %v3689_v18, %v346_v25 }
 0x2aa   :  { %350 = vrot.lane.b32.xlu1 %v4262_v26, %s4095_s28 }
 0x31c   :  { %v351_v27 = vpop.permute.xlu1 %350 }
 0x31d   :  { %3466 = vmatmul.mubr.msk.f32.vlgmr.msra.gmra.mxu0 %vm250_vm3, %v351_v27 }
 0x31e   :  { %3476 = vmatpush3.msra.mxu0 %v4229_v4  ;;  %3479 = vmatprep.mubr.msk.f32.mxu0 %vm4091_vm0, %v4090_v0 }
 0x31f   :  { %3477 = vmatprep.subr.mxu0 %v4090_v0 }
 0x320   :  { %3478 = vmatpush3.msra.mxu0 %v4236_v5 }
 0x321   :  { %3489 = vmatprep.subr.mxu0 %v4090_v0 }
 0x3dd   :  { %v420_v28 = vpop.f32.mrf.mxu0 }
 0x3de   :  { %v425_v29 = vrot.slane %v420_v28, 6 }
 0x3df   :  { %v3467_v30 = vpop.f32.mrf.mxu0 }
 0x3e0   :  { %v427_v31 = vadd.f32 %v425_v29, %v4256_v10 }
 0x3e2   :  { %3692 = vtanh.f32 %v427_v31  ;;  %v3296_v33 = vmul.f32 -1.442695, %v427_v31 }
 0x3e4   :  { %3694 = vpow2.f32 %v3296_v33 }
 0x3ef   :  { %v3693_v32 = vpop.eup %3692 }
 0x3f0   :  { %440 = vrot.lane.b32.xlu0 %v3693_v32, %s4092_s0 }
 0x3f1   :  { %v3695_v34 = vpop.eup %3694 }
 0x3f2   :  { %v431_v35 = vadd.f32 1.0, %v3695_v34 }
 0x3f4   :  { %3696 = vrcp.f32 %v431_v35 }
 0x401   :  { %v3697_v36 = vpop.eup %3696 }
 0x402   :  { %v438_v40 = vmul.f32 %v3697_v36, %v436_v39 }
 0x462   :  { %v441_v37 = vpop.permute.xlu0 %440 }
 0x463   :  { %v443_v38 = vmul.f32 %v3697_v36, %v441_v37 }
 0x465   :  { %445 = vrot.lane.b32.xlu1 %v443_v38, %s4093_s29 }
 0x4d7   :  { %v446_v41 = vpop.permute.xlu1 %445 }
 0x4d8   :  { %v448_v42 = vadd.f32 %v446_v41, %v438_v40 }
 0x4da   :  { %3698 = vtanh.f32 %v448_v42  ;;  %v543_v59 = vrot.slane %v448_v42, 6 }
 0x4e7   :  { %v3699_v43 = vpop.eup %3698 }
 0x4e8   :  { %451 = vrot.lane.b32.xlu0 %v3699_v43, %s4094_s6 }
 0x55a   :  { %v452_v44 = vpop.permute.xlu0 %451 }
 0x55b   :  { %v454_v45 = vmul.f32 %v3697_v36, %v452_v44 }
 0x55d   :  { %v456_v46 = vrot.slane %v454_v45, 2  ;;  %v2022_v7 = vsel %vm2021_vm4, %v4262_v26, %v454_v45 }
 0x55f   :  { %457 = vrot.lane.b32.xlu1 %v456_v46, %s4095_s28 }
 0x5d1   :  { %v458_v47 = vpop.permute.xlu1 %457 }
 0x5d2   :  { %3473 = vmatmul.mubr.msk.f32.vlgmr.msra.gmra.mxu1 %vm250_vm3, %v458_v47 }
 0x5d3   :  { %3483 = vmatpush3.msra.mxu1 %v4229_v4  ;;  %3486 = vmatprep.mubr.msk.f32.mxu1 %vm4091_vm0, %v4090_v0 }
 0x5d4   :  { %3484 = vmatprep.subr.mxu1 %v4090_v0 }
 0x5d5   :  { %3485 = vmatpush3.msra.mxu1 %v4236_v5 }
 0x5d6   :  { %3496 = vmatprep.subr.mxu1 %v4090_v0 }
 0x692   :  { %v527_v48 = vpop.f32.mrf.mxu1 }
 0x693   :  { %v532_v49 = vrot.slane %v527_v48, 4 }
 0x694   :  { %v3474_v50 = vpop.f32.mrf.mxu1 }
 0x695   :  { %v534_v51 = vadd.f32 %v532_v49, %v4256_v10 }
 0x697   :  { %3700 = vtanh.f32 %v534_v51  ;;  %v3298_v53 = vmul.f32 -1.442695, %v534_v51 }
 0x699   :  { %3702 = vpow2.f32 %v3298_v53 }
 0x6a4   :  { %v3701_v52 = vpop.eup %3700 }
 0x6a5   :  { %547 = vrot.lane.b32.xlu0 %v3701_v52, %s4092_s0 }
 0x6a6   :  { %v3703_v54 = vpop.eup %3702 }
 0x6a7   :  { %v538_v55 = vadd.f32 1.0, %v3703_v54 }
 0x6a9   :  { %3704 = vrcp.f32 %v538_v55 }
 0x6b6   :  { %v3705_v56 = vpop.eup %3704 }
 0x6b7   :  { %v545_v60 = vmul.f32 %v3705_v56, %v543_v59 }
 0x717   :  { %v548_v57 = vpop.permute.xlu0 %547 }
 0x718   :  { %v550_v58 = vmul.f32 %v3705_v56, %v548_v57 }
 0x71a   :  { %552 = vrot.lane.b32.xlu1 %v550_v58, %s4093_s29 }
 0x78c   :  { %v553_v61 = vpop.permute.xlu1 %552 }
 0x78d   :  { %v555_v62 = vadd.f32 %v553_v61, %v545_v60 }
 0x78f   :  { %3706 = vtanh.f32 %v555_v62  ;;  %v650_v24 = vrot.slane %v555_v62, 6 }
 0x79c   :  { %v3707_v63 = vpop.eup %3706 }
 0x79d   :  { %558 = vrot.lane.b32.xlu0 %v3707_v63, %s4094_s6 }
 0x80f   :  { %v559_v1 = vpop.permute.xlu0 %558 }
 0x810   :  { %v561_v6 = vmul.f32 %v3705_v56, %v559_v1 }
 0x812   :  { %v563_v9 = vrot.slane %v561_v6, 4  ;;  %v2023_v11 = vsel %vm169_vm1, %v2022_v7, %v561_v6 }
 0x814   :  { %564 = vrot.lane.b32.xlu1 %v563_v9, %s4095_s28 }
 0x886   :  { %v565_v12 = vpop.permute.xlu1 %564 }
 0x887   :  { %3480 = vmatmul.mubr.msk.f32.vlgmr.msra.gmra.mxu0 %vm250_vm3, %v565_v12 }
 0x888   :  { %3490 = vmatpush3.msra.mxu0 %v4229_v4  ;;  %3493 = vmatprep.mubr.msk.f32.mxu0 %vm4091_vm0, %v4090_v0 }
 0x889   :  { %3491 = vmatprep.subr.mxu0 %v4090_v0 }
 0x88a   :  { %3492 = vmatpush3.msra.mxu0 %v4236_v5 }
 0x88b   :  { %3503 = vmatprep.subr.mxu0 %v4090_v0 }
 0x947   :  { %v634_v13 = vpop.f32.mrf.mxu0 }
 0x948   :  { %v639_v14 = vrot.slane %v634_v13, 2 }
 0x949   :  { %v3481_v15 = vpop.f32.mrf.mxu0 }
 0x94a   :  { %v641_v16 = vadd.f32 %v639_v14, %v4256_v10 }
 0x94c   :  { %3708 = vtanh.f32 %v641_v16  ;;  %v3300_v18 = vmul.f32 -1.442695, %v641_v16 }
 0x94e   :  { %3710 = vpow2.f32 %v3300_v18 }
 0x959   :  { %v3709_v17 = vpop.eup %3708 }
 0x95a   :  { %654 = vrot.lane.b32.xlu0 %v3709_v17, %s4092_s0 }
 0x95b   :  { %v3711_v19 = vpop.eup %3710 }
 0x95c   :  { %v645_v20 = vadd.f32 1.0, %v3711_v19 }
 0x95e   :  { %3712 = vrcp.f32 %v645_v20 }
 0x96b   :  { %v3713_v21 = vpop.eup %3712 }
 0x96c   :  { %v652_v25 = vmul.f32 %v3713_v21, %v650_v24 }
 0x9cc   :  { %v655_v22 = vpop.permute.xlu0 %654 }
 0x9cd   :  { %v657_v23 = vmul.f32 %v3713_v21, %v655_v22 }
 0x9cf   :  { %659 = vrot.lane.b32.xlu1 %v657_v23, %s4093_s29 }
 0xa41   :  { %v660_v26 = vpop.permute.xlu1 %659 }
 0xa42   :  { %v662_v27 = vadd.f32 %v660_v26, %v652_v25 }
 0xa44   :  { %3714 = vtanh.f32 %v662_v27  ;;  %v754_v43 = vrot.slane %v662_v27, 6  ;;  %v1093_v27 = vld [vmem:[#allocation8] sm:$0xf] }
 0xa51   :  { %v3715_v10 = vpop.eup %3714 }
 0xa52   :  { %665 = vrot.lane.b32.xlu0 %v3715_v10, %s4094_s6  ;;  %v4346_v10 = vld [vmem:[#allocation10 + $0x8] sm:$0xff] }
 0xac4   :  { %v666_v28 = vpop.permute.xlu0 %665 }
 0xac5   :  { %v668_v29 = vmul.f32 %v3713_v21, %v666_v28  ;;  %v4354_v28 = vld [vmem:[#allocation10] sm:$0xff] }
 0xac7   :  { %v670_v30 = vrot.slane %v668_v29, 6  ;;  %v4305_v31 = vsel %vm2024_vm5, %v2023_v11, %v668_v29 }
 0xac9   :  { %671 = vrot.lane.b32.xlu1 %v670_v30, %s4095_s28 }
 0xb3b   :  { %v672_v32 = vpop.permute.xlu1 %671 }
 0xb3c   :  { %3487 = vmatmul.mubr.msk.f32.vlgmr.msra.gmra.mxu1 %vm250_vm3, %v672_v32 }
 0xb3d   :  { %3497 = vmatpush3.msra.mxu1 %v4229_v4  ;;  %3500 = vmatprep.mubr.msk.f32.mxu1 %vm4091_vm0, %v4090_v0 }
 0xb3e   :  { %3498 = vmatprep.subr.mxu1 %v4090_v0 }
 0xb3f   :  { %3499 = vmatpush3.msra.mxu1 %v4236_v5 }
 0xb40   :  { %3510 = vmatprep.subr.msk.mxu1 %vm169_vm1, %v1093_v27 }
 0xbfc   :  { %v741_v33 = vpop.f32.mrf.mxu1 }
 0xbfd   :  { %v745_v34 = vadd.f32 %v741_v33, %v4254_v8 }
 0xbfe   :  { %v3488_v35 = vpop.f32.mrf.mxu1 }
 0xbff   :  { %3716 = vtanh.f32 %v745_v34  ;;  %v3302_v37 = vmul.f32 -1.442695, %v745_v34 }
 0xc01   :  { %3718 = vpow2.f32 %v3302_v37 }
 0xc0c   :  { %v3717_v36 = vpop.eup %3716 }
 0xc0d   :  { %758 = vrot.lane.b32.xlu0 %v3717_v36, %s4092_s0  ;;  %v4381_v36 = vld [vmem:[#allocation11] ss:$0 sm:$0xff] }
 0xc0e   :  { %v3719_v38 = vpop.eup %3718 }
 0xc0f   :  { %v749_v39 = vadd.f32 1.0, %v3719_v38 }
 0xc11   :  { %3720 = vrcp.f32 %v749_v39 }
 0xc1e   :  { %v3721_v40 = vpop.eup %3720 }
 0xc1f   :  { %v756_v44 = vmul.f32 %v3721_v40, %v754_v43 }
 0xc7f   :  { %v759_v41 = vpop.permute.xlu0 %758 }
 0xc80   :  { %v761_v42 = vmul.f32 %v3721_v40, %v759_v41 }
 0xc82   :  { %763 = vrot.lane.b32.xlu1 %v761_v42, %s4093_s29 }
 0xcf4   :  { %v764_v45 = vpop.permute.xlu1 %763 }
 0xcf5   :  { %v766_v46 = vadd.f32 %v764_v45, %v756_v44 }
 0xcf7   :  { %3722 = vtanh.f32 %v766_v46 }
 0xd04   :  { %v3723_v47 = vpop.eup %3722 }
 0xd05   :  { %769 = vrot.lane.b32.xlu0 %v3723_v47, %s4094_s6 }
 0xd77   :  { %v770_v48 = vpop.permute.xlu0 %769 }
 0xd78   :  { %v4318_v49 = vmul.f32 %v3721_v40, %v770_v48 }
 0xd7a   :  { %774 = vrot.lane.b32.xlu1 %v4318_v49, %s4095_s28 }
 0xdec   :  { %v775_v50 = vpop.permute.xlu1 %774 }
 0xded   :  { %3494 = vmatmul.mubr.msk.f32.vlgmr.msra.gmra.mxu0 %vm250_vm3, %v775_v50 }
 0xdee   :  { %3504 = vmatpush3.msra.mxu0 %v4229_v4  ;;  %3507 = vmatprep.mubr.msk.f32.mxu0 %vm4091_vm0, %v4090_v0 }
 0xdef   :  { %3505 = vmatprep.subr.mxu0 %v4090_v0 }
 0xdf0   :  { %3506 = vmatpush3.msra.mxu0 %v4236_v5  ;;  %v860_v5 = vrot.slane %v766_v46, 6 }
 0xdf1   :  { %3515 = vmatprep.subr.mxu0 %v4090_v0 }
 0xead   :  { %v844_v51 = vpop.f32.mrf.mxu0 }
 0xeae   :  { %v849_v52 = vrot.slane %v844_v51, 6 }
 0xeaf   :  { %v3495_v53 = vpop.f32.mrf.mxu0 }
 0xeb0   :  { %v851_v54 = vadd.f32 %v849_v52, %v4254_v8 }
 0xeb2   :  { %3724 = vtanh.f32 %v851_v54  ;;  %v3304_v56 = vmul.f32 -1.442695, %v851_v54 }
 0xeb4   :  { %3726 = vpow2.f32 %v3304_v56 }
 0xebf   :  { %v3725_v55 = vpop.eup %3724 }
 0xec0   :  { %864 = vrot.lane.b32.xlu0 %v3725_v55, %s4092_s0 }
 0xec1   :  { %v3727_v4 = vpop.eup %3726 }
 0xec2   :  { %v855_v57 = vadd.f32 1.0, %v3727_v4 }
 0xec4   :  { %3728 = vrcp.f32 %v855_v57 }
 0xed1   :  { %v3729_v58 = vpop.eup %3728 }
 0xed2   :  { %v862_v61 = vmul.f32 %v3729_v58, %v860_v5 }
 0xf32   :  { %v865_v59 = vpop.permute.xlu0 %864 }
 0xf33   :  { %v867_v60 = vmul.f32 %v3729_v58, %v865_v59 }
 0xf35   :  { %869 = vrot.lane.b32.xlu1 %v867_v60, %s4093_s29 }
 0xfa7   :  { %v870_v62 = vpop.permute.xlu1 %869 }
 0xfa8   :  { %v872_v63 = vadd.f32 %v870_v62, %v862_v61 }
 0xfaa   :  { %3730 = vtanh.f32 %v872_v63 }
 0xfb7   :  { %v3731_v1 = vpop.eup %3730 }
 0xfb8   :  { %875 = vrot.lane.b32.xlu0 %v3731_v1, %s4094_s6 }
0x102a   :  { %v876_v6 = vpop.permute.xlu0 %875 }
0x102b   :  { %v878_v7 = vmul.f32 %v3729_v58, %v876_v6 }
0x102d   :  { %v880_v9 = vrot.slane %v878_v7, 2 }
0x102f   :  { %881 = vrot.lane.b32.xlu1 %v880_v9, %s4095_s28 }
0x10a1   :  { %v882_v11 = vpop.permute.xlu1 %881 }
0x10a2   :  { %3501 = vmatmul.mubr.msk.f32.vlgmr.msra.gmra.mxu1 %vm250_vm3, %v882_v11 }
0x10a3   :  { %3512 = vmatprep.mubr.msk.f32.mxu1 %vm162_vm2, %v4219_v2  ;;  %v967_v2 = vrot.slane %v872_v63, 6  ;;  %3511 = vmatpush3.msk.msra.mxu1 %vm169_vm1, %v1093_v27 }
0x10a4   :  { %3522 = vmatprep.subr.mxu1 %v4090_v0 }
0x10a6   :  { %3513 = vmatmul.mubr.msk.f32.vlgmr.msra.gmra.mxu1 %vm162_vm2, %v4224_v3  ;;  %v2026_v3 = vsel %vm2021_vm4, %v4318_v49, %v878_v7 }
0x10a7   :  { %3523 = vmatpush3.msra.mxu1 %v4346_v10  ;;  %3526 = vmatprep.mubr.msk.f32.mxu1 %vm4091_vm0, %v4090_v0 }
0x10a8   :  { %3524 = vmatprep.subr.mxu1 %v4090_v0 }
0x10a9   :  { %3525 = vmatpush3.msra.mxu1 %v4354_v28 }
0x10aa   :  { %3536 = vmatprep.subr.mxu1 %v4090_v0 }
0x1162   :  { %v951_v12 = vpop.f32.mrf.mxu1 }
0x1163   :  { %v956_v13 = vrot.slane %v951_v12, 4 }
0x1164   :  { %v3502_v14 = vpop.f32.mrf.mxu1 }
0x1165   :  { %v958_v15 = vadd.f32 %v956_v13, %v4254_v8 }
0x1166   :  { %v3514_v38 = vpop.f32.mrf.mxu1 }
0x1167   :  { %3732 = vtanh.f32 %v958_v15  ;;  %v3306_v17 = vmul.f32 -1.442695, %v958_v15  ;;  %v4384_v39 = vadd.f32 %v3514_v38, %v4381_v36 }
0x1168   :  { %v4401_v58 = vpop.f32.mrf.mxu1 }
0x1169   :  { %3734 = vpow2.f32 %v3306_v17 }
0x1174   :  { %v3733_v16 = vpop.eup %3732 }
0x1175   :  { %971 = vrot.lane.b32.xlu0 %v3733_v16, %s4092_s0 }
0x1176   :  { %v3735_v18 = vpop.eup %3734 }
0x1177   :  { %v962_v19 = vadd.f32 1.0, %v3735_v18 }
0x1179   :  { %3736 = vrcp.f32 %v962_v19 }
0x1186   :  { %v3737_v20 = vpop.eup %3736 }
0x1187   :  { %v969_v23 = vmul.f32 %v3737_v20, %v967_v2 }
0x11e7   :  { %v972_v21 = vpop.permute.xlu0 %971 }
0x11e8   :  { %v974_v22 = vmul.f32 %v3737_v20, %v972_v21 }
0x11ea   :  { %976 = vrot.lane.b32.xlu1 %v974_v22, %s4093_s29 }
0x125c   :  { %v977_v24 = vpop.permute.xlu1 %976 }
0x125d   :  { %v4340_v25 = vadd.f32 %v977_v24, %v969_v23 }
0x125f   :  { %3738 = vtanh.f32 %v4340_v25 }
0x126c   :  { %v3739_v26 = vpop.eup %3738 }
0x126d   :  { %982 = vrot.lane.b32.xlu0 %v3739_v26, %s4094_s6 }
0x12df   :  { %v983_v29 = vpop.permute.xlu0 %982 }
0x12e0   :  { %v985_v30 = vmul.f32 %v3737_v20, %v983_v29 }
0x12e2   :  { %v987_v32 = vrot.slane %v985_v30, 4  ;;  %v4362_v33 = vsel %vm169_vm1, %v2026_v3, %v985_v30 }
0x12e4   :  { %988 = vrot.lane.b32.xlu1 %v987_v32, %s4095_s28 }
0x1356   :  { %v989_v34 = vpop.permute.xlu1 %988 }
0x1357   :  { %3508 = vmatmul.mubr.msk.f32.vlgmr.msra.gmra.mxu0 %vm250_vm3, %v989_v34 }
0x1358   :  { %3516 = vmatpush3.msra.mxu0 %v4346_v10  ;;  %3519 = vmatprep.mubr.msk.f32.mxu0 %vm4091_vm0, %v4090_v0 }
0x1359   :  { %3517 = vmatprep.subr.mxu0 %v4090_v0 }
0x135a   :  { %3518 = vmatpush3.msra.mxu0 %v4354_v28 }
0x135b   :  { %3520 = vmatmul.mubr.f32.vlgmr.msra.gmra.mxu0 %v4090_v0  ;;  %3529 = vmatprep.subr.mxu0 %v4090_v0 }
0x135c   :  { %3530 = vmatpush3.msra.mxu0 %v4346_v10  ;;  %3533 = vmatprep.mubr.msk.f32.mxu0 %vm4091_vm0, %v4090_v0 }
0x135d   :  { %3531 = vmatprep.subr.mxu0 %v4090_v0 }
0x135e   :  { %3532 = vmatpush3.msra.mxu0 %v4354_v28 }
0x135f   :  { %3543 = vmatprep.subr.mxu0 %v4090_v0 }
0x1417   :  { %v4379_v35 = vpop.f32.mrf.mxu0 }
0x1419   :  { %v3509_v37 = vpop.f32.mrf.mxu0 }
0x141b   :  { %v1247_v40 = vpop.f32.mrf.mxu0 }
0x141c   :  { %v1252_v41 = vrot.slane %v1247_v40, 2 }
0x141d   :  { %v3521_v42 = vpop.f32.mrf.mxu0 }
0x141e   :  { %v1254_v43 = vadd.f32 %v1252_v41, %v4384_v39 }
0x1420   :  { %3740 = vtanh.f32 %v1254_v43  ;;  %v3313_v45 = vmul.f32 -1.442695, %v1254_v43 }
0x1422   :  { %3742 = vpow2.f32 %v3313_v45 }
0x142d   :  { %v3741_v44 = vpop.eup %3740 }
0x142e   :  { %1264 = vrot.lane.b32.xlu0 %v3741_v44, %s4092_s0 }
0x142f   :  { %v3743_v46 = vpop.eup %3742 }
0x1430   :  { %v1258_v47 = vadd.f32 1.0, %v3743_v46 }
0x1432   :  { %3744 = vrcp.f32 %v1258_v47 }
0x143f   :  { %v3745_v48 = vpop.eup %3744 }
0x1440   :  { %v1262_v51 = vmul.f32 0.0, %v3745_v48 }
0x14a0   :  { %v1265_v49 = vpop.permute.xlu0 %1264 }
0x14a1   :  { %v1267_v50 = vmul.f32 %v3745_v48, %v1265_v49 }
0x14a3   :  { %1269 = vrot.lane.b32.xlu1 %v1267_v50, %s4093_s29 }
0x1515   :  { %v1270_v52 = vpop.permute.xlu1 %1269 }
0x1516   :  { %v1272_v53 = vadd.f32 %v1270_v52, %v1262_v51 }
0x1518   :  { %3746 = vtanh.f32 %v1272_v53  ;;  %v1367_v12 = vrot.slane %v1272_v53, 2 }
0x1525   :  { %v3747_v54 = vpop.eup %3746 }
0x1526   :  { %1275 = vrot.lane.b32.xlu0 %v3747_v54, %s4094_s6 }
0x1598   :  { %v1276_v55 = vpop.permute.xlu0 %1275 }
0x1599   :  { %v4390_v56 = vmul.f32 %v3745_v48, %v1276_v55 }
0x159b   :  { %v1280_v4 = vrot.slane %v4390_v56, 6 }
0x159d   :  { %1281 = vrot.lane.b32.xlu1 %v1280_v4, %s4095_s28 }
0x160f   :  { %v1282_v57 = vpop.permute.xlu1 %1281 }
0x1610   :  { %3527 = vmatmul.mubr.msk.f32.vlgmr.msra.gmra.mxu1 %vm250_vm3, %v1282_v57 }
0x1611   :  { %3537 = vmatpush3.msra.mxu1 %v4346_v10  ;;  %3540 = vmatprep.mubr.msk.f32.mxu1 %vm4091_vm0, %v4090_v0 }
0x1612   :  { %3538 = vmatprep.subr.mxu1 %v4090_v0 }
0x1613   :  { %3539 = vmatpush3.msra.mxu1 %v4354_v28 }
0x1614   :  { %3550 = vmatprep.subr.mxu1 %v4090_v0 }
0x16d0   :  { %v1351_v59 = vpop.f32.mrf.mxu1 }
0x16d1   :  { %v1356_v60 = vrot.slane %v1351_v59, 4 }
0x16d2   :  { %v3528_v5 = vpop.f32.mrf.mxu1 }
0x16d3   :  { %v1358_v61 = vadd.f32 %v1356_v60, %v4384_v39 }
0x16d5   :  { %3748 = vtanh.f32 %v1358_v61  ;;  %v3315_v63 = vmul.f32 -1.442695, %v1358_v61 }
0x16d7   :  { %3750 = vpow2.f32 %v3315_v63 }
0x16e2   :  { %v3749_v62 = vpop.eup %3748 }
0x16e3   :  { %1371 = vrot.lane.b32.xlu0 %v3749_v62, %s4092_s0 }
0x16e4   :  { %v3751_v1 = vpop.eup %3750 }
0x16e5   :  { %v1362_v6 = vadd.f32 1.0, %v3751_v1  ;;  %v4449_v1 = vadd.f32 %v4381_v36, %v4401_v58 }
0x16e7   :  { %3752 = vrcp.f32 %v1362_v6 }
0x16f4   :  { %v3753_v7 = vpop.eup %3752 }
0x16f5   :  { %v1369_v13 = vmul.f32 %v3753_v7, %v1367_v12 }
0x1755   :  { %v1372_v9 = vpop.permute.xlu0 %1371 }
0x1756   :  { %v1374_v11 = vmul.f32 %v3753_v7, %v1372_v9 }
0x1758   :  { %1376 = vrot.lane.b32.xlu1 %v1374_v11, %s4093_s29 }
0x17ca   :  { %v1377_v14 = vpop.permute.xlu1 %1376 }
0x17cb   :  { %v1379_v15 = vadd.f32 %v1377_v14, %v1369_v13 }
0x17cd   :  { %3754 = vtanh.f32 %v1379_v15  ;;  %v1474_v34 = vrot.slane %v1379_v15, 2 }
0x17da   :  { %v3755_v16 = vpop.eup %3754 }
0x17db   :  { %1382 = vrot.lane.b32.xlu0 %v3755_v16, %s4094_s6 }
0x184d   :  { %v1383_v17 = vpop.permute.xlu0 %1382 }
0x184e   :  { %v4407_v18 = vmul.f32 %v3753_v7, %v1383_v17 }
0x1850   :  { %v1387_v19 = vrot.slane %v4407_v18, 4 }
0x1852   :  { %1388 = vrot.lane.b32.xlu1 %v1387_v19, %s4095_s28 }
0x18c4   :  { %v1389_v20 = vpop.permute.xlu1 %1388 }
0x18c5   :  { %3534 = vmatmul.mubr.msk.f32.vlgmr.msra.gmra.mxu0 %vm250_vm3, %v1389_v20 }
0x18c6   :  { %3544 = vmatpush3.msra.mxu0 %v4346_v10  ;;  %3547 = vmatprep.mubr.msk.f32.mxu0 %vm4091_vm0, %v4090_v0 }
0x18c7   :  { %3545 = vmatprep.subr.mxu0 %v4090_v0 }
0x18c8   :  { %3546 = vmatpush3.msra.mxu0 %v4354_v28 }
0x18c9   :  { %3557 = vmatprep.subr.mxu0 %v4090_v0 }
0x1985   :  { %v1458_v21 = vpop.f32.mrf.mxu0 }
0x1986   :  { %v1463_v22 = vrot.slane %v1458_v21, 6 }
0x1987   :  { %v3535_v2 = vpop.f32.mrf.mxu0 }
0x1988   :  { %v1465_v23 = vadd.f32 %v1463_v22, %v4384_v39 }
0x198a   :  { %3756 = vtanh.f32 %v1465_v23  ;;  %v3317_v26 = vmul.f32 -1.442695, %v1465_v23 }
0x198c   :  { %3758 = vpow2.f32 %v3317_v26 }
0x1997   :  { %v3757_v24 = vpop.eup %3756 }
0x1998   :  { %1478 = vrot.lane.b32.xlu0 %v3757_v24, %s4092_s0 }
0x1999   :  { %v3759_v27 = vpop.eup %3758 }
0x199a   :  { %v1469_v29 = vadd.f32 1.0, %v3759_v27 }
0x199c   :  { %3760 = vrcp.f32 %v1469_v29 }
0x19a9   :  { %v3761_v30 = vpop.eup %3760 }
0x19aa   :  { %v1476_v37 = vmul.f32 %v3761_v30, %v1474_v34 }
0x1a0a   :  { %v1479_v3 = vpop.permute.xlu0 %1478 }
0x1a0b   :  { %v1481_v32 = vmul.f32 %v3761_v30, %v1479_v3 }
0x1a0d   :  { %1483 = vrot.lane.b32.xlu1 %v1481_v32, %s4093_s29 }
0x1a7f   :  { %v1484_v38 = vpop.permute.xlu1 %1483 }
0x1a80   :  { %v1486_v40 = vadd.f32 %v1484_v38, %v1476_v37 }
0x1a82   :  { %3762 = vtanh.f32 %v1486_v40  ;;  %v1578_v4 = vrot.slane %v1486_v40, 2 }
0x1a8f   :  { %v3763_v41 = vpop.eup %3762 }
0x1a90   :  { %1489 = vrot.lane.b32.xlu0 %v3763_v41, %s4094_s6 }
0x1b02   :  { %v1490_v42 = vpop.permute.xlu0 %1489 }
0x1b03   :  { %v4422_v43 = vmul.f32 %v3761_v30, %v1490_v42 }
0x1b05   :  { %v1494_v44 = vrot.slane %v4422_v43, 2 }
0x1b07   :  { %1495 = vrot.lane.b32.xlu1 %v1494_v44, %s4095_s28 }
0x1b79   :  { %v1496_v45 = vpop.permute.xlu1 %1495 }
0x1b7a   :  { %3541 = vmatmul.mubr.msk.f32.vlgmr.msra.gmra.mxu1 %vm250_vm3, %v1496_v45 }
0x1b7b   :  { %3551 = vmatpush3.msra.mxu1 %v4346_v10  ;;  %3554 = vmatprep.mubr.msk.f32.mxu1 %vm4091_vm0, %v4090_v0 }
0x1b7c   :  { %3552 = vmatprep.subr.mxu1 %v4090_v0 }
0x1b7d   :  { %3553 = vmatpush3.msra.mxu1 %v4354_v28 }
0x1b7e   :  { %3564 = vmatprep.subr.mxu1 %v4090_v0 }
0x1c3a   :  { %v1565_v46 = vpop.f32.mrf.mxu1 }
0x1c3b   :  { %v1569_v47 = vadd.f32 %v1565_v46, %v4384_v39 }
0x1c3c   :  { %v3542_v48 = vpop.f32.mrf.mxu1 }
0x1c3d   :  { %3764 = vtanh.f32 %v1569_v47  ;;  %v3319_v50 = vmul.f32 -1.442695, %v1569_v47 }
0x1c3f   :  { %3766 = vpow2.f32 %v3319_v50 }
0x1c4a   :  { %v3765_v49 = vpop.eup %3764 }
0x1c4b   :  { %1582 = vrot.lane.b32.xlu0 %v3765_v49, %s4092_s0 }
0x1c4c   :  { %v3767_v51 = vpop.eup %3766 }
0x1c4d   :  { %v1573_v52 = vadd.f32 1.0, %v3767_v51 }
0x1c4f   :  { %3768 = vrcp.f32 %v1573_v52 }
0x1c5c   :  { %v3769_v53 = vpop.eup %3768 }
0x1c5d   :  { %v1580_v57 = vmul.f32 %v3769_v53, %v1578_v4 }
0x1cbd   :  { %v1583_v54 = vpop.permute.xlu0 %1582 }
0x1cbe   :  { %v1585_v55 = vmul.f32 %v3769_v53, %v1583_v54 }
0x1cc0   :  { %1587 = vrot.lane.b32.xlu1 %v1585_v55, %s4093_s29 }
0x1d32   :  { %v1588_v59 = vpop.permute.xlu1 %1587 }
0x1d33   :  { %v1590_v60 = vadd.f32 %v1588_v59, %v1580_v57 }
0x1d35   :  { %3770 = vtanh.f32 %v1590_v60  ;;  %v1684_v36 = vrot.slane %v1590_v60, 2 }
0x1d42   :  { %v3771_v39 = vpop.eup %3770 }
0x1d43   :  { %1593 = vrot.lane.b32.xlu0 %v3771_v39, %s4094_s6 }
0x1db5   :  { %v1594_v5 = vpop.permute.xlu0 %1593 }
0x1db6   :  { %v4437_v61 = vmul.f32 %v3769_v53, %v1594_v5 }
0x1db8   :  { %1598 = vrot.lane.b32.xlu1 %v4437_v61, %s4095_s28 }
0x1e2a   :  { %v1599_v62 = vpop.permute.xlu1 %1598 }
0x1e2b   :  { %3548 = vmatmul.mubr.msk.f32.vlgmr.msra.gmra.mxu0 %vm250_vm3, %v1599_v62 }
0x1e2c   :  { %3558 = vmatpush3.msra.mxu0 %v4346_v10  ;;  %3561 = vmatprep.mubr.msk.f32.mxu0 %vm4091_vm0, %v4090_v0 }
0x1e2d   :  { %3559 = vmatprep.subr.mxu0 %v4090_v0 }
0x1e2e   :  { %3560 = vmatpush3.msra.mxu0 %v4354_v28 }
0x1eeb   :  { %v1668_v63 = vpop.f32.mrf.mxu0 }
0x1eec   :  { %v1673_v6 = vrot.slane %v1668_v63, 2 }
0x1eed   :  { %v3549_v7 = vpop.f32.mrf.mxu0 }
0x1eee   :  { %v1675_v9 = vadd.f32 %v1673_v6, %v4449_v1 }
0x1ef0   :  { %3772 = vtanh.f32 %v1675_v9  ;;  %v3321_v12 = vmul.f32 -1.442695, %v1675_v9  ;;  %v1063_v9 = vrot.slane %v4379_v35, 2 }
0x1ef2   :  { %3774 = vpow2.f32 %v3321_v12 }
0x1efd   :  { %v3773_v11 = vpop.eup %3772 }
0x1efe   :  { %1688 = vrot.lane.b32.xlu0 %v3773_v11, %s4092_s0  ;;  %v1065_v11 = vadd.f32 %v1063_v9, %v4254_v8 }
0x1eff   :  { %v3775_v13 = vpop.eup %3774 }
0x1f00   :  { %v1679_v14 = vadd.f32 1.0, %v3775_v13 }
0x1f02   :  { %3776 = vrcp.f32 %v1679_v14 }
0x1f0f   :  { %v3777_v15 = vpop.eup %3776 }
0x1f10   :  { %v1686_v58 = vmul.f32 %v3777_v15, %v1684_v36 }
0x1f70   :  { %v1689_v16 = vpop.permute.xlu0 %1688 }
0x1f71   :  { %v1691_v17 = vmul.f32 %v3777_v15, %v1689_v16  ;;  %v3308_v16 = vmul.f32 -1.442695, %v1065_v11 }
0x1f73   :  { %1693 = vrot.lane.b32.xlu1 %v1691_v17, %s4093_s29 }
0x1fe5   :  { %v1694_v19 = vpop.permute.xlu1 %1693 }
0x1fe6   :  { %v1696_v20 = vadd.f32 %v1694_v19, %v1686_v58 }
0x1fe8   :  { %3778 = vtanh.f32 %v1696_v20 }
0x1ff5   :  { %v3779_v21 = vpop.eup %3778 }
0x1ff6   :  { %1699 = vrot.lane.b32.xlu0 %v3779_v21, %s4094_s6 }
0x2068   :  { %v1700_v22 = vpop.permute.xlu0 %1699 }
0x2069   :  { %v4455_v2 = vmul.f32 %v3777_v15, %v1700_v22 }
0x206b   :  { %v1704_v23 = vrot.slane %v4455_v2, 6 }
0x206d   :  { %1705 = vrot.lane.b32.xlu1 %v1704_v23, %s4095_s28 }
0x20df   :  { %v1706_v24 = vpop.permute.xlu1 %1705 }
0x20e0   :  { %3555 = vmatmul.mubr.msk.f32.vlgmr.msra.gmra.mxu1 %vm250_vm3, %v1706_v24 }
0x20e1   :  { %3565 = vmatpush3.msra.mxu1 %v4346_v10  ;;  %3568 = vmatprep.mubr.msk.f32.mxu1 %vm4091_vm0, %v4090_v0 }
0x20e2   :  { %3566 = vmatprep.subr.mxu1 %v4090_v0 }
0x20e3   :  { %3567 = vmatpush3.msra.mxu1 %v4354_v28  ;;  %v1791_v28 = vrot.slane %v1696_v20, 2  ;;  %v1074_v20 = vrot.slane %v4340_v25, 6 }
0x20e4   :  { %3582 = vmatprep.subr.mxu1 %v4090_v0 }
0x21a0   :  { %v1775_v26 = vpop.f32.mrf.mxu1 }
0x21a1   :  { %v1780_v27 = vrot.slane %v1775_v26, 4 }
0x21a2   :  { %v3556_v29 = vpop.f32.mrf.mxu1 }
0x21a3   :  { %v1782_v30 = vadd.f32 %v1780_v27, %v4449_v1 }
0x21a5   :  { %3780 = vtanh.f32 %v1782_v30  ;;  %v3323_v32 = vmul.f32 -1.442695, %v1782_v30 }
0x21a7   :  { %3782 = vpow2.f32 %v3323_v32 }
0x21b2   :  { %v3781_v3 = vpop.eup %3780 }
0x21b3   :  { %1795 = vrot.lane.b32.xlu0 %v3781_v3, %s4092_s0 }
0x21b4   :  { %v3783_v10 = vpop.eup %3782 }
0x21b5   :  { %v1786_v34 = vadd.f32 1.0, %v3783_v10 }
0x21b7   :  { %3784 = vrcp.f32 %v1786_v34 }
0x21c4   :  { %v3785_v37 = vpop.eup %3784 }
0x21c5   :  { %v1793_v41 = vmul.f32 %v3785_v37, %v1791_v28 }
0x2225   :  { %v1796_v38 = vpop.permute.xlu0 %1795 }
0x2226   :  { %v1798_v40 = vmul.f32 %v3785_v37, %v1796_v38 }
0x2228   :  { %1800 = vrot.lane.b32.xlu1 %v1798_v40, %s4093_s29 }
0x229a   :  { %v1801_v42 = vpop.permute.xlu1 %1800 }
0x229b   :  { %v1803_v44 = vadd.f32 %v1801_v42, %v1793_v41  ;;  %v2055_v42 = vld [vmem:[%s4704_s7 + $0x10] sm:$0xff] }
0x229d   :  { %3786 = vtanh.f32 %v1803_v44  ;;  %v1898_v5 = vrot.slane %v1803_v44, 2 }
0x22aa   :  { %v3787_v45 = vpop.eup %3786 }
0x22ab   :  { %1806 = vrot.lane.b32.xlu0 %v3787_v45, %s4094_s6 }
0x231d   :  { %v1807_v46 = vpop.permute.xlu0 %1806 }
0x231e   :  { %v4470_v47 = vmul.f32 %v3785_v37, %v1807_v46 }
0x2320   :  { %v1811_v48 = vrot.slane %v4470_v47, 4 }
0x2322   :  { %1812 = vrot.lane.b32.xlu1 %v1811_v48, %s4095_s28 }
0x2394   :  { %v1813_v49 = vpop.permute.xlu1 %1812 }
0x2395   :  { %3562 = vmatmul.mubr.msk.f32.vlgmr.msra.gmra.mxu0 %vm250_vm3, %v1813_v49  ;;  %v2054_v49 = vld [vmem:[%s4704_s7 + $0x8] sm:$0xff] }
0x2455   :  { %v1882_v50 = vpop.f32.mrf.mxu0 }
0x2456   :  { %v1887_v51 = vrot.slane %v1882_v50, 6  ;;  %v2053_v50 = vld [vmem:[%s4704_s7] sm:$0xff] }
0x2457   :  { %v3563_v52 = vpop.f32.mrf.mxu0 }
0x2458   :  { %v1889_v53 = vadd.f32 %v1887_v51, %v4449_v1  ;;  %v4513_v51 = vld [vmem:[#allocation13 + $0x8] sm:$0xff] }
0x245a   :  { %3788 = vtanh.f32 %v1889_v53  ;;  %v3325_v55 = vmul.f32 -1.442695, %v1889_v53  ;;  %v2032_v53 = vsel %vm2021_vm4, %v4437_v61, %v4422_v43 }
0x245c   :  { %3790 = vpow2.f32 %v3325_v55 }
0x2467   :  { %v3789_v54 = vpop.eup %3788 }
0x2468   :  { %1902 = vrot.lane.b32.xlu0 %v3789_v54, %s4092_s0 }
0x2469   :  { %v3791_v4 = vpop.eup %3790 }
0x246a   :  { %v1893_v57 = vadd.f32 1.0, %v3791_v4 }
0x246c   :  { %3792 = vrcp.f32 %v1893_v57  ;;  %v2033_v57 = vsel %vm169_vm1, %v2032_v53, %v4407_v18 }
0x246d   :  { %v2034_v43 = vsel %vm2024_vm5, %v2033_v57, %v4390_v56 }
0x2479   :  { %v3793_v59 = vpop.eup %3792 }
0x247a   :  { %v1900_v62 = vmul.f32 %v3793_v59, %v1898_v5  ;;  %v3328_v5 = vld [vmem:[%s4706_s9] ss:$0 sm:$0xff] }
0x24da   :  { %v1903_v60 = vpop.permute.xlu0 %1902 }
0x24db   :  { %v1905_v39 = vmul.f32 %v3793_v59, %v1903_v60 }
0x24dd   :  { %1907 = vrot.lane.b32.xlu1 %v1905_v39, %s4093_s29 }
0x254f   :  { %v1908_v63 = vpop.permute.xlu1 %1907 }
0x2550   :  { %v1910_v6 = vadd.f32 %v1908_v63, %v1900_v62 }
0x2552   :  { %3794 = vtanh.f32 %v1910_v6  ;;  %v2002_v38 = vrot.slane %v1910_v6, 2 }
0x2553   :  { %3796 = vtanh.f32 %v1065_v11 }
0x2554   :  { %3798 = vpow2.f32 %v3308_v16 }
0x255f   :  { %v3795_v7 = vpop.eup %3794 }
0x2560   :  { %1913 = vrot.lane.b32.xlu0 %v3795_v7, %s4094_s6  ;;  %v3797_v15 = vpop.eup %3796 }
0x2561   :  { %v3799_v17 = vpop.eup %3798 }
0x2562   :  { %v1069_v36 = vadd.f32 1.0, %v3799_v17 }
0x2564   :  { %3800 = vrcp.f32 %v1069_v36 }
0x2571   :  { %v3801_v8 = vpop.eup %3800 }
0x2572   :  { %v1076_v21 = vmul.f32 %v3801_v8, %v1074_v20 }
0x25d2   :  { %v1914_v12 = vpop.permute.xlu0 %1913 }
0x25d3   :  { %v4481_v13 = vmul.f32 %v3793_v59, %v1914_v12 }
0x25d5   :  { %v1918_v14 = vrot.slane %v4481_v13, 2 }
0x25d7   :  { %1919 = vrot.lane.b32.xlu1 %v1918_v14, %s4095_s28 }
0x25db   :  { %1078 = vrot.lane.b32.xlu1 %v3797_v15, %s4092_s0 }
0x2649   :  { %v1920_v58 = vpop.permute.xlu1 %1919 }
0x264a   :  { %3569 = vmatmul.mubr.msk.f32.vlgmr.msra.gmra.mxu1 %vm250_vm3, %v1920_v58 }
0x264b   :  { %3586 = vmatprep.mubr.msk.f32.mxu1 %vm4091_vm0, %v4090_v0  ;;  %3583 = vmatpush3.msra.mxu1 %v4513_v51 }
0x264c   :  { %3584 = vmatprep.subr.mxu1 %v4090_v0 }
0x264d   :  { %v1079_v35 = vpop.permute.xlu1 %1078 }
0x264e   :  { %v1081_v19 = vmul.f32 %v3801_v8, %v1079_v35 }
0x2650   :  { %1083 = vrot.lane.b32.xlu1 %v1081_v19, %s4093_s29 }
0x26c2   :  { %v1084_v22 = vpop.permute.xlu1 %1083 }
0x26c3   :  { %v1086_v23 = vadd.f32 %v1084_v22, %v1076_v21 }
0x26c5   :  { %3802 = vtanh.f32 %v1086_v23 }
0x26d2   :  { %v3803_v24 = vpop.eup %3802 }
0x26d3   :  { %1089 = vrot.lane.b32.xlu1 %v3803_v24, %s4094_s6 }
0x270a   :  { %v1989_v26 = vpop.f32.mrf.mxu1 }
0x270b   :  { %v1993_v27 = vadd.f32 %v1989_v26, %v4449_v1  ;;  %v2056_v1 = vld [vmem:[%s4704_s7 + $0x18] sm:$0xff] }
0x270c   :  { %v3570_v29 = vpop.f32.mrf.mxu1  ;;  %3571 = vmatprep.subr.mxu0 %v2056_v1 }
0x270d   :  { %3804 = vtanh.f32 %v1993_v27  ;;  %v3327_v3 = vmul.f32 -1.442695, %v1993_v27  ;;  %3572 = vmatpush3.msra.mxu0 %v2056_v1 }
0x270e   :  { %3573 = vmatprep.subr.mxu0 %v2055_v42 }
0x270f   :  { %3806 = vpow2.f32 %v3327_v3  ;;  %3574 = vmatpush3.msra.mxu0 %v2055_v42 }
0x2710   :  { %3575 = vmatprep.subr.mxu0 %v2054_v49 }
0x2711   :  { %3576 = vmatpush3.msra.mxu0 %v2054_v49 }
0x2712   :  { %3577 = vmatprep.subr.mxu0 %v2053_v50 }
0x2713   :  { %3578 = vmatpush3.msra.mxu0 %v2053_v50 }
0x2714   :  { %3596 = vmatprep.subr.mxu0 %v4090_v0 }
0x271a   :  { %v3805_v30 = vpop.eup %3804 }
0x271b   :  { %2006 = vrot.lane.b32.xlu0 %v3805_v30, %s4092_s0 }
0x271c   :  { %v3807_v32 = vpop.eup %3806 }
0x271d   :  { %v1997_v10 = vadd.f32 1.0, %v3807_v32 }
0x271f   :  { %3808 = vrcp.f32 %v1997_v10 }
0x272c   :  { %v3809_v25 = vpop.eup %3808 }
0x272d   :  { %v2004_v40 = vmul.f32 %v3809_v25, %v2002_v38 }
0x2745   :  { %v1090_v45 = vpop.permute.xlu1 %1089 }
0x2746   :  { %v1092_v46 = vmul.f32 %v3801_v8, %v1090_v45 }
0x2748   :  { %v2028_v48 = vsel %vm2024_vm5, %v4362_v33, %v1092_v46 }
0x278d   :  { %v2007_v34 = vpop.permute.xlu0 %2006 }
0x278e   :  { %v2009_v37 = vmul.f32 %v3809_v25, %v2007_v34 }
0x2790   :  { %2011 = vrot.lane.b32.xlu0 %v2009_v37, %s4093_s29 }
0x2802   :  { %v2012_v28 = vpop.permute.xlu0 %2011 }
0x2803   :  { %v2014_v41 = vadd.f32 %v2012_v28, %v2004_v40 }
0x2805   :  { %3810 = vtanh.f32 %v2014_v41 }
0x2812   :  { %v3811_v44 = vpop.eup %3810 }
0x2813   :  { %2017 = vrot.lane.b32.xlu0 %v3811_v44, %s4094_s6 }
0x2817   :  { %2037 = vrot.lane.b32.xlu0 %v4305_v31, %s4095_s28  ;;  %v4517_v31 = vld [vmem:[#allocation13] sm:$0xff] }
0x2818   :  { %3585 = vmatpush3.msra.mxu1 %v4517_v31 }
0x2819   :  { %3587 = vmatmul.mubr.f32.vlgmr.msra.gmra.mxu1 %v4090_v0  ;;  %3589 = vmatprep.subr.mxu1 %v4090_v0 }
0x281a   :  { %3590 = vmatpush3.msra.mxu1 %v4513_v51  ;;  %3593 = vmatprep.mubr.msk.f32.mxu1 %vm4091_vm0, %v4090_v0 }
0x281b   :  { %2039 = vrot.lane.b32.xlu0 %v2028_v48, %s4095_s28  ;;  %3591 = vmatprep.subr.mxu1 %v4090_v0 }
0x281c   :  { %3592 = vmatpush3.msra.mxu1 %v4517_v31 }
0x281d   :  { %3603 = vmatprep.subr.mxu1 %v4090_v0 }
0x2885   :  { %v2018_v33 = vpop.permute.xlu0 %2017 }
0x2886   :  { %v2020_v52 = vmul.f32 %v3809_v25, %v2018_v33 }
0x2888   :  { %v2029_v54 = vsel %vm2021_vm4, %v2020_v52, %v4481_v13 }
0x2889   :  { %v2030_v55 = vsel %vm169_vm1, %v2029_v54, %v4470_v47  ;;  %v2038_v61 = vpop.permute.xlu0 %2037 }
0x288a   :  { %v2031_v4 = vsel %vm2024_vm5, %v2030_v55, %v4455_v2 }
0x288b   :  { %2045 = vrot.lane.b32.xlu1 %v2031_v4, %s4092_s0 }
0x288d   :  { %v2040_v60 = vpop.permute.xlu0 %2039 }
0x288f   :  { %2047 = vrot.lane.b32.xlu1 %v2034_v43, %s4092_s0 }
0x28d9   :  { %v2214_v56 = vpop.f32.mrf.mxu1 }
0x28db   :  { %v3588_v18 = vpop.f32.mrf.mxu1 }
0x28fd   :  { %v2046_v59 = vpop.permute.xlu1 %2045 }
0x28fe   :  { %v2051_v47 = vsel %vm250_vm3, %v2038_v61, %v2046_v59 }
0x28ff   :  { %3579 = vmatprep.mubr.msk.f32.mxu0 %vm2064_vm6, %v2051_v47 }
0x2901   :  { %v2048_v39 = vpop.permute.xlu1 %2047 }
0x2902   :  { %v4547_v2 = vsel %vm250_vm3, %v2040_v60, %v2048_v39 }
0x2903   :  { %3580 = vmatmul.mubr.msk.f32.vlgmr.msra.gmra.mxu0 %vm2064_vm6, %v4547_v2 }
0x2904   :  { %3597 = vmatpush3.msra.mxu0 %v4513_v51  ;;  %3600 = vmatprep.mubr.msk.f32.mxu0 %vm4091_vm0, %v4090_v0 }
0x2905   :  { %3598 = vmatprep.subr.mxu0 %v4090_v0 }
0x2906   :  { %3599 = vmatpush3.msra.mxu0 %v4517_v31 }
0x2907   :  { %3610 = vmatprep.subr.mxu0 %v4090_v0 }
0x29c3   :  { %v3581_v62 = vpop.f32.mrf.mxu0 }
0x29c4   :  { %v4560_v63 = vadd.f32 %v3581_v62, %v3328_v5 }
0x29c5   :  { %v2137_v6 = vpop.f32.mrf.mxu0 }
0x29c6   :  { %v4562_v7 = vadd.f32 %v3328_v5, %v2137_v6 }
0x29c8   :  { %v2218_v9 = vadd.f32 %v2214_v56, %v4562_v7 }
0x29ca   :  { %3812 = vtanh.f32 %v2218_v9  ;;  %v3331_v12 = vmul.f32 -1.442695, %v2218_v9 }
0x29cc   :  { %3814 = vpow2.f32 %v3331_v12 }
0x29d7   :  { %v3813_v11 = vpop.eup %3812 }
0x29d8   :  { %2228 = vrot.lane.b32.xlu0 %v3813_v11, %s4092_s0 }
0x29d9   :  { %v3815_v13 = vpop.eup %3814 }
0x29da   :  { %v2222_v14 = vadd.f32 1.0, %v3815_v13 }
0x29dc   :  { %3816 = vrcp.f32 %v2222_v14 }
0x29e9   :  { %v3817_v15 = vpop.eup %3816 }
0x29ea   :  { %v2226_v36 = vmul.f32 0.0, %v3817_v15 }
0x2a4a   :  { %v2229_v16 = vpop.permute.xlu0 %2228 }
0x2a4b   :  { %v2231_v17 = vmul.f32 %v3817_v15, %v2229_v16 }
0x2a4d   :  { %2233 = vrot.lane.b32.xlu1 %v2231_v17, %s4093_s29 }
0x2abf   :  { %v2234_v58 = vpop.permute.xlu1 %2233 }
0x2ac0   :  { %v2236_v8 = vadd.f32 %v2234_v58, %v2226_v36 }
0x2ac2   :  { %3818 = vtanh.f32 %v2236_v8  ;;  %v2330_v34 = vrot.slane %v2236_v8, 6 }
0x2acf   :  { %v3819_v35 = vpop.eup %3818 }
0x2ad0   :  { %2239 = vrot.lane.b32.xlu0 %v3819_v35, %s4094_s6 }
0x2b42   :  { %v2240_v19 = vpop.permute.xlu0 %2239 }
0x2b43   :  { %v2242_v20 = vmul.f32 %v3817_v15, %v2240_v19 }
0x2b45   :  { %2244 = vrot.lane.b32.xlu1 %v2242_v20, %s4095_s28 }
0x2bb7   :  { %v2245_v21 = vpop.permute.xlu1 %2244 }
0x2bb8   :  { %3594 = vmatmul.mubr.msk.f32.vlgmr.msra.gmra.mxu1 %vm250_vm3, %v2245_v21 }
0x2bb9   :  { %3604 = vmatpush3.msra.mxu1 %v4513_v51  ;;  %3607 = vmatprep.mubr.msk.f32.mxu1 %vm4091_vm0, %v4090_v0 }
0x2bba   :  { %3605 = vmatprep.subr.mxu1 %v4090_v0 }
0x2bbb   :  { %3606 = vmatpush3.msra.mxu1 %v4517_v31 }
0x2bbc   :  { %3617 = vmatprep.subr.mxu1 %v4090_v0 }
0x2c78   :  { %v2314_v22 = vpop.f32.mrf.mxu1 }
0x2c79   :  { %v2319_v23 = vrot.slane %v2314_v22, 6 }
0x2c7a   :  { %v3595_v24 = vpop.f32.mrf.mxu1 }
0x2c7b   :  { %v2321_v26 = vadd.f32 %v2319_v23, %v4562_v7 }
0x2c7d   :  { %3820 = vtanh.f32 %v2321_v26  ;;  %v3333_v29 = vmul.f32 -1.442695, %v2321_v26 }
0x2c7f   :  { %3822 = vpow2.f32 %v3333_v29 }
0x2c8a   :  { %v3821_v27 = vpop.eup %3820 }
0x2c8b   :  { %2334 = vrot.lane.b32.xlu0 %v3821_v27, %s4092_s0 }
0x2c8c   :  { %v3823_v30 = vpop.eup %3822 }
0x2c8d   :  { %v2325_v3 = vadd.f32 1.0, %v3823_v30 }
0x2c8f   :  { %3824 = vrcp.f32 %v2325_v3 }
0x2c9c   :  { %v3825_v32 = vpop.eup %3824 }
0x2c9d   :  { %v2332_v37 = vmul.f32 %v3825_v32, %v2330_v34 }
0x2cfd   :  { %v2335_v10 = vpop.permute.xlu0 %2334 }
0x2cfe   :  { %v2337_v25 = vmul.f32 %v3825_v32, %v2335_v10 }
0x2d00   :  { %2339 = vrot.lane.b32.xlu1 %v2337_v25, %s4093_s29 }
0x2d72   :  { %v2340_v38 = vpop.permute.xlu1 %2339 }
0x2d73   :  { %v2342_v40 = vadd.f32 %v2340_v38, %v2332_v37 }
0x2d75   :  { %3826 = vtanh.f32 %v2342_v40  ;;  %v2437_v57 = vrot.slane %v2342_v40, 6 }
0x2d82   :  { %v3827_v28 = vpop.eup %3826 }
0x2d83   :  { %2345 = vrot.lane.b32.xlu0 %v3827_v28, %s4094_s6 }
0x2df5   :  { %v2346_v41 = vpop.permute.xlu0 %2345 }
0x2df6   :  { %v2348_v1 = vmul.f32 %v3825_v32, %v2346_v41 }
0x2df8   :  { %v2350_v42 = vrot.slane %v2348_v1, 2 }
0x2dfa   :  { %2351 = vrot.lane.b32.xlu1 %v2350_v42, %s4095_s28 }
0x2e6c   :  { %v2352_v44 = vpop.permute.xlu1 %2351 }
0x2e6d   :  { %3601 = vmatmul.mubr.msk.f32.vlgmr.msra.gmra.mxu0 %vm250_vm3, %v2352_v44 }
0x2e6e   :  { %3611 = vmatpush3.msra.mxu0 %v4513_v51  ;;  %3614 = vmatprep.mubr.msk.f32.mxu0 %vm4091_vm0, %v4090_v0 }
0x2e6f   :  { %3612 = vmatprep.subr.mxu0 %v4090_v0 }
0x2e70   :  { %3613 = vmatpush3.msra.mxu0 %v4517_v31 }
0x2e71   :  { %3624 = vmatprep.subr.mxu0 %v4090_v0 }
0x2f2d   :  { %v2421_v45 = vpop.f32.mrf.mxu0 }
0x2f2e   :  { %v2426_v46 = vrot.slane %v2421_v45, 4 }
0x2f2f   :  { %v3602_v48 = vpop.f32.mrf.mxu0 }
0x2f30   :  { %v2428_v49 = vadd.f32 %v2426_v46, %v4562_v7 }
0x2f32   :  { %3828 = vtanh.f32 %v2428_v49  ;;  %v3335_v33 = vmul.f32 -1.442695, %v2428_v49 }
0x2f34   :  { %3830 = vpow2.f32 %v3335_v33 }
0x2f3f   :  { %v3829_v50 = vpop.eup %3828 }
0x2f40   :  { %2441 = vrot.lane.b32.xlu0 %v3829_v50, %s4092_s0 }
0x2f41   :  { %v3831_v52 = vpop.eup %3830 }
0x2f42   :  { %v2432_v53 = vadd.f32 1.0, %v3831_v52 }
0x2f44   :  { %3832 = vrcp.f32 %v2432_v53 }
0x2f51   :  { %v3833_v54 = vpop.eup %3832 }
0x2f52   :  { %v2439_v43 = vmul.f32 %v3833_v54, %v2437_v57 }
0x2fb2   :  { %v2442_v55 = vpop.permute.xlu0 %2441 }
0x2fb3   :  { %v2444_v4 = vmul.f32 %v3833_v54, %v2442_v55 }
0x2fb5   :  { %2446 = vrot.lane.b32.xlu1 %v2444_v4, %s4093_s29 }
0x3027   :  { %v2447_v61 = vpop.permute.xlu1 %2446 }
0x3028   :  { %v2449_v59 = vadd.f32 %v2447_v61, %v2439_v43 }
0x302a   :  { %3834 = vtanh.f32 %v2449_v59  ;;  %v2544_v36 = vrot.slane %v2449_v59, 6 }
0x3037   :  { %v3835_v47 = vpop.eup %3834 }
0x3038   :  { %2452 = vrot.lane.b32.xlu0 %v3835_v47, %s4094_s6 }
0x30aa   :  { %v2453_v60 = vpop.permute.xlu0 %2452 }
0x30ab   :  { %v2455_v39 = vmul.f32 %v3833_v54, %v2453_v60  ;;  %v2990_v60 = vld [vmem:[%s4707_s10 + $0x18] sm:$0xff] }
0x30ad   :  { %v2457_v56 = vrot.slane %v2455_v39, 4 }
0x30af   :  { %2458 = vrot.lane.b32.xlu1 %v2457_v56, %s4095_s28  ;;  %v2989_v56 = vld [vmem:[%s4707_s10 + $0x10] sm:$0xff] }
0x3121   :  { %v2459_v18 = vpop.permute.xlu1 %2458 }
0x3122   :  { %3608 = vmatmul.mubr.msk.f32.vlgmr.msra.gmra.mxu1 %vm250_vm3, %v2459_v18  ;;  %v2988_v18 = vld [vmem:[%s4707_s10 + $0x8] sm:$0xff] }
0x3123   :  { %3618 = vmatpush3.msra.mxu1 %v4513_v51  ;;  %3621 = vmatprep.mubr.msk.f32.mxu1 %vm4091_vm0, %v4090_v0 }
0x3124   :  { %3619 = vmatprep.subr.mxu1 %v4090_v0 }
0x3125   :  { %3620 = vmatpush3.msra.mxu1 %v4517_v31 }
0x3126   :  { %3631 = vmatprep.subr.mxu1 %v4090_v0 }
0x31e2   :  { %v2528_v5 = vpop.f32.mrf.mxu1 }
0x31e3   :  { %v2533_v62 = vrot.slane %v2528_v5, 2  ;;  %v2987_v5 = vld [vmem:[%s4707_s10] sm:$0xff] }
0x31e4   :  { %v3609_v6 = vpop.f32.mrf.mxu1 }
0x31e5   :  { %v2535_v9 = vadd.f32 %v2533_v62, %v4562_v7  ;;  %v2998_v62 = vrot.slane %v4547_v2, 6 }
0x31e7   :  { %3836 = vtanh.f32 %v2535_v9  ;;  %v3337_v12 = vmul.f32 -1.442695, %v2535_v9 }
0x31e9   :  { %3838 = vpow2.f32 %v3337_v12 }
0x31f4   :  { %v3837_v11 = vpop.eup %3836 }
0x31f5   :  { %2548 = vrot.lane.b32.xlu0 %v3837_v11, %s4092_s0 }
0x31f6   :  { %v3839_v13 = vpop.eup %3838 }
0x31f7   :  { %v2539_v14 = vadd.f32 1.0, %v3839_v13 }
0x31f9   :  { %3840 = vrcp.f32 %v2539_v14 }
0x3206   :  { %v3841_v15 = vpop.eup %3840 }
0x3207   :  { %v2546_v58 = vmul.f32 %v3841_v15, %v2544_v36 }
0x3267   :  { %v2549_v16 = vpop.permute.xlu0 %2548 }
0x3268   :  { %v2551_v17 = vmul.f32 %v3841_v15, %v2549_v16 }
0x326a   :  { %2553 = vrot.lane.b32.xlu1 %v2551_v17, %s4093_s29 }
0x32dc   :  { %v2554_v8 = vpop.permute.xlu1 %2553 }
0x32dd   :  { %v2556_v35 = vadd.f32 %v2554_v8, %v2546_v58 }
0x32df   :  { %3842 = vtanh.f32 %v2556_v35  ;;  %v2648_v34 = vrot.slane %v2556_v35, 6 }
0x32ec   :  { %v3843_v7 = vpop.eup %3842 }
0x32ed   :  { %2559 = vrot.lane.b32.xlu0 %v3843_v7, %s4094_s6 }
0x335f   :  { %v2560_v19 = vpop.permute.xlu0 %2559 }
0x3360   :  { %v2562_v20 = vmul.f32 %v3841_v15, %v2560_v19 }
0x3362   :  { %v2564_v21 = vrot.slane %v2562_v20, 6 }
0x3364   :  { %2565 = vrot.lane.b32.xlu1 %v2564_v21, %s4095_s28 }
0x33d6   :  { %v2566_v22 = vpop.permute.xlu1 %2565 }
0x33d7   :  { %3615 = vmatmul.mubr.msk.f32.vlgmr.msra.gmra.mxu0 %vm250_vm3, %v2566_v22 }
0x33d8   :  { %3625 = vmatpush3.msra.mxu0 %v4513_v51  ;;  %3628 = vmatprep.mubr.msk.f32.mxu0 %vm4091_vm0, %v4090_v0 }
0x33d9   :  { %3626 = vmatprep.subr.mxu0 %v4090_v0 }
0x33da   :  { %3627 = vmatpush3.msra.mxu0 %v4517_v31 }
0x33db   :  { %3638 = vmatprep.subr.mxu0 %v4090_v0 }
0x3497   :  { %v2635_v23 = vpop.f32.mrf.mxu0 }
0x3498   :  { %v2639_v24 = vadd.f32 %v2635_v23, %v4560_v63 }
0x3499   :  { %v3616_v26 = vpop.f32.mrf.mxu0 }
0x349a   :  { %3844 = vtanh.f32 %v2639_v24  ;;  %v3339_v29 = vmul.f32 -1.442695, %v2639_v24  ;;  %v3072_v26 = vld [vmem:[#allocation14 + $0x8] sm:$0xff] }
0x349c   :  { %3846 = vpow2.f32 %v3339_v29  ;;  %v3071_v29 = vld [vmem:[#allocation14] sm:$0xff] }
0x34a7   :  { %v3845_v27 = vpop.eup %3844 }
0x34a8   :  { %2652 = vrot.lane.b32.xlu0 %v3845_v27, %s4092_s0 }
0x34a9   :  { %v3847_v30 = vpop.eup %3846 }
0x34aa   :  { %v2643_v3 = vadd.f32 1.0, %v3847_v30  ;;  %v3346_v30 = vld [vmem:[%s4709_s12] ss:$0 sm:$0xff] }
0x34ac   :  { %3848 = vrcp.f32 %v2643_v3 }
0x34b9   :  { %v3849_v32 = vpop.eup %3848 }
0x34ba   :  { %v2650_v37 = vmul.f32 %v3849_v32, %v2648_v34 }
0x351a   :  { %v2653_v10 = vpop.permute.xlu0 %2652 }
0x351b   :  { %v2655_v25 = vmul.f32 %v3849_v32, %v2653_v10 }
0x351d   :  { %2657 = vrot.lane.b32.xlu1 %v2655_v25, %s4093_s29 }
0x358f   :  { %v2658_v38 = vpop.permute.xlu1 %2657 }
0x3590   :  { %v2660_v40 = vadd.f32 %v2658_v38, %v2650_v37 }
0x3592   :  { %3850 = vtanh.f32 %v2660_v40 }
0x359f   :  { %v3851_v28 = vpop.eup %3850 }
0x35a0   :  { %2663 = vrot.lane.b32.xlu0 %v3851_v28, %s4094_s6 }
0x3612   :  { %v2664_v41 = vpop.permute.xlu0 %2663 }
0x3613   :  { %v2666_v1 = vmul.f32 %v3849_v32, %v2664_v41 }
0x3615   :  { %2668 = vrot.lane.b32.xlu1 %v2666_v1, %s4095_s28 }
0x3687   :  { %v2669_v42 = vpop.permute.xlu1 %2668 }
0x3688   :  { %3622 = vmatmul.mubr.msk.f32.vlgmr.msra.gmra.mxu1 %vm250_vm3, %v2669_v42 }
0x3689   :  { %3632 = vmatpush3.msra.mxu1 %v4513_v51  ;;  %3635 = vmatprep.mubr.msk.f32.mxu1 %vm4091_vm0, %v4090_v0 }
0x368a   :  { %3633 = vmatprep.subr.mxu1 %v4090_v0 }
0x368b   :  { %3634 = vmatpush3.msra.mxu1 %v4517_v31  ;;  %v2754_v31 = vrot.slane %v2660_v40, 6 }
0x368c   :  { %3649 = vmatprep.subr.mxu1 %v4090_v0 }
0x3748   :  { %v2738_v44 = vpop.f32.mrf.mxu1 }
0x3749   :  { %v2743_v45 = vrot.slane %v2738_v44, 6 }
0x374a   :  { %v3623_v46 = vpop.f32.mrf.mxu1 }
0x374b   :  { %v2745_v48 = vadd.f32 %v2743_v45, %v4560_v63 }
0x374d   :  { %3852 = vtanh.f32 %v2745_v48  ;;  %v3341_v50 = vmul.f32 -1.442695, %v2745_v48 }
0x374f   :  { %3854 = vpow2.f32 %v3341_v50 }
0x375a   :  { %v3853_v49 = vpop.eup %3852 }
0x375b   :  { %2758 = vrot.lane.b32.xlu0 %v3853_v49, %s4092_s0 }
0x375c   :  { %v3855_v51 = vpop.eup %3854 }
0x375d   :  { %v2749_v33 = vadd.f32 1.0, %v3855_v51 }
0x375f   :  { %3856 = vrcp.f32 %v2749_v33 }
0x376c   :  { %v3857_v52 = vpop.eup %3856 }
0x376d   :  { %v2756_v55 = vmul.f32 %v3857_v52, %v2754_v31 }
0x37cd   :  { %v2759_v53 = vpop.permute.xlu0 %2758 }
0x37ce   :  { %v2761_v54 = vmul.f32 %v3857_v52, %v2759_v53 }
0x37d0   :  { %2763 = vrot.lane.b32.xlu1 %v2761_v54, %s4093_s29 }
0x3842   :  { %v2764_v4 = vpop.permute.xlu1 %2763 }
0x3843   :  { %v2766_v57 = vadd.f32 %v2764_v4, %v2756_v55 }
0x3845   :  { %3858 = vtanh.f32 %v2766_v57  ;;  %v2861_v35 = vrot.slane %v2766_v57, 6 }
0x3852   :  { %v3859_v43 = vpop.eup %3858 }
0x3853   :  { %2769 = vrot.lane.b32.xlu0 %v3859_v43, %s4094_s6 }
0x38c5   :  { %v2770_v61 = vpop.permute.xlu0 %2769 }
0x38c6   :  { %v2772_v59 = vmul.f32 %v3857_v52, %v2770_v61 }
0x38c8   :  { %v2774_v47 = vrot.slane %v2772_v59, 2 }
0x38ca   :  { %2775 = vrot.lane.b32.xlu1 %v2774_v47, %s4095_s28  ;;  %v3181_v47 = vld [vmem:[%s4710_s13 + $0x18] sm:$0xff] }
0x393c   :  { %v2776_v39 = vpop.permute.xlu1 %2775 }
0x393d   :  { %3629 = vmatmul.mubr.msk.f32.vlgmr.msra.gmra.mxu0 %vm250_vm3, %v2776_v39  ;;  %v3179_v39 = vld [vmem:[%s4710_s13 + $0x8] sm:$0xff] }
0x393e   :  { %3639 = vmatpush3.msra.mxu0 %v2990_v60  ;;  %3646 = vmatprep.mubr.msk.f32.mxu0 %vm4091_vm0, %v4090_v0  ;;  %v3180_v60 = vld [vmem:[%s4710_s13 + $0x10] sm:$0xff] }
0x393f   :  { %3640 = vmatprep.subr.mxu0 %v4090_v0 }
0x3940   :  { %3641 = vmatpush3.msra.mxu0 %v2989_v56  ;;  %v3178_v56 = vld [vmem:[%s4710_s13] sm:$0xff]  ;;  %s4096_s13 = smov [#allocation16]  }
0x3941   :  { %3642 = vmatprep.subr.mxu0 %v4090_v0 }
0x3942   :  { %3643 = vmatpush3.msra.mxu0 %v2988_v18 }
0x3943   :  { %3644 = vmatprep.subr.mxu0 %v4090_v0 }
0x3944   :  { %3645 = vmatpush3.msra.mxu0 %v2987_v5 }
0x3945   :  { %3647 = vmatmul.mubr.msk.f32.vlgmr.msra.gmra.mxu0 %vm2064_vm6, %v2998_v62 }
0x39fd   :  { %v2845_v6 = vpop.f32.mrf.mxu0 }
0x39fe   :  { %v2850_v9 = vrot.slane %v2845_v6, 4 }
0x39ff   :  { %v3630_v11 = vpop.f32.mrf.mxu0 }
0x3a00   :  { %v2852_v12 = vadd.f32 %v2850_v9, %v4560_v63 }
0x3a02   :  { %3860 = vtanh.f32 %v2852_v12  ;;  %v3343_v16 = vmul.f32 -1.442695, %v2852_v12 }
0x3a04   :  { %3862 = vpow2.f32 %v3343_v16 }
0x3a05   :  { %v3067_v13 = vpop.f32.mrf.mxu0 }
0x3a06   :  { %v3068_v25 = vadd.f32 %v3346_v30, %v3067_v13 }
0x3a07   :  { %v3648_v14 = vpop.f32.mrf.mxu0 }
0x3a0f   :  { %v3861_v15 = vpop.eup %3860 }
0x3a10   :  { %2865 = vrot.lane.b32.xlu0 %v3861_v15, %s4092_s0 }
0x3a11   :  { %v3863_v17 = vpop.eup %3862 }
0x3a12   :  { %v2856_v2 = vadd.f32 1.0, %v3863_v17 }
0x3a14   :  { %3864 = vrcp.f32 %v2856_v2 }
0x3a21   :  { %v3865_v36 = vpop.eup %3864 }
0x3a22   :  { %v2863_v7 = vmul.f32 %v3865_v36, %v2861_v35 }
0x3a82   :  { %v2866_v58 = vpop.permute.xlu0 %2865 }
0x3a83   :  { %v2868_v8 = vmul.f32 %v3865_v36, %v2866_v58 }
0x3a85   :  { %2870 = vrot.lane.b32.xlu1 %v2868_v8, %s4093_s29 }
0x3af7   :  { %v2871_v19 = vpop.permute.xlu1 %2870 }
0x3af8   :  { %v2873_v20 = vadd.f32 %v2871_v19, %v2863_v7 }
0x3afa   :  { %3866 = vtanh.f32 %v2873_v20  ;;  %v2968_v53 = vrot.slane %v2873_v20, 6 }
0x3b07   :  { %v3867_v21 = vpop.eup %3866 }
0x3b08   :  { %2876 = vrot.lane.b32.xlu0 %v3867_v21, %s4094_s6 }
0x3b7a   :  { %v2877_v22 = vpop.permute.xlu0 %2876 }
0x3b7b   :  { %v2879_v23 = vmul.f32 %v3865_v36, %v2877_v22 }
0x3b7d   :  { %v2881_v24 = vrot.slane %v2879_v23, 4 }
0x3b7f   :  { %2882 = vrot.lane.b32.xlu1 %v2881_v24, %s4095_s28 }
0x3bf1   :  { %v2883_v27 = vpop.permute.xlu1 %2882 }
0x3bf2   :  { %3636 = vmatmul.mubr.msk.f32.vlgmr.msra.gmra.mxu1 %vm250_vm3, %v2883_v27 }
0x3bf3   :  { %3650 = vmatpush3.msra.mxu1 %v3072_v26  ;;  %3653 = vmatprep.mubr.msk.f32.mxu1 %vm4091_vm0, %v4090_v0 }
0x3bf4   :  { %3651 = vmatprep.subr.mxu1 %v4090_v0 }
0x3bf5   :  { %3652 = vmatpush3.msra.mxu1 %v3071_v29 }
0x3bf6   :  { %3654 = vmatmul.mubr.f32.vlgmr.msra.gmra.mxu1 %v4090_v0  ;;  %3656 = vmatprep.subr.mxu1 %v4090_v0 }
0x3bf7   :  { %3664 = vmatprep.mubr.msk.f32.mxu1 %vm4091_vm0, %v4090_v0  ;;  %3657 = vmatpush3.msra.mxu1 %v3181_v47 }
0x3bf8   :  { %3658 = vmatprep.subr.mxu1 %v4090_v0 }
0x3bf9   :  { %3659 = vmatpush3.msra.mxu1 %v3180_v60 }
0x3bfa   :  { %3660 = vmatprep.subr.mxu1 %v4090_v0 }
0x3bfb   :  { %3661 = vmatpush3.msra.mxu1 %v3179_v39 }
0x3bfc   :  { %3662 = vmatprep.subr.mxu1 %v4090_v0  ;;  %v3349_v0 = vld [vmem:[%s4711_s14] ss:$0 sm:$0xff] }
0x3bfd   :  { %3663 = vmatpush3.msra.mxu1 %v3178_v56 }
0x3cb2   :  { %v2952_v3 = vpop.f32.mrf.mxu1 }
0x3cb3   :  { %v2957_v32 = vrot.slane %v2952_v3, 2 }
0x3cb4   :  { %v3637_v10 = vpop.f32.mrf.mxu1 }
0x3cb5   :  { %v2959_v34 = vadd.f32 %v2957_v32, %v4560_v63 }
0x3cb6   :  { %v3139_v37 = vpop.f32.mrf.mxu1 }
0x3cb7   :  { %3868 = vtanh.f32 %v2959_v34  ;;  %v3143_v38 = vadd.f32 %v3139_v37, %v3068_v25  ;;  %v3345_v1 = vmul.f32 -1.442695, %v2959_v34 }
0x3cb8   :  { %v3655_v40 = vpop.f32.mrf.mxu1 }
0x3cb9   :  { %3870 = vtanh.f32 %v3143_v38  ;;  %v3348_v42 = vmul.f32 -1.442695, %v3143_v38 }
0x3cba   :  { %3872 = vpow2.f32 %v3345_v1 }
0x3cbb   :  { %3874 = vpow2.f32 %v3348_v42 }
0x3cc4   :  { %v3869_v28 = vpop.eup %3868 }
0x3cc5   :  { %2972 = vrot.lane.b32.xlu1 %v3869_v28, %s4092_s0 }
0x3cc6   :  { %v3871_v41 = vpop.eup %3870 }
0x3cc7   :  { %3153 = vrot.lane.b32.xlu0 %v3871_v41, %s4092_s0  ;;  %v3873_v44 = vpop.eup %3872 }
0x3cc8   :  { %v3875_v45 = vpop.eup %3874  ;;  %v2963_v46 = vadd.f32 1.0, %v3873_v44 }
0x3cc9   :  { %v3147_v48 = vadd.f32 1.0, %v3875_v45 }
0x3cca   :  { %3876 = vrcp.f32 %v2963_v46 }
0x3ccb   :  { %3878 = vrcp.f32 %v3147_v48 }
0x3cd7   :  { %v3877_v63 = vpop.eup %3876 }
0x3cd8   :  { %v3879_v51 = vpop.eup %3878  ;;  %v2970_v54 = vmul.f32 %v3877_v63, %v2968_v53 }
0x3cd9   :  { %v3151_v4 = vmul.f32 0.0, %v3879_v51 }
0x3d37   :  { %v2973_v49 = vpop.permute.xlu1 %2972 }
0x3d38   :  { %v2975_v50 = vmul.f32 %v3877_v63, %v2973_v49 }
0x3d39   :  { %v3154_v33 = vpop.permute.xlu0 %3153 }
0x3d3a   :  { %2977 = vrot.lane.b32.xlu1 %v2975_v50, %s4093_s29  ;;  %v3156_v52 = vmul.f32 %v3879_v51, %v3154_v33 }
0x3d3c   :  { %3158 = vrot.lane.b32.xlu0 %v3156_v52, %s4093_s29 }
0x3dac   :  { %v2978_v31 = vpop.permute.xlu1 %2977 }
0x3dad   :  { %v2980_v55 = vadd.f32 %v2978_v31, %v2970_v54 }
0x3dae   :  { %v3159_v57 = vpop.permute.xlu0 %3158 }
0x3daf   :  { %3880 = vtanh.f32 %v2980_v55  ;;  %v3161_v43 = vadd.f32 %v3159_v57, %v3151_v4 }
0x3db1   :  { %3882 = vtanh.f32 %v3161_v43 }
0x3dbc   :  { %v3881_v61 = vpop.eup %3880 }
0x3dbd   :  { %2983 = vrot.lane.b32.xlu1 %v3881_v61, %s4094_s6 }
0x3dbe   :  { %v3883_v59 = vpop.eup %3882 }
0x3dbf   :  { %3164 = vrot.lane.b32.xlu0 %v3883_v59, %s4094_s6 }
0x3e2f   :  { %v2984_v18 = vpop.permute.xlu1 %2983 }
0x3e30   :  { %v2986_v5 = vmul.f32 %v3877_v63, %v2984_v18 }
0x3e31   :  { %v3165_v62 = vpop.permute.xlu0 %3164 }
0x3e32   :  { %3169 = vrot.lane.b32.xlu0 %v2986_v5, %s4095_s28  ;;  %v3167_v6 = vmul.f32 %v3879_v51, %v3165_v62 }
0x3e34   :  { %v3173_v9 = vrot.slane %v3167_v6, 2 }
0x3e36   :  { %3174 = vrot.lane.b32.xlu1 %v3173_v9, %s4092_s0  ;;  %s3277_s0 = sshll.u32 %s4096_s13, 4  ;;  %s3278_s0 = int_to_ptr.vmem [resolvable:$true] %s3277_s0 }
0x3e37   :  { %s4048_s28 = scalar_lea.vmem %s3278_s0, 32  ;;  %p4053_p13 = scmp.lt.s32.totalorder %s3278_s0, %s3278_s0 }
0x3e38   :  { %p4049_p12 = scmp.ne.s32.totalorder %s3278_s0, %s4048_s28  ;;  %p4054_p0 = scmp.lt.s32.totalorder %s4048_s28, %s4048_s28 }
0x3e3a   :  { %p4055_p1 = por %p4054_p0, %p4053_p13 }
0x3e3c   :  { %p4056_p2 = pnand %p4055_p1, %p4049_p12 }
0x3ea4   :  { %v3170_v11 = vpop.permute.xlu0 %3169 }
0x3ea8   :  { %v3175_v12 = vpop.permute.xlu1 %3174 }
0x3ea9   :  { %v3177_v13 = vsel %vm250_vm3, %v3170_v11, %v3175_v12 }
0x3eaa   :  { %v3190_v14 = vrot.slane %v3177_v13, 6 }
0x3eac   :  { %3665 = vmatmul.mubr.msk.f32.vlgmr.msra.gmra.mxu1 %vm2064_vm6, %v3190_v14 }
0x3f6c   :  { %v3259_v15 = vpop.f32.mrf.mxu1 }
0x3f6d   :  { %v3260_v16 = vadd.f32 %v3349_v0, %v3259_v15 }
0x3f6e   :  { %v3666_v17 = vpop.f32.mrf.mxu1 }
0x3f6f   :  { %v3351_v2 = vmul.f32 -1.442695, %v3260_v16 }
0x3f71   :  { %3884 = vpow2.f32 %v3351_v2 }
0x3f7e   :  { %v3885_v36 = vpop.eup %3884 }
0x3f7f   :  { %v3266_v58 = vadd.f32 1.0, %v3885_v36 }
0x3f81   :  { %3886 = vrcp.f32 %v3266_v58 }
0x3f8e   :  { %v3887_v8 = vpop.eup %3886 }
0x3f8f   :  { %3270 = vst.msk [vmem:[#allocation16] sm:$0x3] %vm3269_vm7, %v3887_v8 }
0x3f90   :  { %4059 = shalt.err (!%p4056_p2)
}
0x3f91   :  { %3280 = dma.vmem_to_hbm [thread:$0]  %s3278_s0, 32, %s4712_s15, [#allocation4]  }
0x3f92   :  { %4078 = dma.done.wait [#allocation4], 32  }
0x3f93   :  { %4079 = vsyncadd [#allocation4], 4294967264 }
0x3f94   :  { %3284 = vsyncpa [#allocation3], 1 }
0x3f95   :  { %3285 = vsyncpa [#allocation6], 1 }
0x3f96   :  { %3286 = vsyncpa [#allocation9], 1 }
0x3f97   :  { %3287 = vsyncpa [#allocation12], 1 }
0x3f98   :  { %3288 = vsyncpa [#allocation15], 1 }
0x3f99   :  { %3289 = vsyncpa [#allocation4], 1 }

</bundles_post_ra>
